<compile_context>
chip_gen: v5e
topology: v5e:2x2
jax: 0.10.0
libtpu: 0.0.40
codegen_flags: <defaults>
</compile_context>

<pallas_src>
import numpy as np
import jax
import jax.numpy as jnp
from jax.experimental import pallas as pl
from jax.experimental.pallas import tpu as pltpu

_VMEM = pl.BlockSpec(memory_space=pltpu.MemorySpace.VMEM)

_CONV_CFG = [(1, 3, 2), (3, 3, 1), (3, 8, 2), (8, 8, 1),
             (8, 16, 2), (16, 16, 1), (16, 32, 2), (32, 32, 1)]  # (Cin, Cout, stride)


# ----------------------------- host-side constant packing -----------------------------

def _reflect_idx(p, L):
    # padded coordinate p in [0, L+1] -> original coordinate (ReflectionPad2d(1))
    if p == 0:
        return 1
    if p == L + 1:
        return L - 2
    return p - 1


class _Packer:
    """Packs 2-D f32 constants into one blob; items start at 8-aligned rows."""

    def __init__(self, width=64):
        self.width = width
        self.items = []
        self.offsets = []
        self.rows = 0

    def add(self, arr):
        arr = np.asarray(arr, np.float32)
        r, c = arr.shape
        assert c <= self.width, (r, c, self.width)
        off = self.rows
        self.items.append(arr)
        self.offsets.append(off)
        self.rows += ((r + 7) // 8) * 8
        return (off, r, c)

    def finalize(self):
        buf = np.zeros((max(self.rows, 8), self.width), np.float32)
        for arr, off in zip(self.items, self.offsets):
            r, c = arr.shape
            buf[off:off + r, :c] = arr
        return jnp.asarray(buf)


def prepare_fused_params(conv_params, lin_w, lin_b, N, H0=32):
    """Fold pad/stride/conv/flatten layouts into constants packed in ONE blob."""
    pk = _Packer(width=64)
    layers = []
    H = H0
    for (w, _b, gamma, beta, stride) in conv_params:
        w_np = np.asarray(w, np.float32)              # (Cout, Cin, 3, 3)
        cout, cin = w_np.shape[0], w_np.shape[1]
        Wd = H                                        # square activations
        Ho = (H - 1) // stride + 1
        Wo = (Wd - 1) // stride + 1

        # Row-selection (reflection pad + stride), samples interleaved h-major.
        S_slots = []
        for kh in range(3):
            if stride == 1 and kh == 1:
                S_slots.append(None)                  # identity -> skipped in kernel
                continue
            Sb = np.zeros((Ho, H), np.float32)
            for ho in range(Ho):
                Sb[ho, _reflect_idx(stride * ho + kh, H)] = 1.0
            S_slots.append(pk.add(np.kron(Sb, np.eye(N, dtype=np.float32))))

        # Lane-mixing conv matrices (pad + 3x3 taps + stride over W and channels).
        W_slots = []
        for kh in range(3):
            Wm = np.zeros((cin * Wd, cout * Wo), np.float32)
            for kw in range(3):
                for wo in range(Wo):
                    wc = _reflect_idx(stride * wo + kw, Wd)
                    rows_i = np.arange(cin) * Wd + wc
                    cols_i = np.arange(cout) * Wo + wo
                    Wm[np.ix_(rows_i, cols_i)] += w_np[:, :, kh, kw].T
            W_slots.append(pk.add(Wm))

        # BN channel pooling / broadcast matrices + gamma/beta.
        P = np.zeros((cout * Wo, cout), np.float32)
        P[np.arange(cout * Wo), np.repeat(np.arange(cout), Wo)] = 1.0
        p_slot = pk.add(P)
        pt_slot = pk.add(np.ascontiguousarray(P.T))
        gb = np.stack([np.asarray(gamma, np.float32).reshape(-1),
                       np.asarray(beta, np.float32).reshape(-1)], axis=0)
        gb_slot = pk.add(gb)

        layers.append(dict(stride=stride, H=H, Ho=Ho, Wo=Wo, cin=cin, cout=cout,
                           S=S_slots, W=W_slots, P=p_slot, PT=pt_slot, gb=gb_slot))
        H = Ho

    # Linear(128, 10): fold the PyTorch NCHW flatten order into per-row weights.
    lw = np.asarray(lin_w, np.float32)                # (10, C*Hl*Wl)
    C = conv_params[-1][0].shape[0]
    Hl = Wl = H
    wl_slots = []
    for h in range(Hl):
        WLh = np.zeros((C * Wl, lw.shape[0]), np.float32)
        for c in range(C):
            for wcol in range(Wl):
                WLh[c * Wl + wcol, :] = lw[:, c * Hl * Wl + h * Wl + wcol]
        wl_slots.append(pk.add(WLh))
    bl_slot = pk.add(np.asarray(lin_b, np.float32).reshape(1, -1))

    blob = pk.finalize()
    meta = dict(layers=layers, wl=wl_slots, bl=bl_slot, N=N, H0=H0)
    return meta, blob


# ----------------------------- fused Pallas kernel -----------------------------

def make_kernel(meta):
    layers = meta["layers"]
    wl_slots = meta["wl"]
    bl_slot = meta["bl"]
    N = meta["N"]

    def kernel(x_ref, c_ref, o_ref):
        def cl(slot):                       # static window load from the const blob
            off, r, c = slot
            return c_ref[pl.ds(off, r), pl.ds(0, c)]

        a = x_ref[...]                      # (N*H, Cin*W), rows ordered h*N + n

        for L in layers:
            # --- ReflectionPad2d(1) + Conv2d(3x3, stride): row-select + lane-mix ---
            rows = []
            for kh in range(3):
                if L["S"][kh] is None:      # stride-1, kh=1 -> identity selection
                    rows.append(a)
                else:
                    rows.append(jnp.dot(cl(L["S"][kh]), a,
                                        preferred_element_type=jnp.float32))
            # back-to-back accumulating dots (MRB-friendly on v7x)
            y = jnp.dot(rows[0], cl(L["W"][0]), preferred_element_type=jnp.float32)
            y = y + jnp.dot(rows[1], cl(L["W"][1]), preferred_element_type=jnp.float32)
            y = y + jnp.dot(rows[2], cl(L["W"][2]), preferred_element_type=jnp.float32)
            # y: (N*Ho, Cout*Wo)

            # --- BatchNorm2d, training mode (batch stats, biased var, eps=1e-5) ---
            colsums = jnp.concatenate(
                [jnp.sum(y, axis=0, keepdims=True),
                 jnp.sum(y * y, axis=0, keepdims=True)], axis=0)     # (2, Cout*Wo)
            stats = jnp.dot(colsums, cl(L["P"]),
                            preferred_element_type=jnp.float32)       # (2, Cout)
            inv_m = 1.0 / float(N * L["Ho"] * L["Wo"])
            mean = stats[0:1, :] * inv_m
            var = stats[1:2, :] * inv_m - mean * mean
            gb = cl(L["gb"])
            scale = gb[0:1, :] * jax.lax.rsqrt(var + 1e-5)             # gamma*rsqrt
            shift = gb[1:2, :] - mean * scale                          # beta - mean*scale
            ss = jnp.dot(jnp.concatenate([scale, shift], axis=0), cl(L["PT"]),
                         preferred_element_type=jnp.float32)           # (2, Cout*Wo)

            # --- folded BN affine + LeakyReLU(0.2) ---
            z = y * ss[0:1, :] + ss[1:2, :]
            a = jnp.where(z > 0, z, 0.2 * z)

        # --- Flatten (NCHW order folded into weights) + Linear(128, 10) ---
        out = cl(bl_slot)                                              # (1, 10)
        for h, slot in enumerate(wl_slots):
            out = out + jnp.dot(a[h * N:(h + 1) * N, :], cl(slot),
                                preferred_element_type=jnp.float32)    # (N, 10)
        o_ref[...] = out

    return kernel


def build_fused_forward(meta):
    kernel = make_kernel(meta)
    N, H0 = meta["N"], meta["H0"]

    @jax.jit
    def forward(x_nchw, const_blob):
        x = x_nchw[:, 0, :, :].astype(jnp.float32)             # Cin=1 -> (N, H0, H0)
        x = jnp.transpose(x, (1, 0, 2)).reshape(H0 * N, H0)    # h-major sample stack
        return pl.pallas_call(
            kernel,
            out_shape=jax.ShapeDtypeStruct((N, 10), jnp.float32),
            in_specs=[_VMEM, _VMEM],
            out_specs=_VMEM,
        )(x, const_blob)

    return forward


# ---------------------- deterministic parameter initialization ----------------------

def init_params(key):
    conv_params = []
    for cin, cout, stride in _CONV_CFG:
        key, wk = jax.random.split(key)
        fan_in, fan_out = cin * 9, cout * 9
        std = (2.0 / (fan_in + fan_out)) ** 0.5                 # xavier_normal_
        w = jax.random.normal(wk, (cout, cin, 3, 3), jnp.float32) * std
        b = jnp.zeros((1, cout), jnp.float32)                   # conv bias zeroed
        gamma = jnp.ones((1, cout), jnp.float32)                # BN weight = 1
        beta = jnp.zeros((1, cout), jnp.float32)                # BN bias = 0
        conv_params.append((w, b, gamma, beta, stride))
    key, lk = jax.random.split(key)
    lin_w = jax.random.normal(lk, (10, 128), jnp.float32) * 0.01  # normal(0, 0.01)
    lin_b = jnp.zeros((10,), jnp.float32)
    return conv_params, lin_w, lin_b, key


# ------------------------------ plain-JAX reference ------------------------------

def reference_forward(x_nchw, conv_params, lin_w, lin_b):
    x = x_nchw.astype(jnp.float32)
    for (w, b, gamma, beta, stride) in conv_params:
        xp = jnp.pad(x, ((0, 0), (0, 0), (1, 1), (1, 1)), mode="reflect")
        y = jax.lax.conv_general_dilated(
            xp, w, (stride, stride), "VALID",
            dimension_numbers=("NCHW", "OIHW", "NCHW"),
            precision=jax.lax.Precision.HIGHEST)
        y = y + b.reshape(1, -1, 1, 1)
        mean = jnp.mean(y, axis=(0, 2, 3), keepdims=True)
        var = jnp.mean((y - mean) ** 2, axis=(0, 2, 3), keepdims=True)
        y = ((y - mean) * jax.lax.rsqrt(var + 1e-5) * gamma.reshape(1, -1, 1, 1)
             + beta.reshape(1, -1, 1, 1))
        x = jnp.where(y > 0, y, 0.2 * y)
    flat = x.reshape(x.shape[0], -1)
    return jnp.dot(flat, lin_w.T, precision=jax.lax.Precision.HIGHEST) + lin_b.reshape(1, -1)


if __name__ == "__main__":
    key = jax.random.PRNGKey(0)
    conv_params, lin_w, lin_b, key = init_params(key)

    key, xk = jax.random.split(key)
    # Input must be (N, 1, 32, 32) so the flattened feature is 32*2*2 = 128.
    N = 2
    x = jax.random.normal(xk, (N, 1, 32, 32), jnp.float32)

    meta, const_blob = prepare_fused_params(conv_params, lin_w, lin_b, N)
    fused_forward = build_fused_forward(meta)

    out = fused_forward(x, const_blob)
    out = jax.block_until_ready(out)
    assert out.shape == (N, 10) and out.dtype == jnp.float32

    ref = jax.block_until_ready(reference_forward(x, conv_params, lin_w, lin_b))
    err = float(jnp.max(jnp.abs(out - ref)))
    assert err < 1e-2, f"fused kernel mismatch vs reference: max|diff|={err}"

    print("KERNEL_OK")
</pallas_src>

<mosaic_0001>
module attributes {stable_mosaic.version = 11 : i64} {
  func.func @kernel(%arg0: memref<64x32xf32, #tpu.memory_space<vmem>>, %arg1: memref<2472x64xf32, #tpu.memory_space<vmem>>, %arg2: memref<2x10xf32, #tpu.memory_space<vmem>>) attributes {dimension_semantics = [], scalar_prefetch = 0 : i64, scratch_operands = 0 : i64, tpu.core_type = #tpu.core_type<tc>} {
    %c0 = arith.constant 0 : index
    %c0_0 = arith.constant 0 : index
    %0 = vector.load %arg0[%c0, %c0_0] : memref<64x32xf32, #tpu.memory_space<vmem>>, vector<64x32xf32>
    %c0_1 = arith.constant 0 : index
    %c0_2 = arith.constant 0 : index
    %1 = vector.load %arg1[%c0_1, %c0_2] : memref<2472x64xf32, #tpu.memory_space<vmem>>, vector<32x64xf32>
    %cst = arith.constant dense<0.000000e+00> : vector<32x32xf32>
    %2 = tpu.matmul %1, %0, %cst {dimension_numbers = #tpu.dot_dimension_numbers<[1], [0], [0], [1], [0, 0, 1, 1], [], []>} : vector<32x64xf32>, vector<64x32xf32>, vector<32x32xf32> -> vector<32x32xf32>
    %c32 = arith.constant 32 : index
    %c0_3 = arith.constant 0 : index
    %3 = vector.load %arg1[%c32, %c0_3] : memref<2472x64xf32, #tpu.memory_space<vmem>>, vector<32x64xf32>
    %cst_4 = arith.constant dense<0.000000e+00> : vector<32x32xf32>
    %4 = tpu.matmul %3, %0, %cst_4 {dimension_numbers = #tpu.dot_dimension_numbers<[1], [0], [0], [1], [0, 0, 1, 1], [], []>} : vector<32x64xf32>, vector<64x32xf32>, vector<32x32xf32> -> vector<32x32xf32>
    %c64 = arith.constant 64 : index
    %c0_5 = arith.constant 0 : index
    %5 = vector.load %arg1[%c64, %c0_5] : memref<2472x64xf32, #tpu.memory_space<vmem>>, vector<32x64xf32>
    %cst_6 = arith.constant dense<0.000000e+00> : vector<32x32xf32>
    %6 = tpu.matmul %5, %0, %cst_6 {dimension_numbers = #tpu.dot_dimension_numbers<[1], [0], [0], [1], [0, 0, 1, 1], [], []>} : vector<32x64xf32>, vector<64x32xf32>, vector<32x32xf32> -> vector<32x32xf32>
    %c96 = arith.constant 96 : index
    %c0_7 = arith.constant 0 : index
    %7 = vector.load %arg1[%c96, %c0_7] : memref<2472x64xf32, #tpu.memory_space<vmem>>, vector<32x48xf32>
    %cst_8 = arith.constant dense<0.000000e+00> : vector<32x48xf32>
    %8 = tpu.matmul %2, %7, %cst_8 {dimension_numbers = #tpu.dot_dimension_numbers<[1], [0], [0], [1], [0, 0, 1, 1], [], []>} : vector<32x32xf32>, vector<32x48xf32>, vector<32x48xf32> -> vector<32x48xf32>
    %c128 = arith.constant 128 : index
    %c0_9 = arith.constant 0 : index
    %9 = vector.load %arg1[%c128, %c0_9] : memref<2472x64xf32, #tpu.memory_space<vmem>>, vector<32x48xf32>
    %cst_10 = arith.constant dense<0.000000e+00> : vector<32x48xf32>
    %10 = tpu.matmul %4, %9, %cst_10 {dimension_numbers = #tpu.dot_dimension_numbers<[1], [0], [0], [1], [0, 0, 1, 1], [], []>} : vector<32x32xf32>, vector<32x48xf32>, vector<32x48xf32> -> vector<32x48xf32>
    %11 = arith.addf %8, %10 : vector<32x48xf32>
    %c160 = arith.constant 160 : index
    %c0_11 = arith.constant 0 : index
    %12 = vector.load %arg1[%c160, %c0_11] : memref<2472x64xf32, #tpu.memory_space<vmem>>, vector<32x48xf32>
    %cst_12 = arith.constant dense<0.000000e+00> : vector<32x48xf32>
    %13 = tpu.matmul %6, %12, %cst_12 {dimension_numbers = #tpu.dot_dimension_numbers<[1], [0], [0], [1], [0, 0, 1, 1], [], []>} : vector<32x32xf32>, vector<32x48xf32>, vector<32x48xf32> -> vector<32x48xf32>
    %14 = arith.addf %11, %13 : vector<32x48xf32>
    %cst_13 = arith.constant dense<0.000000e+00> : vector<48xf32>
    %15 = vector.multi_reduction <add>, %14, %cst_13 [0] : vector<32x48xf32> to vector<48xf32>
    %16 = vector.shape_cast %15 : vector<48xf32> to vector<1x48xf32>
    %17 = arith.mulf %14, %14 : vector<32x48xf32>
    %cst_14 = arith.constant dense<0.000000e+00> : vector<48xf32>
    %18 = vector.multi_reduction <add>, %17, %cst_14 [0] : vector<32x48xf32> to vector<48xf32>
    %19 = vector.shape_cast %18 : vector<48xf32> to vector<1x48xf32>
    %20 = tpu.concatenate %16, %19 in 0 : vector<1x48xf32>, vector<1x48xf32> -> vector<2x48xf32>
    %c192 = arith.constant 192 : index
    %c0_15 = arith.constant 0 : index
    %21 = vector.load %arg1[%c192, %c0_15] : memref<2472x64xf32, #tpu.memory_space<vmem>>, vector<48x3xf32>
    %cst_16 = arith.constant dense<0.000000e+00> : vector<2x3xf32>
    %22 = tpu.matmul %20, %21, %cst_16 {dimension_numbers = #tpu.dot_dimension_numbers<[1], [0], [0], [1], [0, 0, 1, 1], [], []>} : vector<2x48xf32>, vector<48x3xf32>, vector<2x3xf32> -> vector<2x3xf32>
    %23 = vector.extract_strided_slice %22 {offsets = [0, 0], sizes = [1, 3], strides = [1, 1]} : vector<2x3xf32> to vector<1x3xf32>
    %cst_17 = arith.constant 0.001953125 : f32
    %24 = vector.broadcast %cst_17 : f32 to vector<1x3xf32>
    %25 = arith.mulf %23, %24 : vector<1x3xf32>
    %26 = vector.extract_strided_slice %22 {offsets = [1, 0], sizes = [1, 3], strides = [1, 1]} : vector<2x3xf32> to vector<1x3xf32>
    %cst_18 = arith.constant 0.001953125 : f32
    %27 = vector.broadcast %cst_18 : f32 to vector<1x3xf32>
    %28 = arith.mulf %26, %27 : vector<1x3xf32>
    %29 = arith.mulf %25, %25 : vector<1x3xf32>
    %30 = arith.subf %28, %29 : vector<1x3xf32>
    %c248 = arith.constant 248 : index
    %c0_19 = arith.constant 0 : index
    %31 = vector.load %arg1[%c248, %c0_19] : memref<2472x64xf32, #tpu.memory_space<vmem>>, vector<2x3xf32>
    %32 = vector.extract_strided_slice %31 {offsets = [0, 0], sizes = [1, 3], strides = [1, 1]} : vector<2x3xf32> to vector<1x3xf32>
    %cst_20 = arith.constant 9.99999974E-6 : f32
    %33 = vector.broadcast %cst_20 : f32 to vector<1x3xf32>
    %34 = arith.addf %30, %33 : vector<1x3xf32>
    %35 = math.rsqrt %34 : vector<1x3xf32>
    %36 = arith.mulf %32, %35 : vector<1x3xf32>
    %37 = vector.extract_strided_slice %31 {offsets = [1, 0], sizes = [1, 3], strides = [1, 1]} : vector<2x3xf32> to vector<1x3xf32>
    %38 = arith.mulf %25, %36 : vector<1x3xf32>
    %39 = arith.subf %37, %38 : vector<1x3xf32>
    %40 = tpu.concatenate %36, %39 in 0 : vector<1x3xf32>, vector<1x3xf32> -> vector<2x3xf32>
    %c240 = arith.constant 240 : index
    %c0_21 = arith.constant 0 : index
    %41 = vector.load %arg1[%c240, %c0_21] : memref<2472x64xf32, #tpu.memory_space<vmem>>, vector<3x48xf32>
    %cst_22 = arith.constant dense<0.000000e+00> : vector<2x48xf32>
    %42 = tpu.matmul %40, %41, %cst_22 {dimension_numbers = #tpu.dot_dimension_numbers<[1], [0], [0], [1], [0, 0, 1, 1], [], []>} : vector<2x3xf32>, vector<3x48xf32>, vector<2x48xf32> -> vector<2x48xf32>
    %43 = vector.extract_strided_slice %42 {offsets = [0, 0], sizes = [1, 48], strides = [1, 1]} : vector<2x48xf32> to vector<1x48xf32>
    %44 = vector.broadcast %43 : vector<1x48xf32> to vector<32x48xf32>
    %45 = arith.mulf %14, %44 : vector<32x48xf32>
    %46 = vector.extract_strided_slice %42 {offsets = [1, 0], sizes = [1, 48], strides = [1, 1]} : vector<2x48xf32> to vector<1x48xf32>
    %47 = vector.broadcast %46 : vector<1x48xf32> to vector<32x48xf32>
    %48 = arith.addf %45, %47 : vector<32x48xf32>
    %cst_23 = arith.constant 0.000000e+00 : f32
    %49 = vector.broadcast %cst_23 : f32 to vector<32x48xf32>
    %50 = arith.cmpf ogt, %48, %49 : vector<32x48xf32>
    %cst_24 = arith.constant 2.000000e-01 : f32
    %51 = vector.broadcast %cst_24 : f32 to vector<32x48xf32>
    %52 = arith.mulf %51, %48 : vector<32x48xf32>
    %53 = arith.select %50, %48, %52 : vector<32x48xi1>, vector<32x48xf32>
    %c256 = arith.constant 256 : index
    %c0_25 = arith.constant 0 : index
    %54 = vector.load %arg1[%c256, %c0_25] : memref<2472x64xf32, #tpu.memory_space<vmem>>, vector<32x32xf32>
    %cst_26 = arith.constant dense<0.000000e+00> : vector<32x48xf32>
    %55 = tpu.matmul %54, %53, %cst_26 {dimension_numbers = #tpu.dot_dimension_numbers<[1], [0], [0], [1], [0, 0, 1, 1], [], []>} : vector<32x32xf32>, vector<32x48xf32>, vector<32x48xf32> -> vector<32x48xf32>
    %c288 = arith.constant 288 : index
    %c0_27 = arith.constant 0 : index
    %56 = vector.load %arg1[%c288, %c0_27] : memref<2472x64xf32, #tpu.memory_space<vmem>>, vector<32x32xf32>
    %cst_28 = arith.constant dense<0.000000e+00> : vector<32x48xf32>
    %57 = tpu.matmul %56, %53, %cst_28 {dimension_numbers = #tpu.dot_dimension_numbers<[1], [0], [0], [1], [0, 0, 1, 1], [], []>} : vector<32x32xf32>, vector<32x48xf32>, vector<32x48xf32> -> vector<32x48xf32>
    %c320 = arith.constant 320 : index
    %c0_29 = arith.constant 0 : index
    %58 = vector.load %arg1[%c320, %c0_29] : memref<2472x64xf32, #tpu.memory_space<vmem>>, vector<48x48xf32>
    %cst_30 = arith.constant dense<0.000000e+00> : vector<32x48xf32>
    %59 = tpu.matmul %55, %58, %cst_30 {dimension_numbers = #tpu.dot_dimension_numbers<[1], [0], [0], [1], [0, 0, 1, 1], [], []>} : vector<32x48xf32>, vector<48x48xf32>, vector<32x48xf32> -> vector<32x48xf32>
    %c368 = arith.constant 368 : index
    %c0_31 = arith.constant 0 : index
    %60 = vector.load %arg1[%c368, %c0_31] : memref<2472x64xf32, #tpu.memory_space<vmem>>, vector<48x48xf32>
    %cst_32 = arith.constant dense<0.000000e+00> : vector<32x48xf32>
    %61 = tpu.matmul %53, %60, %cst_32 {dimension_numbers = #tpu.dot_dimension_numbers<[1], [0], [0], [1], [0, 0, 1, 1], [], []>} : vector<32x48xf32>, vector<48x48xf32>, vector<32x48xf32> -> vector<32x48xf32>
    %62 = arith.addf %59, %61 : vector<32x48xf32>
    %c416 = arith.constant 416 : index
    %c0_33 = arith.constant 0 : index
    %63 = vector.load %arg1[%c416, %c0_33] : memref<2472x64xf32, #tpu.memory_space<vmem>>, vector<48x48xf32>
    %cst_34 = arith.constant dense<0.000000e+00> : vector<32x48xf32>
    %64 = tpu.matmul %57, %63, %cst_34 {dimension_numbers = #tpu.dot_dimension_numbers<[1], [0], [0], [1], [0, 0, 1, 1], [], []>} : vector<32x48xf32>, vector<48x48xf32>, vector<32x48xf32> -> vector<32x48xf32>
    %65 = arith.addf %62, %64 : vector<32x48xf32>
    %cst_35 = arith.constant dense<0.000000e+00> : vector<48xf32>
    %66 = vector.multi_reduction <add>, %65, %cst_35 [0] : vector<32x48xf32> to vector<48xf32>
    %67 = vector.shape_cast %66 : vector<48xf32> to vector<1x48xf32>
    %68 = arith.mulf %65, %65 : vector<32x48xf32>
    %cst_36 = arith.constant dense<0.000000e+00> : vector<48xf32>
    %69 = vector.multi_reduction <add>, %68, %cst_36 [0] : vector<32x48xf32> to vector<48xf32>
    %70 = vector.shape_cast %69 : vector<48xf32> to vector<1x48xf32>
    %71 = tpu.concatenate %67, %70 in 0 : vector<1x48xf32>, vector<1x48xf32> -> vector<2x48xf32>
    %c464 = arith.constant 464 : index
    %c0_37 = arith.constant 0 : index
    %72 = vector.load %arg1[%c464, %c0_37] : memref<2472x64xf32, #tpu.memory_space<vmem>>, vector<48x3xf32>
    %cst_38 = arith.constant dense<0.000000e+00> : vector<2x3xf32>
    %73 = tpu.matmul %71, %72, %cst_38 {dimension_numbers = #tpu.dot_dimension_numbers<[1], [0], [0], [1], [0, 0, 1, 1], [], []>} : vector<2x48xf32>, vector<48x3xf32>, vector<2x3xf32> -> vector<2x3xf32>
    %74 = vector.extract_strided_slice %73 {offsets = [0, 0], sizes = [1, 3], strides = [1, 1]} : vector<2x3xf32> to vector<1x3xf32>
    %cst_39 = arith.constant 0.001953125 : f32
    %75 = vector.broadcast %cst_39 : f32 to vector<1x3xf32>
    %76 = arith.mulf %74, %75 : vector<1x3xf32>
    %77 = vector.extract_strided_slice %73 {offsets = [1, 0], sizes = [1, 3], strides = [1, 1]} : vector<2x3xf32> to vector<1x3xf32>
    %cst_40 = arith.constant 0.001953125 : f32
    %78 = vector.broadcast %cst_40 : f32 to vector<1x3xf32>
    %79 = arith.mulf %77, %78 : vector<1x3xf32>
    %80 = arith.mulf %76, %76 : vector<1x3xf32>
    %81 = arith.subf %79, %80 : vector<1x3xf32>
    %c520 = arith.constant 520 : index
    %c0_41 = arith.constant 0 : index
    %82 = vector.load %arg1[%c520, %c0_41] : memref<2472x64xf32, #tpu.memory_space<vmem>>, vector<2x3xf32>
    %83 = vector.extract_strided_slice %82 {offsets = [0, 0], sizes = [1, 3], strides = [1, 1]} : vector<2x3xf32> to vector<1x3xf32>
    %cst_42 = arith.constant 9.99999974E-6 : f32
    %84 = vector.broadcast %cst_42 : f32 to vector<1x3xf32>
    %85 = arith.addf %81, %84 : vector<1x3xf32>
    %86 = math.rsqrt %85 : vector<1x3xf32>
    %87 = arith.mulf %83, %86 : vector<1x3xf32>
    %88 = vector.extract_strided_slice %82 {offsets = [1, 0], sizes = [1, 3], strides = [1, 1]} : vector<2x3xf32> to vector<1x3xf32>
    %89 = arith.mulf %76, %87 : vector<1x3xf32>
    %90 = arith.subf %88, %89 : vector<1x3xf32>
    %91 = tpu.concatenate %87, %90 in 0 : vector<1x3xf32>, vector<1x3xf32> -> vector<2x3xf32>
    %c512 = arith.constant 512 : index
    %c0_43 = arith.constant 0 : index
    %92 = vector.load %arg1[%c512, %c0_43] : memref<2472x64xf32, #tpu.memory_space<vmem>>, vector<3x48xf32>
    %cst_44 = arith.constant dense<0.000000e+00> : vector<2x48xf32>
    %93 = tpu.matmul %91, %92, %cst_44 {dimension_numbers = #tpu.dot_dimension_numbers<[1], [0], [0], [1], [0, 0, 1, 1], [], []>} : vector<2x3xf32>, vector<3x48xf32>, vector<2x48xf32> -> vector<2x48xf32>
    %94 = vector.extract_strided_slice %93 {offsets = [0, 0], sizes = [1, 48], strides = [1, 1]} : vector<2x48xf32> to vector<1x48xf32>
    %95 = vector.broadcast %94 : vector<1x48xf32> to vector<32x48xf32>
    %96 = arith.mulf %65, %95 : vector<32x48xf32>
    %97 = vector.extract_strided_slice %93 {offsets = [1, 0], sizes = [1, 48], strides = [1, 1]} : vector<2x48xf32> to vector<1x48xf32>
    %98 = vector.broadcast %97 : vector<1x48xf32> to vector<32x48xf32>
    %99 = arith.addf %96, %98 : vector<32x48xf32>
    %cst_45 = arith.constant 0.000000e+00 : f32
    %100 = vector.broadcast %cst_45 : f32 to vector<32x48xf32>
    %101 = arith.cmpf ogt, %99, %100 : vector<32x48xf32>
    %cst_46 = arith.constant 2.000000e-01 : f32
    %102 = vector.broadcast %cst_46 : f32 to vector<32x48xf32>
    %103 = arith.mulf %102, %99 : vector<32x48xf32>
    %104 = arith.select %101, %99, %103 : vector<32x48xi1>, vector<32x48xf32>
    %c528 = arith.constant 528 : index
    %c0_47 = arith.constant 0 : index
    %105 = vector.load %arg1[%c528, %c0_47] : memref<2472x64xf32, #tpu.memory_space<vmem>>, vector<16x32xf32>
    %cst_48 = arith.constant dense<0.000000e+00> : vector<16x48xf32>
    %106 = tpu.matmul %105, %104, %cst_48 {dimension_numbers = #tpu.dot_dimension_numbers<[1], [0], [0], [1], [0, 0, 1, 1], [], []>} : vector<16x32xf32>, vector<32x48xf32>, vector<16x48xf32> -> vector<16x48xf32>
    %c544 = arith.constant 544 : index
    %c0_49 = arith.constant 0 : index
    %107 = vector.load %arg1[%c544, %c0_49] : memref<2472x64xf32, #tpu.memory_space<vmem>>, vector<16x32xf32>
    %cst_50 = arith.constant dense<0.000000e+00> : vector<16x48xf32>
    %108 = tpu.matmul %107, %104, %cst_50 {dimension_numbers = #tpu.dot_dimension_numbers<[1], [0], [0], [1], [0, 0, 1, 1], [], []>} : vector<16x32xf32>, vector<32x48xf32>, vector<16x48xf32> -> vector<16x48xf32>
    %c560 = arith.constant 560 : index
    %c0_51 = arith.constant 0 : index
    %109 = vector.load %arg1[%c560, %c0_51] : memref<2472x64xf32, #tpu.memory_space<vmem>>, vector<16x32xf32>
    %cst_52 = arith.constant dense<0.000000e+00> : vector<16x48xf32>
    %110 = tpu.matmul %109, %104, %cst_52 {dimension_numbers = #tpu.dot_dimension_numbers<[1], [0], [0], [1], [0, 0, 1, 1], [], []>} : vector<16x32xf32>, vector<32x48xf32>, vector<16x48xf32> -> vector<16x48xf32>
    %c576 = arith.constant 576 : index
    %c0_53 = arith.constant 0 : index
    %111 = vector.load %arg1[%c576, %c0_53] : memref<2472x64xf32, #tpu.memory_space<vmem>>, vector<48x64xf32>
    %cst_54 = arith.constant dense<0.000000e+00> : vector<16x64xf32>
    %112 = tpu.matmul %106, %111, %cst_54 {dimension_numbers = #tpu.dot_dimension_numbers<[1], [0], [0], [1], [0, 0, 1, 1], [], []>} : vector<16x48xf32>, vector<48x64xf32>, vector<16x64xf32> -> vector<16x64xf32>
    %c624 = arith.constant 624 : index
    %c0_55 = arith.constant 0 : index
    %113 = vector.load %arg1[%c624, %c0_55] : memref<2472x64xf32, #tpu.memory_space<vmem>>, vector<48x64xf32>
    %cst_56 = arith.constant dense<0.000000e+00> : vector<16x64xf32>
    %114 = tpu.matmul %108, %113, %cst_56 {dimension_numbers = #tpu.dot_dimension_numbers<[1], [0], [0], [1], [0, 0, 1, 1], [], []>} : vector<16x48xf32>, vector<48x64xf32>, vector<16x64xf32> -> vector<16x64xf32>
    %115 = arith.addf %112, %114 : vector<16x64xf32>
    %c672 = arith.constant 672 : index
    %c0_57 = arith.constant 0 : index
    %116 = vector.load %arg1[%c672, %c0_57] : memref<2472x64xf32, #tpu.memory_space<vmem>>, vector<48x64xf32>
    %cst_58 = arith.constant dense<0.000000e+00> : vector<16x64xf32>
    %117 = tpu.matmul %110, %116, %cst_58 {dimension_numbers = #tpu.dot_dimension_numbers<[1], [0], [0], [1], [0, 0, 1, 1], [], []>} : vector<16x48xf32>, vector<48x64xf32>, vector<16x64xf32> -> vector<16x64xf32>
    %118 = arith.addf %115, %117 : vector<16x64xf32>
    %cst_59 = arith.constant dense<0.000000e+00> : vector<64xf32>
    %119 = vector.multi_reduction <add>, %118, %cst_59 [0] : vector<16x64xf32> to vector<64xf32>
    %120 = vector.shape_cast %119 : vector<64xf32> to vector<1x64xf32>
    %121 = arith.mulf %118, %118 : vector<16x64xf32>
    %cst_60 = arith.constant dense<0.000000e+00> : vector<64xf32>
    %122 = vector.multi_reduction <add>, %121, %cst_60 [0] : vector<16x64xf32> to vector<64xf32>
    %123 = vector.shape_cast %122 : vector<64xf32> to vector<1x64xf32>
    %124 = tpu.concatenate %120, %123 in 0 : vector<1x64xf32>, vector<1x64xf32> -> vector<2x64xf32>
    %c720 = arith.constant 720 : index
    %c0_61 = arith.constant 0 : index
    %125 = vector.load %arg1[%c720, %c0_61] : memref<2472x64xf32, #tpu.memory_space<vmem>>, vector<64x8xf32>
    %cst_62 = arith.constant dense<0.000000e+00> : vector<2x8xf32>
    %126 = tpu.matmul %124, %125, %cst_62 {dimension_numbers = #tpu.dot_dimension_numbers<[1], [0], [0], [1], [0, 0, 1, 1], [], []>} : vector<2x64xf32>, vector<64x8xf32>, vector<2x8xf32> -> vector<2x8xf32>
    %127 = vector.extract_strided_slice %126 {offsets = [0, 0], sizes = [1, 8], strides = [1, 1]} : vector<2x8xf32> to vector<1x8xf32>
    %cst_63 = arith.constant 7.812500e-03 : f32
    %128 = vector.broadcast %cst_63 : f32 to vector<1x8xf32>
    %129 = arith.mulf %127, %128 : vector<1x8xf32>
    %130 = vector.extract_strided_slice %126 {offsets = [1, 0], sizes = [1, 8], strides = [1, 1]} : vector<2x8xf32> to vector<1x8xf32>
    %cst_64 = arith.constant 7.812500e-03 : f32
    %131 = vector.broadcast %cst_64 : f32 to vector<1x8xf32>
    %132 = arith.mulf %130, %131 : vector<1x8xf32>
    %133 = arith.mulf %129, %129 : vector<1x8xf32>
    %134 = arith.subf %132, %133 : vector<1x8xf32>
    %c792 = arith.constant 792 : index
    %c0_65 = arith.constant 0 : index
    %135 = vector.load %arg1[%c792, %c0_65] : memref<2472x64xf32, #tpu.memory_space<vmem>>, vector<2x8xf32>
    %136 = vector.extract_strided_slice %135 {offsets = [0, 0], sizes = [1, 8], strides = [1, 1]} : vector<2x8xf32> to vector<1x8xf32>
    %cst_66 = arith.constant 9.99999974E-6 : f32
    %137 = vector.broadcast %cst_66 : f32 to vector<1x8xf32>
    %138 = arith.addf %134, %137 : vector<1x8xf32>
    %139 = math.rsqrt %138 : vector<1x8xf32>
    %140 = arith.mulf %136, %139 : vector<1x8xf32>
    %141 = vector.extract_strided_slice %135 {offsets = [1, 0], sizes = [1, 8], strides = [1, 1]} : vector<2x8xf32> to vector<1x8xf32>
    %142 = arith.mulf %129, %140 : vector<1x8xf32>
    %143 = arith.subf %141, %142 : vector<1x8xf32>
    %144 = tpu.concatenate %140, %143 in 0 : vector<1x8xf32>, vector<1x8xf32> -> vector<2x8xf32>
    %c784 = arith.constant 784 : index
    %c0_67 = arith.constant 0 : index
    %145 = vector.load %arg1[%c784, %c0_67] : memref<2472x64xf32, #tpu.memory_space<vmem>>, vector<8x64xf32>
    %cst_68 = arith.constant dense<0.000000e+00> : vector<2x64xf32>
    %146 = tpu.matmul %144, %145, %cst_68 {dimension_numbers = #tpu.dot_dimension_numbers<[1], [0], [0], [1], [0, 0, 1, 1], [], []>} : vector<2x8xf32>, vector<8x64xf32>, vector<2x64xf32> -> vector<2x64xf32>
    %147 = vector.extract_strided_slice %146 {offsets = [0, 0], sizes = [1, 64], strides = [1, 1]} : vector<2x64xf32> to vector<1x64xf32>
    %148 = vector.broadcast %147 : vector<1x64xf32> to vector<16x64xf32>
    %149 = arith.mulf %118, %148 : vector<16x64xf32>
    %150 = vector.extract_strided_slice %146 {offsets = [1, 0], sizes = [1, 64], strides = [1, 1]} : vector<2x64xf32> to vector<1x64xf32>
    %151 = vector.broadcast %150 : vector<1x64xf32> to vector<16x64xf32>
    %152 = arith.addf %149, %151 : vector<16x64xf32>
    %cst_69 = arith.constant 0.000000e+00 : f32
    %153 = vector.broadcast %cst_69 : f32 to vector<16x64xf32>
    %154 = arith.cmpf ogt, %152, %153 : vector<16x64xf32>
    %cst_70 = arith.constant 2.000000e-01 : f32
    %155 = vector.broadcast %cst_70 : f32 to vector<16x64xf32>
    %156 = arith.mulf %155, %152 : vector<16x64xf32>
    %157 = arith.select %154, %152, %156 : vector<16x64xi1>, vector<16x64xf32>
    %c800 = arith.constant 800 : index
    %c0_71 = arith.constant 0 : index
    %158 = vector.load %arg1[%c800, %c0_71] : memref<2472x64xf32, #tpu.memory_space<vmem>>, vector<16x16xf32>
    %cst_72 = arith.constant dense<0.000000e+00> : vector<16x64xf32>
    %159 = tpu.matmul %158, %157, %cst_72 {dimension_numbers = #tpu.dot_dimension_numbers<[1], [0], [0], [1], [0, 0, 1, 1], [], []>} : vector<16x16xf32>, vector<16x64xf32>, vector<16x64xf32> -> vector<16x64xf32>
    %c816 = arith.constant 816 : index
    %c0_73 = arith.constant 0 : index
    %160 = vector.load %arg1[%c816, %c0_73] : memref<2472x64xf32, #tpu.memory_space<vmem>>, vector<16x16xf32>
    %cst_74 = arith.constant dense<0.000000e+00> : vector<16x64xf32>
    %161 = tpu.matmul %160, %157, %cst_74 {dimension_numbers = #tpu.dot_dimension_numbers<[1], [0], [0], [1], [0, 0, 1, 1], [], []>} : vector<16x16xf32>, vector<16x64xf32>, vector<16x64xf32> -> vector<16x64xf32>
    %c832 = arith.constant 832 : index
    %c0_75 = arith.constant 0 : index
    %162 = vector.load %arg1[%c832, %c0_75] : memref<2472x64xf32, #tpu.memory_space<vmem>>, vector<64x64xf32>
    %cst_76 = arith.constant dense<0.000000e+00> : vector<16x64xf32>
    %163 = tpu.matmul %159, %162, %cst_76 {dimension_numbers = #tpu.dot_dimension_numbers<[1], [0], [0], [1], [0, 0, 1, 1], [], []>} : vector<16x64xf32>, vector<64x64xf32>, vector<16x64xf32> -> vector<16x64xf32>
    %c896 = arith.constant 896 : index
    %c0_77 = arith.constant 0 : index
    %164 = vector.load %arg1[%c896, %c0_77] : memref<2472x64xf32, #tpu.memory_space<vmem>>, vector<64x64xf32>
    %cst_78 = arith.constant dense<0.000000e+00> : vector<16x64xf32>
    %165 = tpu.matmul %157, %164, %cst_78 {dimension_numbers = #tpu.dot_dimension_numbers<[1], [0], [0], [1], [0, 0, 1, 1], [], []>} : vector<16x64xf32>, vector<64x64xf32>, vector<16x64xf32> -> vector<16x64xf32>
    %166 = arith.addf %163, %165 : vector<16x64xf32>
    %c960 = arith.constant 960 : index
    %c0_79 = arith.constant 0 : index
    %167 = vector.load %arg1[%c960, %c0_79] : memref<2472x64xf32, #tpu.memory_space<vmem>>, vector<64x64xf32>
    %cst_80 = arith.constant dense<0.000000e+00> : vector<16x64xf32>
    %168 = tpu.matmul %161, %167, %cst_80 {dimension_numbers = #tpu.dot_dimension_numbers<[1], [0], [0], [1], [0, 0, 1, 1], [], []>} : vector<16x64xf32>, vector<64x64xf32>, vector<16x64xf32> -> vector<16x64xf32>
    %169 = arith.addf %166, %168 : vector<16x64xf32>
    %cst_81 = arith.constant dense<0.000000e+00> : vector<64xf32>
    %170 = vector.multi_reduction <add>, %169, %cst_81 [0] : vector<16x64xf32> to vector<64xf32>
    %171 = vector.shape_cast %170 : vector<64xf32> to vector<1x64xf32>
    %172 = arith.mulf %169, %169 : vector<16x64xf32>
    %cst_82 = arith.constant dense<0.000000e+00> : vector<64xf32>
    %173 = vector.multi_reduction <add>, %172, %cst_82 [0] : vector<16x64xf32> to vector<64xf32>
    %174 = vector.shape_cast %173 : vector<64xf32> to vector<1x64xf32>
    %175 = tpu.concatenate %171, %174 in 0 : vector<1x64xf32>, vector<1x64xf32> -> vector<2x64xf32>
    %c1024 = arith.constant 1024 : index
    %c0_83 = arith.constant 0 : index
    %176 = vector.load %arg1[%c1024, %c0_83] : memref<2472x64xf32, #tpu.memory_space<vmem>>, vector<64x8xf32>
    %cst_84 = arith.constant dense<0.000000e+00> : vector<2x8xf32>
    %177 = tpu.matmul %175, %176, %cst_84 {dimension_numbers = #tpu.dot_dimension_numbers<[1], [0], [0], [1], [0, 0, 1, 1], [], []>} : vector<2x64xf32>, vector<64x8xf32>, vector<2x8xf32> -> vector<2x8xf32>
    %178 = vector.extract_strided_slice %177 {offsets = [0, 0], sizes = [1, 8], strides = [1, 1]} : vector<2x8xf32> to vector<1x8xf32>
    %cst_85 = arith.constant 7.812500e-03 : f32
    %179 = vector.broadcast %cst_85 : f32 to vector<1x8xf32>
    %180 = arith.mulf %178, %179 : vector<1x8xf32>
    %181 = vector.extract_strided_slice %177 {offsets = [1, 0], sizes = [1, 8], strides = [1, 1]} : vector<2x8xf32> to vector<1x8xf32>
    %cst_86 = arith.constant 7.812500e-03 : f32
    %182 = vector.broadcast %cst_86 : f32 to vector<1x8xf32>
    %183 = arith.mulf %181, %182 : vector<1x8xf32>
    %184 = arith.mulf %180, %180 : vector<1x8xf32>
    %185 = arith.subf %183, %184 : vector<1x8xf32>
    %c1096 = arith.constant 1096 : index
    %c0_87 = arith.constant 0 : index
    %186 = vector.load %arg1[%c1096, %c0_87] : memref<2472x64xf32, #tpu.memory_space<vmem>>, vector<2x8xf32>
    %187 = vector.extract_strided_slice %186 {offsets = [0, 0], sizes = [1, 8], strides = [1, 1]} : vector<2x8xf32> to vector<1x8xf32>
    %cst_88 = arith.constant 9.99999974E-6 : f32
    %188 = vector.broadcast %cst_88 : f32 to vector<1x8xf32>
    %189 = arith.addf %185, %188 : vector<1x8xf32>
    %190 = math.rsqrt %189 : vector<1x8xf32>
    %191 = arith.mulf %187, %190 : vector<1x8xf32>
    %192 = vector.extract_strided_slice %186 {offsets = [1, 0], sizes = [1, 8], strides = [1, 1]} : vector<2x8xf32> to vector<1x8xf32>
    %193 = arith.mulf %180, %191 : vector<1x8xf32>
    %194 = arith.subf %192, %193 : vector<1x8xf32>
    %195 = tpu.concatenate %191, %194 in 0 : vector<1x8xf32>, vector<1x8xf32> -> vector<2x8xf32>
    %c1088 = arith.constant 1088 : index
    %c0_89 = arith.constant 0 : index
    %196 = vector.load %arg1[%c1088, %c0_89] : memref<2472x64xf32, #tpu.memory_space<vmem>>, vector<8x64xf32>
    %cst_90 = arith.constant dense<0.000000e+00> : vector<2x64xf32>
    %197 = tpu.matmul %195, %196, %cst_90 {dimension_numbers = #tpu.dot_dimension_numbers<[1], [0], [0], [1], [0, 0, 1, 1], [], []>} : vector<2x8xf32>, vector<8x64xf32>, vector<2x64xf32> -> vector<2x64xf32>
    %198 = vector.extract_strided_slice %197 {offsets = [0, 0], sizes = [1, 64], strides = [1, 1]} : vector<2x64xf32> to vector<1x64xf32>
    %199 = vector.broadcast %198 : vector<1x64xf32> to vector<16x64xf32>
    %200 = arith.mulf %169, %199 : vector<16x64xf32>
    %201 = vector.extract_strided_slice %197 {offsets = [1, 0], sizes = [1, 64], strides = [1, 1]} : vector<2x64xf32> to vector<1x64xf32>
    %202 = vector.broadcast %201 : vector<1x64xf32> to vector<16x64xf32>
    %203 = arith.addf %200, %202 : vector<16x64xf32>
    %cst_91 = arith.constant 0.000000e+00 : f32
    %204 = vector.broadcast %cst_91 : f32 to vector<16x64xf32>
    %205 = arith.cmpf ogt, %203, %204 : vector<16x64xf32>
    %cst_92 = arith.constant 2.000000e-01 : f32
    %206 = vector.broadcast %cst_92 : f32 to vector<16x64xf32>
    %207 = arith.mulf %206, %203 : vector<16x64xf32>
    %208 = arith.select %205, %203, %207 : vector<16x64xi1>, vector<16x64xf32>
    %c1104 = arith.constant 1104 : index
    %c0_93 = arith.constant 0 : index
    %209 = vector.load %arg1[%c1104, %c0_93] : memref<2472x64xf32, #tpu.memory_space<vmem>>, vector<8x16xf32>
    %cst_94 = arith.constant dense<0.000000e+00> : vector<8x64xf32>
    %210 = tpu.matmul %209, %208, %cst_94 {dimension_numbers = #tpu.dot_dimension_numbers<[1], [0], [0], [1], [0, 0, 1, 1], [], []>} : vector<8x16xf32>, vector<16x64xf32>, vector<8x64xf32> -> vector<8x64xf32>
    %c1112 = arith.constant 1112 : index
    %c0_95 = arith.constant 0 : index
    %211 = vector.load %arg1[%c1112, %c0_95] : memref<2472x64xf32, #tpu.memory_space<vmem>>, vector<8x16xf32>
    %cst_96 = arith.constant dense<0.000000e+00> : vector<8x64xf32>
    %212 = tpu.matmul %211, %208, %cst_96 {dimension_numbers = #tpu.dot_dimension_numbers<[1], [0], [0], [1], [0, 0, 1, 1], [], []>} : vector<8x16xf32>, vector<16x64xf32>, vector<8x64xf32> -> vector<8x64xf32>
    %c1120 = arith.constant 1120 : index
    %c0_97 = arith.constant 0 : index
    %213 = vector.load %arg1[%c1120, %c0_97] : memref<2472x64xf32, #tpu.memory_space<vmem>>, vector<8x16xf32>
    %cst_98 = arith.constant dense<0.000000e+00> : vector<8x64xf32>
    %214 = tpu.matmul %213, %208, %cst_98 {dimension_numbers = #tpu.dot_dimension_numbers<[1], [0], [0], [1], [0, 0, 1, 1], [], []>} : vector<8x16xf32>, vector<16x64xf32>, vector<8x64xf32> -> vector<8x64xf32>
    %c1128 = arith.constant 1128 : index
    %c0_99 = arith.constant 0 : index
    %215 = vector.load %arg1[%c1128, %c0_99] : memref<2472x64xf32, #tpu.memory_space<vmem>>, vector<64x64xf32>
    %cst_100 = arith.constant dense<0.000000e+00> : vector<8x64xf32>
    %216 = tpu.matmul %210, %215, %cst_100 {dimension_numbers = #tpu.dot_dimension_numbers<[1], [0], [0], [1], [0, 0, 1, 1], [], []>} : vector<8x64xf32>, vector<64x64xf32>, vector<8x64xf32> -> vector<8x64xf32>
    %c1192 = arith.constant 1192 : index
    %c0_101 = arith.constant 0 : index
    %217 = vector.load %arg1[%c1192, %c0_101] : memref<2472x64xf32, #tpu.memory_space<vmem>>, vector<64x64xf32>
    %cst_102 = arith.constant dense<0.000000e+00> : vector<8x64xf32>
    %218 = tpu.matmul %212, %217, %cst_102 {dimension_numbers = #tpu.dot_dimension_numbers<[1], [0], [0], [1], [0, 0, 1, 1], [], []>} : vector<8x64xf32>, vector<64x64xf32>, vector<8x64xf32> -> vector<8x64xf32>
    %219 = arith.addf %216, %218 : vector<8x64xf32>
    %c1256 = arith.constant 1256 : index
    %c0_103 = arith.constant 0 : index
    %220 = vector.load %arg1[%c1256, %c0_103] : memref<2472x64xf32, #tpu.memory_space<vmem>>, vector<64x64xf32>
    %cst_104 = arith.constant dense<0.000000e+00> : vector<8x64xf32>
    %221 = tpu.matmul %214, %220, %cst_104 {dimension_numbers = #tpu.dot_dimension_numbers<[1], [0], [0], [1], [0, 0, 1, 1], [], []>} : vector<8x64xf32>, vector<64x64xf32>, vector<8x64xf32> -> vector<8x64xf32>
    %222 = arith.addf %219, %221 : vector<8x64xf32>
    %cst_105 = arith.constant dense<0.000000e+00> : vector<64xf32>
    %223 = vector.multi_reduction <add>, %222, %cst_105 [0] : vector<8x64xf32> to vector<64xf32>
    %224 = vector.shape_cast %223 : vector<64xf32> to vector<1x64xf32>
    %225 = arith.mulf %222, %222 : vector<8x64xf32>
    %cst_106 = arith.constant dense<0.000000e+00> : vector<64xf32>
    %226 = vector.multi_reduction <add>, %225, %cst_106 [0] : vector<8x64xf32> to vector<64xf32>
    %227 = vector.shape_cast %226 : vector<64xf32> to vector<1x64xf32>
    %228 = tpu.concatenate %224, %227 in 0 : vector<1x64xf32>, vector<1x64xf32> -> vector<2x64xf32>
    %c1320 = arith.constant 1320 : index
    %c0_107 = arith.constant 0 : index
    %229 = vector.load %arg1[%c1320, %c0_107] : memref<2472x64xf32, #tpu.memory_space<vmem>>, vector<64x16xf32>
    %cst_108 = arith.constant dense<0.000000e+00> : vector<2x16xf32>
    %230 = tpu.matmul %228, %229, %cst_108 {dimension_numbers = #tpu.dot_dimension_numbers<[1], [0], [0], [1], [0, 0, 1, 1], [], []>} : vector<2x64xf32>, vector<64x16xf32>, vector<2x16xf32> -> vector<2x16xf32>
    %231 = vector.extract_strided_slice %230 {offsets = [0, 0], sizes = [1, 16], strides = [1, 1]} : vector<2x16xf32> to vector<1x16xf32>
    %cst_109 = arith.constant 3.125000e-02 : f32
    %232 = vector.broadcast %cst_109 : f32 to vector<1x16xf32>
    %233 = arith.mulf %231, %232 : vector<1x16xf32>
    %234 = vector.extract_strided_slice %230 {offsets = [1, 0], sizes = [1, 16], strides = [1, 1]} : vector<2x16xf32> to vector<1x16xf32>
    %cst_110 = arith.constant 3.125000e-02 : f32
    %235 = vector.broadcast %cst_110 : f32 to vector<1x16xf32>
    %236 = arith.mulf %234, %235 : vector<1x16xf32>
    %237 = arith.mulf %233, %233 : vector<1x16xf32>
    %238 = arith.subf %236, %237 : vector<1x16xf32>
    %c1400 = arith.constant 1400 : index
    %c0_111 = arith.constant 0 : index
    %239 = vector.load %arg1[%c1400, %c0_111] : memref<2472x64xf32, #tpu.memory_space<vmem>>, vector<2x16xf32>
    %240 = vector.extract_strided_slice %239 {offsets = [0, 0], sizes = [1, 16], strides = [1, 1]} : vector<2x16xf32> to vector<1x16xf32>
    %cst_112 = arith.constant 9.99999974E-6 : f32
    %241 = vector.broadcast %cst_112 : f32 to vector<1x16xf32>
    %242 = arith.addf %238, %241 : vector<1x16xf32>
    %243 = math.rsqrt %242 : vector<1x16xf32>
    %244 = arith.mulf %240, %243 : vector<1x16xf32>
    %245 = vector.extract_strided_slice %239 {offsets = [1, 0], sizes = [1, 16], strides = [1, 1]} : vector<2x16xf32> to vector<1x16xf32>
    %246 = arith.mulf %233, %244 : vector<1x16xf32>
    %247 = arith.subf %245, %246 : vector<1x16xf32>
    %248 = tpu.concatenate %244, %247 in 0 : vector<1x16xf32>, vector<1x16xf32> -> vector<2x16xf32>
    %c1384 = arith.constant 1384 : index
    %c0_113 = arith.constant 0 : index
    %249 = vector.load %arg1[%c1384, %c0_113] : memref<2472x64xf32, #tpu.memory_space<vmem>>, vector<16x64xf32>
    %cst_114 = arith.constant dense<0.000000e+00> : vector<2x64xf32>
    %250 = tpu.matmul %248, %249, %cst_114 {dimension_numbers = #tpu.dot_dimension_numbers<[1], [0], [0], [1], [0, 0, 1, 1], [], []>} : vector<2x16xf32>, vector<16x64xf32>, vector<2x64xf32> -> vector<2x64xf32>
    %251 = vector.extract_strided_slice %250 {offsets = [0, 0], sizes = [1, 64], strides = [1, 1]} : vector<2x64xf32> to vector<1x64xf32>
    %252 = vector.broadcast %251 : vector<1x64xf32> to vector<8x64xf32>
    %253 = arith.mulf %222, %252 : vector<8x64xf32>
    %254 = vector.extract_strided_slice %250 {offsets = [1, 0], sizes = [1, 64], strides = [1, 1]} : vector<2x64xf32> to vector<1x64xf32>
    %255 = vector.broadcast %254 : vector<1x64xf32> to vector<8x64xf32>
    %256 = arith.addf %253, %255 : vector<8x64xf32>
    %cst_115 = arith.constant 0.000000e+00 : f32
    %257 = vector.broadcast %cst_115 : f32 to vector<8x64xf32>
    %258 = arith.cmpf ogt, %256, %257 : vector<8x64xf32>
    %cst_116 = arith.constant 2.000000e-01 : f32
    %259 = vector.broadcast %cst_116 : f32 to vector<8x64xf32>
    %260 = arith.mulf %259, %256 : vector<8x64xf32>
    %261 = arith.select %258, %256, %260 : vector<8x64xi1>, vector<8x64xf32>
    %c1408 = arith.constant 1408 : index
    %c0_117 = arith.constant 0 : index
    %262 = vector.load %arg1[%c1408, %c0_117] : memref<2472x64xf32, #tpu.memory_space<vmem>>, vector<8x8xf32>
    %cst_118 = arith.constant dense<0.000000e+00> : vector<8x64xf32>
    %263 = tpu.matmul %262, %261, %cst_118 {dimension_numbers = #tpu.dot_dimension_numbers<[1], [0], [0], [1], [0, 0, 1, 1], [], []>} : vector<8x8xf32>, vector<8x64xf32>, vector<8x64xf32> -> vector<8x64xf32>
    %c1416 = arith.constant 1416 : index
    %c0_119 = arith.constant 0 : index
    %264 = vector.load %arg1[%c1416, %c0_119] : memref<2472x64xf32, #tpu.memory_space<vmem>>, vector<8x8xf32>
    %cst_120 = arith.constant dense<0.000000e+00> : vector<8x64xf32>
    %265 = tpu.matmul %264, %261, %cst_120 {dimension_numbers = #tpu.dot_dimension_numbers<[1], [0], [0], [1], [0, 0, 1, 1], [], []>} : vector<8x8xf32>, vector<8x64xf32>, vector<8x64xf32> -> vector<8x64xf32>
    %c1424 = arith.constant 1424 : index
    %c0_121 = arith.constant 0 : index
    %266 = vector.load %arg1[%c1424, %c0_121] : memref<2472x64xf32, #tpu.memory_space<vmem>>, vector<64x64xf32>
    %cst_122 = arith.constant dense<0.000000e+00> : vector<8x64xf32>
    %267 = tpu.matmul %263, %266, %cst_122 {dimension_numbers = #tpu.dot_dimension_numbers<[1], [0], [0], [1], [0, 0, 1, 1], [], []>} : vector<8x64xf32>, vector<64x64xf32>, vector<8x64xf32> -> vector<8x64xf32>
    %c1488 = arith.constant 1488 : index
    %c0_123 = arith.constant 0 : index
    %268 = vector.load %arg1[%c1488, %c0_123] : memref<2472x64xf32, #tpu.memory_space<vmem>>, vector<64x64xf32>
    %cst_124 = arith.constant dense<0.000000e+00> : vector<8x64xf32>
    %269 = tpu.matmul %261, %268, %cst_124 {dimension_numbers = #tpu.dot_dimension_numbers<[1], [0], [0], [1], [0, 0, 1, 1], [], []>} : vector<8x64xf32>, vector<64x64xf32>, vector<8x64xf32> -> vector<8x64xf32>
    %270 = arith.addf %267, %269 : vector<8x64xf32>
    %c1552 = arith.constant 1552 : index
    %c0_125 = arith.constant 0 : index
    %271 = vector.load %arg1[%c1552, %c0_125] : memref<2472x64xf32, #tpu.memory_space<vmem>>, vector<64x64xf32>
    %cst_126 = arith.constant dense<0.000000e+00> : vector<8x64xf32>
    %272 = tpu.matmul %265, %271, %cst_126 {dimension_numbers = #tpu.dot_dimension_numbers<[1], [0], [0], [1], [0, 0, 1, 1], [], []>} : vector<8x64xf32>, vector<64x64xf32>, vector<8x64xf32> -> vector<8x64xf32>
    %273 = arith.addf %270, %272 : vector<8x64xf32>
    %cst_127 = arith.constant dense<0.000000e+00> : vector<64xf32>
    %274 = vector.multi_reduction <add>, %273, %cst_127 [0] : vector<8x64xf32> to vector<64xf32>
    %275 = vector.shape_cast %274 : vector<64xf32> to vector<1x64xf32>
    %276 = arith.mulf %273, %273 : vector<8x64xf32>
    %cst_128 = arith.constant dense<0.000000e+00> : vector<64xf32>
    %277 = vector.multi_reduction <add>, %276, %cst_128 [0] : vector<8x64xf32> to vector<64xf32>
    %278 = vector.shape_cast %277 : vector<64xf32> to vector<1x64xf32>
    %279 = tpu.concatenate %275, %278 in 0 : vector<1x64xf32>, vector<1x64xf32> -> vector<2x64xf32>
    %c1616 = arith.constant 1616 : index
    %c0_129 = arith.constant 0 : index
    %280 = vector.load %arg1[%c1616, %c0_129] : memref<2472x64xf32, #tpu.memory_space<vmem>>, vector<64x16xf32>
    %cst_130 = arith.constant dense<0.000000e+00> : vector<2x16xf32>
    %281 = tpu.matmul %279, %280, %cst_130 {dimension_numbers = #tpu.dot_dimension_numbers<[1], [0], [0], [1], [0, 0, 1, 1], [], []>} : vector<2x64xf32>, vector<64x16xf32>, vector<2x16xf32> -> vector<2x16xf32>
    %282 = vector.extract_strided_slice %281 {offsets = [0, 0], sizes = [1, 16], strides = [1, 1]} : vector<2x16xf32> to vector<1x16xf32>
    %cst_131 = arith.constant 3.125000e-02 : f32
    %283 = vector.broadcast %cst_131 : f32 to vector<1x16xf32>
    %284 = arith.mulf %282, %283 : vector<1x16xf32>
    %285 = vector.extract_strided_slice %281 {offsets = [1, 0], sizes = [1, 16], strides = [1, 1]} : vector<2x16xf32> to vector<1x16xf32>
    %cst_132 = arith.constant 3.125000e-02 : f32
    %286 = vector.broadcast %cst_132 : f32 to vector<1x16xf32>
    %287 = arith.mulf %285, %286 : vector<1x16xf32>
    %288 = arith.mulf %284, %284 : vector<1x16xf32>
    %289 = arith.subf %287, %288 : vector<1x16xf32>
    %c1696 = arith.constant 1696 : index
    %c0_133 = arith.constant 0 : index
    %290 = vector.load %arg1[%c1696, %c0_133] : memref<2472x64xf32, #tpu.memory_space<vmem>>, vector<2x16xf32>
    %291 = vector.extract_strided_slice %290 {offsets = [0, 0], sizes = [1, 16], strides = [1, 1]} : vector<2x16xf32> to vector<1x16xf32>
    %cst_134 = arith.constant 9.99999974E-6 : f32
    %292 = vector.broadcast %cst_134 : f32 to vector<1x16xf32>
    %293 = arith.addf %289, %292 : vector<1x16xf32>
    %294 = math.rsqrt %293 : vector<1x16xf32>
    %295 = arith.mulf %291, %294 : vector<1x16xf32>
    %296 = vector.extract_strided_slice %290 {offsets = [1, 0], sizes = [1, 16], strides = [1, 1]} : vector<2x16xf32> to vector<1x16xf32>
    %297 = arith.mulf %284, %295 : vector<1x16xf32>
    %298 = arith.subf %296, %297 : vector<1x16xf32>
    %299 = tpu.concatenate %295, %298 in 0 : vector<1x16xf32>, vector<1x16xf32> -> vector<2x16xf32>
    %c1680 = arith.constant 1680 : index
    %c0_135 = arith.constant 0 : index
    %300 = vector.load %arg1[%c1680, %c0_135] : memref<2472x64xf32, #tpu.memory_space<vmem>>, vector<16x64xf32>
    %cst_136 = arith.constant dense<0.000000e+00> : vector<2x64xf32>
    %301 = tpu.matmul %299, %300, %cst_136 {dimension_numbers = #tpu.dot_dimension_numbers<[1], [0], [0], [1], [0, 0, 1, 1], [], []>} : vector<2x16xf32>, vector<16x64xf32>, vector<2x64xf32> -> vector<2x64xf32>
    %302 = vector.extract_strided_slice %301 {offsets = [0, 0], sizes = [1, 64], strides = [1, 1]} : vector<2x64xf32> to vector<1x64xf32>
    %303 = vector.broadcast %302 : vector<1x64xf32> to vector<8x64xf32>
    %304 = arith.mulf %273, %303 : vector<8x64xf32>
    %305 = vector.extract_strided_slice %301 {offsets = [1, 0], sizes = [1, 64], strides = [1, 1]} : vector<2x64xf32> to vector<1x64xf32>
    %306 = vector.broadcast %305 : vector<1x64xf32> to vector<8x64xf32>
    %307 = arith.addf %304, %306 : vector<8x64xf32>
    %cst_137 = arith.constant 0.000000e+00 : f32
    %308 = vector.broadcast %cst_137 : f32 to vector<8x64xf32>
    %309 = arith.cmpf ogt, %307, %308 : vector<8x64xf32>
    %cst_138 = arith.constant 2.000000e-01 : f32
    %310 = vector.broadcast %cst_138 : f32 to vector<8x64xf32>
    %311 = arith.mulf %310, %307 : vector<8x64xf32>
    %312 = arith.select %309, %307, %311 : vector<8x64xi1>, vector<8x64xf32>
    %c1704 = arith.constant 1704 : index
    %c0_139 = arith.constant 0 : index
    %313 = vector.load %arg1[%c1704, %c0_139] : memref<2472x64xf32, #tpu.memory_space<vmem>>, vector<4x8xf32>
    %cst_140 = arith.constant dense<0.000000e+00> : vector<4x64xf32>
    %314 = tpu.matmul %313, %312, %cst_140 {dimension_numbers = #tpu.dot_dimension_numbers<[1], [0], [0], [1], [0, 0, 1, 1], [], []>} : vector<4x8xf32>, vector<8x64xf32>, vector<4x64xf32> -> vector<4x64xf32>
    %c1712 = arith.constant 1712 : index
    %c0_141 = arith.constant 0 : index
    %315 = vector.load %arg1[%c1712, %c0_141] : memref<2472x64xf32, #tpu.memory_space<vmem>>, vector<4x8xf32>
    %cst_142 = arith.constant dense<0.000000e+00> : vector<4x64xf32>
    %316 = tpu.matmul %315, %312, %cst_142 {dimension_numbers = #tpu.dot_dimension_numbers<[1], [0], [0], [1], [0, 0, 1, 1], [], []>} : vector<4x8xf32>, vector<8x64xf32>, vector<4x64xf32> -> vector<4x64xf32>
    %c1720 = arith.constant 1720 : index
    %c0_143 = arith.constant 0 : index
    %317 = vector.load %arg1[%c1720, %c0_143] : memref<2472x64xf32, #tpu.memory_space<vmem>>, vector<4x8xf32>
    %cst_144 = arith.constant dense<0.000000e+00> : vector<4x64xf32>
    %318 = tpu.matmul %317, %312, %cst_144 {dimension_numbers = #tpu.dot_dimension_numbers<[1], [0], [0], [1], [0, 0, 1, 1], [], []>} : vector<4x8xf32>, vector<8x64xf32>, vector<4x64xf32> -> vector<4x64xf32>
    %c1728 = arith.constant 1728 : index
    %c0_145 = arith.constant 0 : index
    %319 = vector.load %arg1[%c1728, %c0_145] : memref<2472x64xf32, #tpu.memory_space<vmem>>, vector<64x64xf32>
    %cst_146 = arith.constant dense<0.000000e+00> : vector<4x64xf32>
    %320 = tpu.matmul %314, %319, %cst_146 {dimension_numbers = #tpu.dot_dimension_numbers<[1], [0], [0], [1], [0, 0, 1, 1], [], []>} : vector<4x64xf32>, vector<64x64xf32>, vector<4x64xf32> -> vector<4x64xf32>
    %c1792 = arith.constant 1792 : index
    %c0_147 = arith.constant 0 : index
    %321 = vector.load %arg1[%c1792, %c0_147] : memref<2472x64xf32, #tpu.memory_space<vmem>>, vector<64x64xf32>
    %cst_148 = arith.constant dense<0.000000e+00> : vector<4x64xf32>
    %322 = tpu.matmul %316, %321, %cst_148 {dimension_numbers = #tpu.dot_dimension_numbers<[1], [0], [0], [1], [0, 0, 1, 1], [], []>} : vector<4x64xf32>, vector<64x64xf32>, vector<4x64xf32> -> vector<4x64xf32>
    %323 = arith.addf %320, %322 : vector<4x64xf32>
    %c1856 = arith.constant 1856 : index
    %c0_149 = arith.constant 0 : index
    %324 = vector.load %arg1[%c1856, %c0_149] : memref<2472x64xf32, #tpu.memory_space<vmem>>, vector<64x64xf32>
    %cst_150 = arith.constant dense<0.000000e+00> : vector<4x64xf32>
    %325 = tpu.matmul %318, %324, %cst_150 {dimension_numbers = #tpu.dot_dimension_numbers<[1], [0], [0], [1], [0, 0, 1, 1], [], []>} : vector<4x64xf32>, vector<64x64xf32>, vector<4x64xf32> -> vector<4x64xf32>
    %326 = arith.addf %323, %325 : vector<4x64xf32>
    %cst_151 = arith.constant dense<0.000000e+00> : vector<64xf32>
    %327 = vector.multi_reduction <add>, %326, %cst_151 [0] : vector<4x64xf32> to vector<64xf32>
    %328 = vector.shape_cast %327 : vector<64xf32> to vector<1x64xf32>
    %329 = arith.mulf %326, %326 : vector<4x64xf32>
    %cst_152 = arith.constant dense<0.000000e+00> : vector<64xf32>
    %330 = vector.multi_reduction <add>, %329, %cst_152 [0] : vector<4x64xf32> to vector<64xf32>
    %331 = vector.shape_cast %330 : vector<64xf32> to vector<1x64xf32>
    %332 = tpu.concatenate %328, %331 in 0 : vector<1x64xf32>, vector<1x64xf32> -> vector<2x64xf32>
    %c1920 = arith.constant 1920 : index
    %c0_153 = arith.constant 0 : index
    %333 = vector.load %arg1[%c1920, %c0_153] : memref<2472x64xf32, #tpu.memory_space<vmem>>, vector<64x32xf32>
    %cst_154 = arith.constant dense<0.000000e+00> : vector<2x32xf32>
    %334 = tpu.matmul %332, %333, %cst_154 {dimension_numbers = #tpu.dot_dimension_numbers<[1], [0], [0], [1], [0, 0, 1, 1], [], []>} : vector<2x64xf32>, vector<64x32xf32>, vector<2x32xf32> -> vector<2x32xf32>
    %335 = vector.extract_strided_slice %334 {offsets = [0, 0], sizes = [1, 32], strides = [1, 1]} : vector<2x32xf32> to vector<1x32xf32>
    %cst_155 = arith.constant 1.250000e-01 : f32
    %336 = vector.broadcast %cst_155 : f32 to vector<1x32xf32>
    %337 = arith.mulf %335, %336 : vector<1x32xf32>
    %338 = vector.extract_strided_slice %334 {offsets = [1, 0], sizes = [1, 32], strides = [1, 1]} : vector<2x32xf32> to vector<1x32xf32>
    %cst_156 = arith.constant 1.250000e-01 : f32
    %339 = vector.broadcast %cst_156 : f32 to vector<1x32xf32>
    %340 = arith.mulf %338, %339 : vector<1x32xf32>
    %341 = arith.mulf %337, %337 : vector<1x32xf32>
    %342 = arith.subf %340, %341 : vector<1x32xf32>
    %c2016 = arith.constant 2016 : index
    %c0_157 = arith.constant 0 : index
    %343 = vector.load %arg1[%c2016, %c0_157] : memref<2472x64xf32, #tpu.memory_space<vmem>>, vector<2x32xf32>
    %344 = vector.extract_strided_slice %343 {offsets = [0, 0], sizes = [1, 32], strides = [1, 1]} : vector<2x32xf32> to vector<1x32xf32>
    %cst_158 = arith.constant 9.99999974E-6 : f32
    %345 = vector.broadcast %cst_158 : f32 to vector<1x32xf32>
    %346 = arith.addf %342, %345 : vector<1x32xf32>
    %347 = math.rsqrt %346 : vector<1x32xf32>
    %348 = arith.mulf %344, %347 : vector<1x32xf32>
    %349 = vector.extract_strided_slice %343 {offsets = [1, 0], sizes = [1, 32], strides = [1, 1]} : vector<2x32xf32> to vector<1x32xf32>
    %350 = arith.mulf %337, %348 : vector<1x32xf32>
    %351 = arith.subf %349, %350 : vector<1x32xf32>
    %352 = tpu.concatenate %348, %351 in 0 : vector<1x32xf32>, vector<1x32xf32> -> vector<2x32xf32>
    %c1984 = arith.constant 1984 : index
    %c0_159 = arith.constant 0 : index
    %353 = vector.load %arg1[%c1984, %c0_159] : memref<2472x64xf32, #tpu.memory_space<vmem>>, vector<32x64xf32>
    %cst_160 = arith.constant dense<0.000000e+00> : vector<2x64xf32>
    %354 = tpu.matmul %352, %353, %cst_160 {dimension_numbers = #tpu.dot_dimension_numbers<[1], [0], [0], [1], [0, 0, 1, 1], [], []>} : vector<2x32xf32>, vector<32x64xf32>, vector<2x64xf32> -> vector<2x64xf32>
    %355 = vector.extract_strided_slice %354 {offsets = [0, 0], sizes = [1, 64], strides = [1, 1]} : vector<2x64xf32> to vector<1x64xf32>
    %356 = vector.broadcast %355 : vector<1x64xf32> to vector<4x64xf32>
    %357 = arith.mulf %326, %356 : vector<4x64xf32>
    %358 = vector.extract_strided_slice %354 {offsets = [1, 0], sizes = [1, 64], strides = [1, 1]} : vector<2x64xf32> to vector<1x64xf32>
    %359 = vector.broadcast %358 : vector<1x64xf32> to vector<4x64xf32>
    %360 = arith.addf %357, %359 : vector<4x64xf32>
    %cst_161 = arith.constant 0.000000e+00 : f32
    %361 = vector.broadcast %cst_161 : f32 to vector<4x64xf32>
    %362 = arith.cmpf ogt, %360, %361 : vector<4x64xf32>
    %cst_162 = arith.constant 2.000000e-01 : f32
    %363 = vector.broadcast %cst_162 : f32 to vector<4x64xf32>
    %364 = arith.mulf %363, %360 : vector<4x64xf32>
    %365 = arith.select %362, %360, %364 : vector<4x64xi1>, vector<4x64xf32>
    %c2024 = arith.constant 2024 : index
    %c0_163 = arith.constant 0 : index
    %366 = vector.load %arg1[%c2024, %c0_163] : memref<2472x64xf32, #tpu.memory_space<vmem>>, vector<4x4xf32>
    %cst_164 = arith.constant dense<0.000000e+00> : vector<4x64xf32>
    %367 = tpu.matmul %366, %365, %cst_164 {dimension_numbers = #tpu.dot_dimension_numbers<[1], [0], [0], [1], [0, 0, 1, 1], [], []>} : vector<4x4xf32>, vector<4x64xf32>, vector<4x64xf32> -> vector<4x64xf32>
    %c2032 = arith.constant 2032 : index
    %c0_165 = arith.constant 0 : index
    %368 = vector.load %arg1[%c2032, %c0_165] : memref<2472x64xf32, #tpu.memory_space<vmem>>, vector<4x4xf32>
    %cst_166 = arith.constant dense<0.000000e+00> : vector<4x64xf32>
    %369 = tpu.matmul %368, %365, %cst_166 {dimension_numbers = #tpu.dot_dimension_numbers<[1], [0], [0], [1], [0, 0, 1, 1], [], []>} : vector<4x4xf32>, vector<4x64xf32>, vector<4x64xf32> -> vector<4x64xf32>
    %c2040 = arith.constant 2040 : index
    %c0_167 = arith.constant 0 : index
    %370 = vector.load %arg1[%c2040, %c0_167] : memref<2472x64xf32, #tpu.memory_space<vmem>>, vector<64x64xf32>
    %cst_168 = arith.constant dense<0.000000e+00> : vector<4x64xf32>
    %371 = tpu.matmul %367, %370, %cst_168 {dimension_numbers = #tpu.dot_dimension_numbers<[1], [0], [0], [1], [0, 0, 1, 1], [], []>} : vector<4x64xf32>, vector<64x64xf32>, vector<4x64xf32> -> vector<4x64xf32>
    %c2104 = arith.constant 2104 : index
    %c0_169 = arith.constant 0 : index
    %372 = vector.load %arg1[%c2104, %c0_169] : memref<2472x64xf32, #tpu.memory_space<vmem>>, vector<64x64xf32>
    %cst_170 = arith.constant dense<0.000000e+00> : vector<4x64xf32>
    %373 = tpu.matmul %365, %372, %cst_170 {dimension_numbers = #tpu.dot_dimension_numbers<[1], [0], [0], [1], [0, 0, 1, 1], [], []>} : vector<4x64xf32>, vector<64x64xf32>, vector<4x64xf32> -> vector<4x64xf32>
    %374 = arith.addf %371, %373 : vector<4x64xf32>
    %c2168 = arith.constant 2168 : index
    %c0_171 = arith.constant 0 : index
    %375 = vector.load %arg1[%c2168, %c0_171] : memref<2472x64xf32, #tpu.memory_space<vmem>>, vector<64x64xf32>
    %cst_172 = arith.constant dense<0.000000e+00> : vector<4x64xf32>
    %376 = tpu.matmul %369, %375, %cst_172 {dimension_numbers = #tpu.dot_dimension_numbers<[1], [0], [0], [1], [0, 0, 1, 1], [], []>} : vector<4x64xf32>, vector<64x64xf32>, vector<4x64xf32> -> vector<4x64xf32>
    %377 = arith.addf %374, %376 : vector<4x64xf32>
    %cst_173 = arith.constant dense<0.000000e+00> : vector<64xf32>
    %378 = vector.multi_reduction <add>, %377, %cst_173 [0] : vector<4x64xf32> to vector<64xf32>
    %379 = vector.shape_cast %378 : vector<64xf32> to vector<1x64xf32>
    %380 = arith.mulf %377, %377 : vector<4x64xf32>
    %cst_174 = arith.constant dense<0.000000e+00> : vector<64xf32>
    %381 = vector.multi_reduction <add>, %380, %cst_174 [0] : vector<4x64xf32> to vector<64xf32>
    %382 = vector.shape_cast %381 : vector<64xf32> to vector<1x64xf32>
    %383 = tpu.concatenate %379, %382 in 0 : vector<1x64xf32>, vector<1x64xf32> -> vector<2x64xf32>
    %c2232 = arith.constant 2232 : index
    %c0_175 = arith.constant 0 : index
    %384 = vector.load %arg1[%c2232, %c0_175] : memref<2472x64xf32, #tpu.memory_space<vmem>>, vector<64x32xf32>
    %cst_176 = arith.constant dense<0.000000e+00> : vector<2x32xf32>
    %385 = tpu.matmul %383, %384, %cst_176 {dimension_numbers = #tpu.dot_dimension_numbers<[1], [0], [0], [1], [0, 0, 1, 1], [], []>} : vector<2x64xf32>, vector<64x32xf32>, vector<2x32xf32> -> vector<2x32xf32>
    %386 = vector.extract_strided_slice %385 {offsets = [0, 0], sizes = [1, 32], strides = [1, 1]} : vector<2x32xf32> to vector<1x32xf32>
    %cst_177 = arith.constant 1.250000e-01 : f32
    %387 = vector.broadcast %cst_177 : f32 to vector<1x32xf32>
    %388 = arith.mulf %386, %387 : vector<1x32xf32>
    %389 = vector.extract_strided_slice %385 {offsets = [1, 0], sizes = [1, 32], strides = [1, 1]} : vector<2x32xf32> to vector<1x32xf32>
    %cst_178 = arith.constant 1.250000e-01 : f32
    %390 = vector.broadcast %cst_178 : f32 to vector<1x32xf32>
    %391 = arith.mulf %389, %390 : vector<1x32xf32>
    %392 = arith.mulf %388, %388 : vector<1x32xf32>
    %393 = arith.subf %391, %392 : vector<1x32xf32>
    %c2328 = arith.constant 2328 : index
    %c0_179 = arith.constant 0 : index
    %394 = vector.load %arg1[%c2328, %c0_179] : memref<2472x64xf32, #tpu.memory_space<vmem>>, vector<2x32xf32>
    %395 = vector.extract_strided_slice %394 {offsets = [0, 0], sizes = [1, 32], strides = [1, 1]} : vector<2x32xf32> to vector<1x32xf32>
    %cst_180 = arith.constant 9.99999974E-6 : f32
    %396 = vector.broadcast %cst_180 : f32 to vector<1x32xf32>
    %397 = arith.addf %393, %396 : vector<1x32xf32>
    %398 = math.rsqrt %397 : vector<1x32xf32>
    %399 = arith.mulf %395, %398 : vector<1x32xf32>
    %400 = vector.extract_strided_slice %394 {offsets = [1, 0], sizes = [1, 32], strides = [1, 1]} : vector<2x32xf32> to vector<1x32xf32>
    %401 = arith.mulf %388, %399 : vector<1x32xf32>
    %402 = arith.subf %400, %401 : vector<1x32xf32>
    %403 = tpu.concatenate %399, %402 in 0 : vector<1x32xf32>, vector<1x32xf32> -> vector<2x32xf32>
    %c2296 = arith.constant 2296 : index
    %c0_181 = arith.constant 0 : index
    %404 = vector.load %arg1[%c2296, %c0_181] : memref<2472x64xf32, #tpu.memory_space<vmem>>, vector<32x64xf32>
    %cst_182 = arith.constant dense<0.000000e+00> : vector<2x64xf32>
    %405 = tpu.matmul %403, %404, %cst_182 {dimension_numbers = #tpu.dot_dimension_numbers<[1], [0], [0], [1], [0, 0, 1, 1], [], []>} : vector<2x32xf32>, vector<32x64xf32>, vector<2x64xf32> -> vector<2x64xf32>
    %406 = vector.extract_strided_slice %405 {offsets = [0, 0], sizes = [1, 64], strides = [1, 1]} : vector<2x64xf32> to vector<1x64xf32>
    %407 = vector.broadcast %406 : vector<1x64xf32> to vector<4x64xf32>
    %408 = arith.mulf %377, %407 : vector<4x64xf32>
    %409 = vector.extract_strided_slice %405 {offsets = [1, 0], sizes = [1, 64], strides = [1, 1]} : vector<2x64xf32> to vector<1x64xf32>
    %410 = vector.broadcast %409 : vector<1x64xf32> to vector<4x64xf32>
    %411 = arith.addf %408, %410 : vector<4x64xf32>
    %cst_183 = arith.constant 0.000000e+00 : f32
    %412 = vector.broadcast %cst_183 : f32 to vector<4x64xf32>
    %413 = arith.cmpf ogt, %411, %412 : vector<4x64xf32>
    %cst_184 = arith.constant 2.000000e-01 : f32
    %414 = vector.broadcast %cst_184 : f32 to vector<4x64xf32>
    %415 = arith.mulf %414, %411 : vector<4x64xf32>
    %416 = arith.select %413, %411, %415 : vector<4x64xi1>, vector<4x64xf32>
    %c2464 = arith.constant 2464 : index
    %c0_185 = arith.constant 0 : index
    %417 = vector.load %arg1[%c2464, %c0_185] : memref<2472x64xf32, #tpu.memory_space<vmem>>, vector<1x10xf32>
    %418 = vector.extract_strided_slice %416 {offsets = [0, 0], sizes = [2, 64], strides = [1, 1]} : vector<4x64xf32> to vector<2x64xf32>
    %c2336 = arith.constant 2336 : index
    %c0_186 = arith.constant 0 : index
    %419 = vector.load %arg1[%c2336, %c0_186] : memref<2472x64xf32, #tpu.memory_space<vmem>>, vector<64x10xf32>
    %cst_187 = arith.constant dense<0.000000e+00> : vector<2x10xf32>
    %420 = tpu.matmul %418, %419, %cst_187 {dimension_numbers = #tpu.dot_dimension_numbers<[1], [0], [0], [1], [0, 0, 1, 1], [], []>} : vector<2x64xf32>, vector<64x10xf32>, vector<2x10xf32> -> vector<2x10xf32>
    %421 = vector.broadcast %417 : vector<1x10xf32> to vector<2x10xf32>
    %422 = arith.addf %421, %420 : vector<2x10xf32>
    %423 = vector.extract_strided_slice %416 {offsets = [2, 0], sizes = [2, 64], strides = [1, 1]} : vector<4x64xf32> to vector<2x64xf32>
    %c2400 = arith.constant 2400 : index
    %c0_188 = arith.constant 0 : index
    %424 = vector.load %arg1[%c2400, %c0_188] : memref<2472x64xf32, #tpu.memory_space<vmem>>, vector<64x10xf32>
    %cst_189 = arith.constant dense<0.000000e+00> : vector<2x10xf32>
    %425 = tpu.matmul %423, %424, %cst_189 {dimension_numbers = #tpu.dot_dimension_numbers<[1], [0], [0], [1], [0, 0, 1, 1], [], []>} : vector<2x64xf32>, vector<64x10xf32>, vector<2x10xf32> -> vector<2x10xf32>
    %426 = arith.addf %422, %425 : vector<2x10xf32>
    %c0_190 = arith.constant 0 : index
    %c0_191 = arith.constant 0 : index
    %427 = vector.load %arg2[%c0_190, %c0_191] : memref<2x10xf32, #tpu.memory_space<vmem>>, vector<2x10xf32>
    tpu.vector_store %arg2[%c0_190, %c0_191], %426 {strides = array<i32>} : memref<2x10xf32, #tpu.memory_space<vmem>>, vector<2x10xf32>,
    return
  }
}

</mosaic_0001>

<bundles_post_ra>
// kernel: forward.1
= control target key start
LH: loop header
LB: loop body
LE: loop exit
PB: predicated region body
PF: predicated region fallthrough
CT: control target
= control target key end

     0   :  { %s3917_s0 = inlined_call_operand.vmem [shape: f32[64,32], index: 0, kind: input, shape index: {}]   ;;  %s3918_s1 = inlined_call_operand.vmem [shape: f32[2472,64], index: 1, kind: input, shape index: {}]   ;;  %s3919_s2 = inlined_call_operand.hbm [shape: f32[2,10], index: 2, kind: output, shape index: {}]  }
   0x1   :  { %v19_v0 = vld [vmem:[%s3917_s0 + $0x38] sm:$0xff]  ;;  %v18_v1 = vld [vmem:[%s3917_s0 + $0x30] sm:$0xff]  ;;  %v17_v2 = vld [vmem:[%s3917_s0 + $0x28] sm:$0xff] }
   0x2   :  { %90 = vmatpush.msra.mxu1 %v19_v0  ;;  %45 = vmatpush.msra.mxu0 %v19_v0  ;;  %v16_v3 = vld [vmem:[%s3917_s0 + $0x20] sm:$0xff] }
   0x3   :  { %135 = vmatpush.msra.mxu2 %v19_v0 }
   0x4   :  { %91 = vmatpush.msra.mxu1 %v18_v1  ;;  %46 = vmatpush.msra.mxu0 %v18_v1 }
   0x5   :  { %136 = vmatpush.msra.mxu2 %v18_v1 }
   0x6   :  { %7 = vsyncpa [#allocation3], 0  ;;  %92 = vmatpush.msra.mxu1 %v17_v2  ;;  %47 = vmatpush.msra.mxu0 %v17_v2  ;;  %v15_v4 = vld [vmem:[%s3917_s0 + $0x18] sm:$0xff]  ;;  %v14_v5 = vld [vmem:[%s3917_s0 + $0x10] sm:$0xff]  ;;  %vm24_vm0 = vcmask 523264   ;;  %vm164_vm1 = vcmask 261120  }
   0x7   :  { %137 = vmatpush.msra.mxu2 %v17_v2  ;;  %v13_v6 = vld [vmem:[%s3917_s0 + $0x8] sm:$0xff]  ;;  %v163_v7 = vld [vmem:[%s3918_s1 + $0x98] sm:$0xff]  ;;  %v162_v8 = vld [vmem:[%s3918_s1 + $0x90] sm:$0xff]  ;;  %vm296_vm2 = vcmask 392192   ;;  %vm327_vm3 = vcmask 1040384   ;;  %vm391_vm4 = vcmask 1042432  }
   0x8   :  { %93 = vmatpush.msra.mxu1 %v16_v3  ;;  %48 = vmatpush.msra.mxu0 %v16_v3  ;;  %v12_v9 = vld [vmem:[%s3917_s0] sm:$0xff]  ;;  %v161_v12 = vld [vmem:[%s3918_s1 + $0x88] sm:$0xff]  ;;  %v68_v17 = vld [vmem:[%s3918_s1 + $0x30] sm:$0xff]  ;;  %vm387_vm8 = vcmask 23552   ;;  %s2709_s6 = smov [#allocation2]   ;;  %s2546_s9 = sshll.u32 %s3919_s2, 4  ;;  %s2547_s9 = int_to_ptr.hbm [resolvable:$true] %s2546_s9 }
   0x9   :  { %138 = vmatpush.msra.mxu2 %v16_v3  ;;  %189 = vmatpush.msra.mxu3 %v163_v7  ;;  %v66_v10 = vld [vmem:[%s3918_s1 + $0x20] sm:$0xff]  ;;  %v67_v14 = vld [vmem:[%s3918_s1 + $0x28] sm:$0xff]  ;;  %v22_v18 = vld [vmem:[%s3918_s1 + $0x10] sm:$0xff]  ;;  %s2544_s0 = sshll.u32 %s2709_s6, 4  ;;  %s2545_s0 = int_to_ptr.vmem [resolvable:$true] %s2544_s0 }
   0xa   :  { %94 = vmatpush.msra.mxu1 %v15_v4  ;;  %49 = vmatpush.msra.mxu0 %v15_v4  ;;  %v20_v11 = vld [vmem:[%s3918_s1] sm:$0xff]  ;;  %v21_v15 = vld [vmem:[%s3918_s1 + $0x8] sm:$0xff]  ;;  %v113_v19 = vld [vmem:[%s3918_s1 + $0x50] sm:$0xff] }
   0xb   :  { %139 = vmatpush.msra.mxu2 %v15_v4  ;;  %190 = vmatpush.msra.mxu3 %v162_v8  ;;  %v111_v13 = vld [vmem:[%s3918_s1 + $0x40] sm:$0xff]  ;;  %v112_v16 = vld [vmem:[%s3918_s1 + $0x48] sm:$0xff]  ;;  %v69_v20 = vld [vmem:[%s3918_s1 + $0x38] sm:$0xff] }
   0xc   :  { %95 = vmatpush.msra.mxu1 %v14_v5  ;;  %50 = vmatpush.msra.mxu0 %v14_v5  ;;  %v23_v21 = vld [vmem:[%s3918_s1 + $0x18] sm:$0xff]  ;;  %v160_v23 = vld [vmem:[%s3918_s1 + $0x80] sm:$0xff]  ;;  %v158_v25 = vld [vmem:[%s3918_s1 + $0x70] sm:$0xff] }
   0xd   :  { %140 = vmatpush.msra.mxu2 %v14_v5  ;;  %191 = vmatpush.msra.mxu3 %v161_v12  ;;  %v114_v22 = vld [vmem:[%s3918_s1 + $0x58] sm:$0xff]  ;;  %v157_v27 = vld [vmem:[%s3918_s1 + $0x68] sm:$0xff]  ;;  %v156_v28 = vld [vmem:[%s3918_s1 + $0x60] sm:$0xff] }
   0xe   :  { %96 = vmatpush.msra.mxu1 %v13_v6  ;;  %51 = vmatpush.msra.mxu0 %v13_v6  ;;  %v159_v24 = vld [vmem:[%s3918_s1 + $0x78] sm:$0xff]  ;;  %v249_v30 = vld [vmem:[%s3918_s1 + $0xb0] sm:$0xff]  ;;  %v248_v31 = vld [vmem:[%s3918_s1 + $0xa8] sm:$0xff] }
   0xf   :  { %141 = vmatpush.msra.mxu2 %v13_v6  ;;  %192 = vmatpush.msra.mxu3 %v160_v23  ;;  %v250_v26 = vld [vmem:[%s3918_s1 + $0xb8] sm:$0xff]  ;;  %v247_v32 = vld [vmem:[%s3918_s1 + $0xa0] sm:$0xff]  ;;  %v334_v50 = vld [vmem:[%s3918_s1 + $0xe8] sm:$0xff] }
  0x10   :  { %97 = vmatpush.msra.mxu1 %v12_v9  ;;  %52 = vmatpush.msra.mxu0 %v12_v9  ;;  %v333_v52 = vld [vmem:[%s3918_s1 + $0xe0] sm:$0xff]  ;;  %v332_v53 = vld [vmem:[%s3918_s1 + $0xd8] sm:$0xff]  ;;  %v331_v54 = vld [vmem:[%s3918_s1 + $0xd0] sm:$0xff] }
  0x11   :  { %2559 = vmatmul.msk.f32.vlgmr.msra.gmra.mxu1 %vm24_vm0, %v66_v10  ;;  %2555 = vmatmul.msk.f32.vlgmr.msra.gmra.mxu0 %vm24_vm0, %v20_v11  ;;  %v330_v56 = vld [vmem:[%s3918_s1 + $0xc8] sm:$0xff]  ;;  %v329_v57 = vld [vmem:[%s3918_s1 + $0xc0] sm:$0xff] }
  0x12   :  { %142 = vmatpush.msra.mxu2 %v12_v9  ;;  %230 = vmatpush.msrb.mxu3 %v159_v24 }
  0x13   :  { %2563 = vmatmul.msk.f32.vlgmr.msra.gmra.mxu2 %vm24_vm0, %v111_v13  ;;  %275 = vmatpush.msrb.mxu0 %v250_v26 }
  0x14   :  { %231 = vmatpush.msrb.mxu3 %v158_v25  ;;  %348 = vmatpush.msrb.mxu1 %v334_v50 }
  0x15   :  { %276 = vmatpush.msrb.mxu0 %v249_v30 }
  0x16   :  { %232 = vmatpush.msrb.mxu3 %v157_v27  ;;  %349 = vmatpush.msrb.mxu1 %v333_v52 }
  0x17   :  { %277 = vmatpush.msrb.mxu0 %v248_v31 }
  0x18   :  { %233 = vmatpush.msrb.mxu3 %v156_v28  ;;  %350 = vmatpush.msrb.mxu1 %v332_v53 }
  0x19   :  { %2560 = vmatmul.msk.f32.gmra.mxu1 %vm24_vm0, %v67_v14  ;;  %2556 = vmatmul.msk.f32.gmra.mxu0 %vm24_vm0, %v21_v15 }
  0x1a   :  { %278 = vmatpush.msrb.mxu0 %v247_v32  ;;  %351 = vmatpush.msrb.mxu1 %v331_v54 }
  0x1b   :  { %2564 = vmatmul.msk.f32.gmra.mxu2 %vm24_vm0, %v112_v16 }
  0x1c   :  { %352 = vmatpush.msrb.mxu1 %v330_v56 }
  0x1e   :  { %353 = vmatpush.msrb.mxu1 %v329_v57 }
  0x21   :  { %2561 = vmatmul.msk.f32.gmra.mxu1 %vm24_vm0, %v68_v17  ;;  %2557 = vmatmul.msk.f32.gmra.mxu0 %vm24_vm0, %v22_v18 }
  0x23   :  { %2565 = vmatmul.msk.f32.gmra.mxu2 %vm24_vm0, %v113_v19 }
  0x29   :  { %2562 = vmatmul.msk.f32.gmra.mxu1 %vm24_vm0, %v69_v20  ;;  %2558 = vmatmul.msk.f32.gmra.mxu0 %vm24_vm0, %v23_v21 }
  0x2b   :  { %2566 = vmatmul.msk.f32.gmra.mxu2 %vm24_vm0, %v114_v22 }
  0x8e   :  { %v99_v29 = vpop.f32.mrf.mxu1  ;;  %v54_v38 = vpop.f32.mrf.mxu0 }
  0x8f   :  { %2567 = vmatmul.msk.f32.vlgmr.msra.gmra.mxu3 %vm164_vm1, %v99_v29 }
  0x96   :  { %v102_v33 = vpop.f32.mrf.mxu1  ;;  %v144_v34 = vpop.f32.mrf.mxu2 }
  0x97   :  { %2568 = vmatmul.msk.f32.gmra.mxu3 %vm164_vm1, %v102_v33  ;;  %2575 = vmatmul.msk.f32.vlgmr.msrb.gmra.mxu0 %vm164_vm1, %v144_v34  ;;  %v57_v41 = vpop.f32.mrf.mxu0 }
  0x9e   :  { %v105_v35 = vpop.f32.mrf.mxu1  ;;  %v147_v36 = vpop.f32.mrf.mxu2 }
  0x9f   :  { %2569 = vmatmul.msk.f32.gmra.mxu3 %vm164_vm1, %v105_v35  ;;  %2576 = vmatmul.msk.f32.gmra.mxu0 %vm164_vm1, %v147_v36  ;;  %v60_v42 = vpop.f32.mrf.mxu0 }
  0xa6   :  { %v108_v37 = vpop.f32.mrf.mxu1  ;;  %v150_v39 = vpop.f32.mrf.mxu2 }
  0xa7   :  { %2570 = vmatmul.msk.f32.gmra.mxu3 %vm164_vm1, %v108_v37  ;;  %2577 = vmatmul.msk.f32.gmra.mxu0 %vm164_vm1, %v150_v39  ;;  %v63_v43 = vpop.f32.mrf.mxu0 }
  0xae   :  { %v153_v40 = vpop.f32.mrf.mxu2 }
  0xaf   :  { %2571 = vmatmul.msk.f32.vlgmr.msrb.gmra.mxu3 %vm164_vm1, %v54_v38  ;;  %2578 = vmatmul.msk.f32.gmra.mxu0 %vm164_vm1, %v153_v40 }
  0xb7   :  { %2572 = vmatmul.msk.f32.gmra.mxu3 %vm164_vm1, %v57_v41  ;;  %v386_v41 = vld [vmem:[%s3918_s1 + $0xf0] sm:$0x7] }
  0xb8   :  { %2580 = vmatpush.msk.msrb.mxu2 %vm391_vm4, %v386_v41 }
  0xbf   :  { %2573 = vmatmul.msk.f32.gmra.mxu3 %vm164_vm1, %v60_v42 }
  0xc7   :  { %2574 = vmatmul.msk.f32.gmra.mxu3 %vm164_vm1, %v63_v43  ;;  %v538_v43 = vld [vmem:[%s3918_s1 + $0x198] sm:$0xff] }
  0xc8   :  { %561 = vmatpush.msra.mxu3 %v538_v43 }
 0x112   :  { %v194_v44 = vpop.f32.mrf.mxu3 }
 0x114   :  { %v280_v48 = vpop.f32.mrf.mxu0 }
 0x11a   :  { %v197_v45 = vpop.f32.mrf.mxu3 }
 0x11c   :  { %v283_v51 = vpop.f32.mrf.mxu0 }
 0x122   :  { %v200_v46 = vpop.f32.mrf.mxu3 }
 0x124   :  { %v286_v59 = vpop.f32.mrf.mxu0 }
 0x12a   :  { %v203_v47 = vpop.f32.mrf.mxu3 }
 0x12c   :  { %v289_v7 = vpop.f32.mrf.mxu0 }
 0x132   :  { %v235_v49 = vpop.f32.mrf.mxu3 }
 0x133   :  { %v236_v60 = vadd.f32 %v235_v49, %v194_v44 }
 0x135   :  { %v2865_v0 = vadd.f32 %v280_v48, %v236_v60  ;;  %v536_v60 = vld [vmem:[%s3918_s1 + $0x188] sm:$0xff] }
 0x137   :  { %v310_v3 = vmul.f32 %v2865_v0, %v2865_v0  ;;  %v297_v8 = vsel %vm296_vm2, %v2865_v0, 0.0 }
 0x139   :  { %v314_v13 = vsel %vm296_vm2, %v310_v3, 0.0 }
 0x13a   :  { %v238_v55 = vpop.f32.mrf.mxu3 }
 0x13b   :  { %v239_v58 = vadd.f32 %v238_v55, %v197_v45 }
 0x13d   :  { %v2863_v62 = vadd.f32 %v283_v51, %v239_v58  ;;  %v364_v51 = vld [vmem:[%s3918_s1 + $0xf8] sm:$0x3] }
 0x13f   :  { %v311_v2 = vmul.f32 %v2863_v62, %v2863_v62  ;;  %v298_v4 = vsel %vm296_vm2, %v2863_v62, 0.0 }
 0x140   :  { %v299_v12 = vadd.f32 %v298_v4, %v297_v8 }
 0x141   :  { %v315_v9 = vsel %vm296_vm2, %v311_v2, 0.0  ;;  %v533_v2 = vld [vmem:[%s3918_s1 + $0x170] sm:$0xff] }
 0x142   :  { %v241_v61 = vpop.f32.mrf.mxu3  ;;  %v316_v16 = vadd.f32 %v315_v9, %v314_v13 }
 0x143   :  { %v242_v63 = vadd.f32 %v241_v61, %v200_v46  ;;  %v535_v61 = vld [vmem:[%s3918_s1 + $0x180] sm:$0xff] }
 0x145   :  { %v2867_v1 = vadd.f32 %v286_v59, %v242_v63  ;;  %v537_v59 = vld [vmem:[%s3918_s1 + $0x190] sm:$0xff]  ;;  %v534_v63 = vld [vmem:[%s3918_s1 + $0x178] sm:$0xff] }
 0x146   :  { %562 = vmatpush.msra.mxu3 %v537_v59  ;;  %v703_v59 = vld [vmem:[%s3918_s1 + $0x1d0] sm:$0xff] }
 0x147   :  { %v312_v5 = vmul.f32 %v2867_v1, %v2867_v1  ;;  %v300_v10 = vsel %vm296_vm2, %v2867_v1, 0.0 }
 0x148   :  { %v301_v17 = vadd.f32 %v300_v10, %v299_v12  ;;  %563 = vmatpush.msra.mxu3 %v536_v60 }
 0x149   :  { %v317_v14 = vsel %vm296_vm2, %v312_v5, 0.0 }
 0x14a   :  { %v244_v6 = vpop.f32.mrf.mxu3  ;;  %v318_v20 = vadd.f32 %v317_v14, %v316_v16  ;;  %564 = vmatpush.msra.mxu3 %v535_v61 }
 0x14b   :  { %v245_v11 = vadd.f32 %v244_v6, %v203_v47 }
 0x14c   :  { %565 = vmatpush.msra.mxu3 %v534_v63 }
 0x14d   :  { %v2884_v15 = vadd.f32 %v289_v7, %v245_v11 }
 0x14e   :  { %566 = vmatpush.msra.mxu3 %v533_v2 }
 0x14f   :  { %v302_v18 = vsel %vm296_vm2, %v2884_v15, 0.0  ;;  %v313_v19 = vmul.f32 %v2884_v15, %v2884_v15 }
 0x150   :  { %v303_v21 = vadd.f32 %v302_v18, %v301_v17 }
 0x151   :  { %v319_v22 = vsel %vm296_vm2, %v313_v19, 0.0 }
 0x152   :  { %v304_v23 = vrot.slane %v303_v21, 4  ;;  %v320_v24 = vadd.f32 %v319_v22, %v318_v20  ;;  %v437_v22 = vld [vmem:[%s3918_s1 + $0x100] sm:$0xff] }
 0x154   :  { %v305_v25 = vadd.f32 %v304_v23, %v303_v21  ;;  %v321_v26 = vrot.slane %v320_v24, 4  ;;  %v482_v23 = vld [vmem:[%s3918_s1 + $0x120] sm:$0xff] }
 0x156   :  { %v306_v27 = vrot.slane %v305_v25, 2  ;;  %v322_v28 = vadd.f32 %v321_v26, %v320_v24  ;;  %v626_v24 = vld [vmem:[%s3918_s1 + $0x1c8] sm:$0xff] }
 0x157   :  { %v528_v26 = vld [vmem:[%s3918_s1 + $0x148] sm:$0xff] }
 0x158   :  { %v307_v29 = vadd.f32 %v306_v27, %v305_v25  ;;  %v323_v30 = vrot.slane %v322_v28, 2  ;;  %v529_v25 = vld [vmem:[%s3918_s1 + $0x150] sm:$0xff]  ;;  %v625_v27 = vld [vmem:[%s3918_s1 + $0x1c0] sm:$0xff] }
 0x15a   :  { %v308_v31 = vrot.slane %v307_v29, 1  ;;  %v324_v32 = vadd.f32 %v323_v30, %v322_v28  ;;  %v438_v28 = vld [vmem:[%s3918_s1 + $0x108] sm:$0xff]  ;;  %v439_v30 = vld [vmem:[%s3918_s1 + $0x110] sm:$0xff] }
 0x15c   :  { %v325_v33 = vrot.slane %v324_v32, 1  ;;  %v309_v34 = vadd.f32 %v308_v31, %v307_v29  ;;  %v483_v29 = vld [vmem:[%s3918_s1 + $0x128] sm:$0xff]  ;;  %v484_v31 = vld [vmem:[%s3918_s1 + $0x130] sm:$0xff] }
 0x15e   :  { %v326_v35 = vadd.f32 %v325_v33, %v324_v32  ;;  %v440_v32 = vld [vmem:[%s3918_s1 + $0x118] sm:$0xff] }
 0x15f   :  { %v485_v33 = vld [vmem:[%s3918_s1 + $0x138] sm:$0xff] }
 0x160   :  { %v328_v36 = vsel %vm327_vm3, %v309_v34, %v326_v35  ;;  %v527_v34 = vld [vmem:[%s3918_s1 + $0x140] sm:$0xff]  ;;  %v624_v35 = vld [vmem:[%s3918_s1 + $0x1b8] sm:$0xff] }
 0x161   :  { %2579 = vmatmul.msk.f32.vlgmr.msrb.gmra.mxu1 %vm296_vm2, %v328_v36  ;;  %v623_v36 = vld [vmem:[%s3918_s1 + $0x1b0] sm:$0xff] }
 0x1de   :  { %v355_v37 = vpop.f32.mrf.mxu1 }
 0x1df   :  { %v358_v38 = vmul.f32 0.001953125, %v355_v37  ;;  %v622_v37 = vld [vmem:[%s3918_s1 + $0x1a8] sm:$0xff] }
 0x1e1   :  { %v359_v39 = vmul.f32 %v358_v38, %v358_v38 }
 0x1e3   :  { %v361_v40 = vrot.slane %v359_v39, 7 }
 0x1e5   :  { %v363_v42 = vsub.f32 %v358_v38, %v361_v40 }
 0x1e7   :  { %v365_v44 = vadd.f32 1e-05, %v363_v42 }
 0x1e9   :  { %2667 = vrsqrt.f32 %v365_v44  ;;  %vm372_vm6 = vweird.f32 %v365_v44 }
 0x1ef   :  { %v2668_v45 = vpop.eup %2667 }
 0x1f0   :  { %v367_v46 = vmul.f32 %v2668_v45, %v365_v44  ;;  %vm373_vm5 = vweird.f32 %v2668_v45 }
 0x1f1   :  { %vm374_vm7 = vmor %vm372_vm6, %vm373_vm5 }
 0x1f2   :  { %v368_v47 = vmul.f32 %v2668_v45, %v367_v46 }
 0x1f4   :  { %v369_v48 = vmul.f32 0.5, %v368_v47 }
 0x1f6   :  { %v370_v49 = vsub.f32 1.5, %v369_v48 }
 0x1f8   :  { %v371_v50 = vmul.f32 %v2668_v45, %v370_v49 }
 0x1fa   :  { %v375_v52 = vsel %vm374_vm7, %v2668_v45, %v371_v50 }
 0x1fb   :  { %v377_v53 = vrot.slane %v375_v52, 1  ;;  %v708_v52 = vld [vmem:[%s3918_s1 + $0x1f8] sm:$0xff] }
 0x1fd   :  { %v379_v54 = vmul.f32 %v377_v53, %v364_v51  ;;  %v707_v53 = vld [vmem:[%s3918_s1 + $0x1f0] sm:$0xff] }
 0x1ff   :  { %v380_v55 = vmul.f32 %v379_v54, %v358_v38  ;;  %v621_v38 = vld [vmem:[%s3918_s1 + $0x1a0] sm:$0xff] }
 0x201   :  { %v382_v56 = vrot.slane %v380_v55, 7  ;;  %v705_v55 = vld [vmem:[%s3918_s1 + $0x1e0] sm:$0xff] }
 0x203   :  { %v384_v57 = vsub.f32 %v364_v51, %v382_v56 }
 0x205   :  { %v385_v58 = vsel %vm327_vm3, %v379_v54, %v384_v57  ;;  %v706_v54 = vld [vmem:[%s3918_s1 + $0x1e8] sm:$0xff]  ;;  %v704_v57 = vld [vmem:[%s3918_s1 + $0x1d8] sm:$0xff] }
 0x206   :  { %2581 = vmatmul.msk.f32.vlgmr.msrb.gmra.mxu2 %vm387_vm8, %v385_v58 }
 0x289   :  { %v412_v3 = vpop.f32.mrf.mxu2 }
 0x28a   :  { %v415_v4 = vperm.slane %v412_v3, 0  ;;  %v420_v5 = vperm.slane %v412_v3, 1 }
 0x28c   :  { %v416_v6 = vmul.f32 %v415_v4, %v2865_v0  ;;  %v419_v7 = vmul.f32 %v415_v4, %v2884_v15  ;;  %v418_v8 = vmul.f32 %v415_v4, %v2867_v1  ;;  %v417_v9 = vmul.f32 %v415_v4, %v2863_v62  ;;  %v532_v0 = vld [vmem:[%s3918_s1 + $0x168] sm:$0xff]  ;;  %v531_v62 = vld [vmem:[%s3918_s1 + $0x160] sm:$0xff]  ;;  %v530_v15 = vld [vmem:[%s3918_s1 + $0x158] sm:$0xff] }
 0x28d   :  { %602 = vmatpush.msra.mxu0 %v532_v0 }
 0x28e   :  { %v421_v10 = vadd.f32 %v420_v5, %v416_v6  ;;  %v424_v11 = vadd.f32 %v420_v5, %v419_v7  ;;  %v423_v12 = vadd.f32 %v420_v5, %v418_v8  ;;  %v422_v13 = vadd.f32 %v420_v5, %v417_v9 }
 0x28f   :  { %603 = vmatpush.msra.mxu0 %v531_v62 }
 0x290   :  { %vm428_vm9 = vcmp.gt.f32.partialorder %v424_v11, 0.0  ;;  %v432_v14 = vmul.f32 0.2, %v424_v11  ;;  %vm425_vm10 = vcmp.gt.f32.partialorder %v421_v10, 0.0  ;;  %v429_v16 = vmul.f32 0.2, %v421_v10 }
 0x291   :  { %vm427_vm11 = vcmp.gt.f32.partialorder %v423_v12, 0.0  ;;  %v431_v17 = vmul.f32 0.2, %v423_v12  ;;  %v430_v20 = vmul.f32 0.2, %v422_v13  ;;  %vm426_vm12 = vcmp.gt.f32.partialorder %v422_v13, 0.0  ;;  %604 = vmatpush.msra.mxu0 %v530_v15 }
 0x292   :  { %v436_v18 = vsel %vm428_vm9, %v424_v11, %v432_v14  ;;  %v433_v19 = vsel %vm425_vm10, %v421_v10, %v429_v16  ;;  %vm1090_vm10 = vcmask 64512  }
 0x293   :  { %465 = vmatpush.msra.mxu1 %v436_v18  ;;  %510 = vmatpush.msra.mxu2 %v436_v18  ;;  %v435_v1 = vsel %vm427_vm11, %v423_v12, %v431_v17  ;;  %v434_v21 = vsel %vm426_vm12, %v422_v13, %v430_v20 }
 0x294   :  { %2590 = vmatmul.msk.f32.vlgmr.msra.gmra.mxu3 %vm296_vm2, %v433_v19  ;;  %605 = vmatpush.msra.mxu0 %v529_v25 }
 0x295   :  { %466 = vmatpush.msra.mxu1 %v435_v1  ;;  %511 = vmatpush.msra.mxu2 %v435_v1 }
 0x296   :  { %606 = vmatpush.msra.mxu0 %v528_v26 }
 0x297   :  { %467 = vmatpush.msra.mxu1 %v434_v21  ;;  %512 = vmatpush.msra.mxu2 %v434_v21 }
 0x298   :  { %607 = vmatpush.msra.mxu0 %v527_v34 }
 0x299   :  { %468 = vmatpush.msra.mxu1 %v433_v19  ;;  %513 = vmatpush.msra.mxu2 %v433_v19 }
 0x29a   :  { %2582 = vmatmul.msk.f32.vlgmr.msra.gmra.mxu1 %vm164_vm1, %v437_v22  ;;  %2586 = vmatmul.msk.f32.vlgmr.msra.gmra.mxu2 %vm164_vm1, %v482_v23 }
 0x29b   :  { %649 = vmatpush.msrb.mxu1 %v626_v24  ;;  %722 = vmatpush.msrb.mxu2 %v708_v52 }
 0x29c   :  { %2591 = vmatmul.msk.f32.gmra.mxu3 %vm296_vm2, %v434_v21 }
 0x29d   :  { %650 = vmatpush.msrb.mxu1 %v625_v27  ;;  %723 = vmatpush.msrb.mxu2 %v707_v53  ;;  %v738_v53 = vld [vmem:[%s3918_s1 + $0x208] sm:$0x3] }
 0x29f   :  { %651 = vmatpush.msrb.mxu1 %v624_v35  ;;  %724 = vmatpush.msrb.mxu2 %v706_v54 }
 0x2a1   :  { %652 = vmatpush.msrb.mxu1 %v623_v36  ;;  %725 = vmatpush.msrb.mxu2 %v705_v55 }
 0x2a2   :  { %2583 = vmatmul.msk.f32.gmra.mxu1 %vm164_vm1, %v438_v28  ;;  %2587 = vmatmul.msk.f32.gmra.mxu2 %vm164_vm1, %v483_v29 }
 0x2a3   :  { %653 = vmatpush.msrb.mxu1 %v622_v37  ;;  %726 = vmatpush.msrb.mxu2 %v704_v57 }
 0x2a4   :  { %2592 = vmatmul.msk.f32.gmra.mxu3 %vm296_vm2, %v435_v1 }
 0x2a5   :  { %654 = vmatpush.msrb.mxu1 %v621_v38  ;;  %727 = vmatpush.msrb.mxu2 %v703_v59 }
 0x2aa   :  { %2584 = vmatmul.msk.f32.gmra.mxu1 %vm164_vm1, %v439_v30  ;;  %2588 = vmatmul.msk.f32.gmra.mxu2 %vm164_vm1, %v484_v31 }
 0x2ac   :  { %2593 = vmatmul.msk.f32.gmra.mxu3 %vm296_vm2, %v436_v18 }
 0x2b2   :  { %2585 = vmatmul.msk.f32.gmra.mxu1 %vm164_vm1, %v440_v32  ;;  %2589 = vmatmul.msk.f32.gmra.mxu2 %vm164_vm1, %v485_v33 }
 0x317   :  { %v470_v39 = vpop.f32.mrf.mxu1  ;;  %v568_v47 = vpop.f32.mrf.mxu3 }
 0x318   :  { %2594 = vmatmul.msk.f32.vlgmr.msra.gmra.mxu0 %vm296_vm2, %v470_v39 }
 0x31d   :  { %v515_v40 = vpop.f32.mrf.mxu2 }
 0x31e   :  { %2598 = vmatmul.msk.f32.vlgmr.msrb.gmra.mxu1 %vm296_vm2, %v515_v40 }
 0x31f   :  { %v473_v41 = vpop.f32.mrf.mxu1  ;;  %v571_v50 = vpop.f32.mrf.mxu3 }
 0x320   :  { %2595 = vmatmul.msk.f32.gmra.mxu0 %vm296_vm2, %v473_v41 }
 0x325   :  { %v518_v42 = vpop.f32.mrf.mxu2 }
 0x326   :  { %2599 = vmatmul.msk.f32.gmra.mxu1 %vm296_vm2, %v518_v42 }
 0x327   :  { %v476_v43 = vpop.f32.mrf.mxu1  ;;  %v574_v60 = vpop.f32.mrf.mxu3 }
 0x328   :  { %2596 = vmatmul.msk.f32.gmra.mxu0 %vm296_vm2, %v476_v43 }
 0x32d   :  { %v521_v44 = vpop.f32.mrf.mxu2 }
 0x32e   :  { %2600 = vmatmul.msk.f32.gmra.mxu1 %vm296_vm2, %v521_v44  ;;  %v760_v44 = vld [vmem:[%s3918_s1 + $0x200] sm:$0x7] }
 0x32f   :  { %v479_v45 = vpop.f32.mrf.mxu1  ;;  %v577_v12 = vpop.f32.mrf.mxu3  ;;  %2603 = vmatpush.msk.msra.mxu2 %vm391_vm4, %v760_v44 }
 0x330   :  { %2597 = vmatmul.msk.f32.gmra.mxu0 %vm296_vm2, %v479_v45 }
 0x335   :  { %v524_v46 = vpop.f32.mrf.mxu2 }
 0x336   :  { %2601 = vmatmul.msk.f32.gmra.mxu1 %vm296_vm2, %v524_v46 }
 0x395   :  { %v609_v48 = vpop.f32.mrf.mxu0 }
 0x396   :  { %v610_v63 = vadd.f32 %v609_v48, %v568_v47 }
 0x39b   :  { %v656_v49 = vpop.f32.mrf.mxu1 }
 0x39c   :  { %v3024_v5 = vadd.f32 %v656_v49, %v610_v63  ;;  %v912_v63 = vld [vmem:[%s3918_s1 + $0x290] sm:$0xff] }
 0x39d   :  { %v612_v51 = vpop.f32.mrf.mxu0 }
 0x39e   :  { %v613_v61 = vadd.f32 %v612_v51, %v571_v50  ;;  %v685_v9 = vmul.f32 %v3024_v5, %v3024_v5  ;;  %v672_v13 = vsel %vm296_vm2, %v3024_v5, 0.0 }
 0x3a0   :  { %v689_v20 = vsel %vm296_vm2, %v685_v9, 0.0 }
 0x3a3   :  { %v659_v56 = vpop.f32.mrf.mxu1 }
 0x3a4   :  { %v3022_v2 = vadd.f32 %v659_v56, %v613_v61  ;;  %v913_v61 = vld [vmem:[%s3918_s1 + $0x298] sm:$0xff] }
 0x3a5   :  { %v615_v58 = vpop.f32.mrf.mxu0  ;;  %930 = vmatpush.msra.mxu1 %v913_v61 }
 0x3a6   :  { %v616_v3 = vadd.f32 %v615_v58, %v574_v60  ;;  %v686_v7 = vmul.f32 %v3022_v2, %v3022_v2  ;;  %v673_v10 = vsel %vm296_vm2, %v3022_v2, 0.0 }
 0x3a7   :  { %v674_v18 = vadd.f32 %v673_v10, %v672_v13  ;;  %931 = vmatpush.msra.mxu1 %v912_v63 }
 0x3a8   :  { %v690_v14 = vsel %vm296_vm2, %v686_v7, 0.0 }
 0x3a9   :  { %v691_v1 = vadd.f32 %v690_v14, %v689_v20 }
 0x3ab   :  { %v662_v4 = vpop.f32.mrf.mxu1 }
 0x3ac   :  { %v3026_v6 = vadd.f32 %v662_v4, %v616_v3 }
 0x3ad   :  { %v618_v8 = vpop.f32.mrf.mxu0 }
 0x3ae   :  { %v687_v11 = vmul.f32 %v3026_v6, %v3026_v6  ;;  %v675_v16 = vsel %vm296_vm2, %v3026_v6, 0.0  ;;  %v619_v17 = vadd.f32 %v618_v8, %v577_v12 }
 0x3af   :  { %v676_v15 = vadd.f32 %v675_v16, %v674_v18 }
 0x3b0   :  { %v692_v0 = vsel %vm296_vm2, %v687_v11, 0.0 }
 0x3b1   :  { %v693_v23 = vadd.f32 %v692_v0, %v691_v1  ;;  %v840_v1 = vld [vmem:[%s3918_s1 + $0x220] sm:$0xff] }
 0x3b3   :  { %v665_v19 = vpop.f32.mrf.mxu1 }
 0x3b4   :  { %v671_v62 = vadd.f32 %v665_v19, %v619_v17 }
 0x3b6   :  { %v677_v21 = vsel %vm296_vm2, %v671_v62, 0.0  ;;  %v688_v22 = vmul.f32 %v671_v62, %v671_v62 }
 0x3b7   :  { %v678_v24 = vadd.f32 %v677_v21, %v676_v15  ;;  %v871_v15 = vld [vmem:[%s3918_s1 + $0x230] sm:$0xff]  ;;  %v907_v21 = vld [vmem:[%s3918_s1 + $0x268] sm:$0xff] }
 0x3b8   :  { %v694_v25 = vsel %vm296_vm2, %v688_v22, 0.0  ;;  %v977_v22 = vld [vmem:[%s3918_s1 + $0x2c8] sm:$0xff] }
 0x3b9   :  { %v679_v26 = vrot.slane %v678_v24, 4  ;;  %v695_v27 = vadd.f32 %v694_v25, %v693_v23  ;;  %v906_v23 = vld [vmem:[%s3918_s1 + $0x260] sm:$0xff]  ;;  %v905_v25 = vld [vmem:[%s3918_s1 + $0x258] sm:$0xff] }
 0x3bb   :  { %v680_v28 = vadd.f32 %v679_v26, %v678_v24  ;;  %v696_v29 = vrot.slane %v695_v27, 4  ;;  %v976_v24 = vld [vmem:[%s3918_s1 + $0x2c0] sm:$0xff]  ;;  %v975_v26 = vld [vmem:[%s3918_s1 + $0x2b8] sm:$0xff] }
 0x3bd   :  { %v681_v30 = vrot.slane %v680_v28, 2  ;;  %v697_v31 = vadd.f32 %v696_v29, %v695_v27  ;;  %v810_v27 = vld [vmem:[%s3918_s1 + $0x218] sm:$0xff]  ;;  %v841_v29 = vld [vmem:[%s3918_s1 + $0x228] sm:$0xff] }
 0x3bf   :  { %v682_v32 = vadd.f32 %v681_v30, %v680_v28  ;;  %v698_v33 = vrot.slane %v697_v31, 2  ;;  %v974_v28 = vld [vmem:[%s3918_s1 + $0x2b0] sm:$0xff]  ;;  %v872_v30 = vld [vmem:[%s3918_s1 + $0x238] sm:$0xff] }
 0x3c1   :  { %v683_v34 = vrot.slane %v682_v32, 1  ;;  %v699_v35 = vadd.f32 %v698_v33, %v697_v31  ;;  %v904_v31 = vld [vmem:[%s3918_s1 + $0x250] sm:$0xff]  ;;  %v911_v33 = vld [vmem:[%s3918_s1 + $0x288] sm:$0xff] }
 0x3c2   :  { %932 = vmatpush.msra.mxu1 %v911_v33 }
 0x3c3   :  { %v700_v36 = vrot.slane %v699_v35, 1  ;;  %v684_v37 = vadd.f32 %v683_v34, %v682_v32  ;;  %v903_v32 = vld [vmem:[%s3918_s1 + $0x248] sm:$0xff]  ;;  %v902_v34 = vld [vmem:[%s3918_s1 + $0x240] sm:$0xff] }
 0x3c5   :  { %v701_v38 = vadd.f32 %v700_v36, %v699_v35  ;;  %v973_v35 = vld [vmem:[%s3918_s1 + $0x2a8] sm:$0xff]  ;;  %v910_v36 = vld [vmem:[%s3918_s1 + $0x280] sm:$0xff] }
 0x3c6   :  { %933 = vmatpush.msra.mxu1 %v910_v36 }
 0x3c7   :  { %v702_v39 = vsel %vm327_vm3, %v684_v37, %v701_v38  ;;  %v972_v37 = vld [vmem:[%s3918_s1 + $0x2a0] sm:$0xff]  ;;  %v909_v38 = vld [vmem:[%s3918_s1 + $0x278] sm:$0xff] }
 0x3c8   :  { %2602 = vmatmul.msk.f32.vlgmr.msrb.gmra.mxu2 %vm296_vm2, %v702_v39  ;;  %v908_v39 = vld [vmem:[%s3918_s1 + $0x270] sm:$0xff]  ;;  %934 = vmatpush.msra.mxu1 %v909_v38 }
 0x3ca   :  { %935 = vmatpush.msra.mxu1 %v908_v39 }
 0x44b   :  { %v729_v40 = vpop.f32.mrf.mxu2 }
 0x44c   :  { %v732_v41 = vmul.f32 0.001953125, %v729_v40 }
 0x44e   :  { %v733_v42 = vmul.f32 %v732_v41, %v732_v41 }
 0x450   :  { %v735_v43 = vrot.slane %v733_v42, 7 }
 0x452   :  { %v737_v45 = vsub.f32 %v732_v41, %v735_v43 }
 0x454   :  { %v739_v46 = vadd.f32 1e-05, %v737_v45 }
 0x456   :  { %2669 = vrsqrt.f32 %v739_v46  ;;  %vm746_vm14 = vweird.f32 %v739_v46 }
 0x45c   :  { %v2670_v47 = vpop.eup %2669 }
 0x45d   :  { %v741_v48 = vmul.f32 %v2670_v47, %v739_v46  ;;  %vm747_vm13 = vweird.f32 %v2670_v47  ;;  %v1037_v46 = vld [vmem:[%s3918_s1 + $0x308] sm:$0xff] }
 0x45e   :  { %vm748_vm15 = vmor %vm746_vm14, %vm747_vm13  ;;  %1049 = vmatpush.msrb.mxu1 %v1037_v46  ;;  %v1200_v46 = vld [vmem:[%s3918_s1 + $0x398] sm:$0xff]  ;;  %vm1128_vm13 = vcmask 130048  }
 0x45f   :  { %v742_v49 = vmul.f32 %v2670_v47, %v741_v48  ;;  %v1035_v48 = vld [vmem:[%s3918_s1 + $0x2f8] sm:$0xff] }
 0x461   :  { %v743_v50 = vmul.f32 0.5, %v742_v49  ;;  %v1034_v49 = vld [vmem:[%s3918_s1 + $0x2f0] sm:$0xff] }
 0x463   :  { %v744_v51 = vsub.f32 1.5, %v743_v50  ;;  %v1033_v50 = vld [vmem:[%s3918_s1 + $0x2e8] sm:$0xff] }
 0x465   :  { %v745_v52 = vmul.f32 %v2670_v47, %v744_v51  ;;  %v1032_v51 = vld [vmem:[%s3918_s1 + $0x2e0] sm:$0xff] }
 0x467   :  { %v749_v54 = vsel %vm748_vm15, %v2670_v47, %v745_v52  ;;  %v1036_v47 = vld [vmem:[%s3918_s1 + $0x300] sm:$0xff]  ;;  %v1031_v52 = vld [vmem:[%s3918_s1 + $0x2d8] sm:$0xff] }
 0x468   :  { %v751_v55 = vrot.slane %v749_v54, 1  ;;  %1050 = vmatpush.msrb.mxu1 %v1036_v47  ;;  %v1030_v54 = vld [vmem:[%s3918_s1 + $0x2d0] sm:$0xff] }
 0x469   :  { %v1199_v47 = vld [vmem:[%s3918_s1 + $0x390] sm:$0xff] }
 0x46a   :  { %v753_v56 = vmul.f32 %v751_v55, %v738_v53  ;;  %1051 = vmatpush.msrb.mxu1 %v1035_v48  ;;  %v1198_v48 = vld [vmem:[%s3918_s1 + $0x388] sm:$0xff] }
 0x46c   :  { %v754_v57 = vmul.f32 %v753_v56, %v732_v41  ;;  %1052 = vmatpush.msrb.mxu1 %v1034_v49  ;;  %v1197_v49 = vld [vmem:[%s3918_s1 + $0x380] sm:$0xff] }
 0x46e   :  { %v756_v58 = vrot.slane %v754_v57, 7  ;;  %1053 = vmatpush.msrb.mxu1 %v1033_v50  ;;  %v1196_v50 = vld [vmem:[%s3918_s1 + $0x378] sm:$0xff] }
 0x470   :  { %v758_v59 = vsub.f32 %v738_v53, %v756_v58  ;;  %1054 = vmatpush.msrb.mxu1 %v1032_v51  ;;  %v1195_v51 = vld [vmem:[%s3918_s1 + $0x370] sm:$0xff] }
 0x472   :  { %v759_v60 = vsel %vm327_vm3, %v753_v56, %v758_v59  ;;  %1055 = vmatpush.msrb.mxu1 %v1031_v52  ;;  %v1194_v52 = vld [vmem:[%s3918_s1 + $0x368] sm:$0xff] }
 0x473   :  { %2604 = vmatmul.msk.f32.vlgmr.msra.gmra.mxu2 %vm387_vm8, %v759_v60 }
 0x474   :  { %1056 = vmatpush.msrb.mxu1 %v1030_v54  ;;  %v1192_v54 = vld [vmem:[%s3918_s1 + $0x358] sm:$0xff] }
 0x4f6   :  { %v784_v3 = vpop.f32.mrf.mxu2 }
 0x4f7   :  { %v787_v4 = vperm.slane %v784_v3, 0  ;;  %v792_v7 = vperm.slane %v784_v3, 1 }
 0x4f9   :  { %v791_v8 = vmul.f32 %v787_v4, %v671_v62  ;;  %v790_v9 = vmul.f32 %v787_v4, %v3026_v6  ;;  %v789_v10 = vmul.f32 %v787_v4, %v3022_v2  ;;  %v788_v11 = vmul.f32 %v787_v4, %v3024_v5  ;;  %v809_v5 = vld [vmem:[%s3918_s1 + $0x210] sm:$0xff] }
 0x4fb   :  { %v796_v12 = vadd.f32 %v792_v7, %v791_v8  ;;  %v795_v13 = vadd.f32 %v792_v7, %v790_v9  ;;  %v794_v14 = vadd.f32 %v792_v7, %v789_v10  ;;  %v793_v18 = vadd.f32 %v792_v7, %v788_v11 }
 0x4fd   :  { %vm800_vm4 = vcmp.gt.f32.partialorder %v796_v12, 0.0  ;;  %v804_v16 = vmul.f32 0.2, %v796_v12  ;;  %v803_v17 = vmul.f32 0.2, %v795_v13  ;;  %vm799_vm5 = vcmp.gt.f32.partialorder %v795_v13, 0.0 }
 0x4fe   :  { %v802_v20 = vmul.f32 0.2, %v794_v14  ;;  %vm798_vm6 = vcmp.gt.f32.partialorder %v794_v14, 0.0  ;;  %v801_v6 = vmul.f32 0.2, %v793_v18  ;;  %vm797_vm7 = vcmp.gt.f32.partialorder %v793_v18, 0.0 }
 0x4ff   :  { %v808_v19 = vsel %vm800_vm4, %v796_v12, %v804_v16  ;;  %v807_v0 = vsel %vm799_vm5, %v795_v13, %v803_v17 }
 0x500   :  { %829 = vmatpush.msrb.mxu2 %v808_v19  ;;  %860 = vmatpush.msrb.mxu3 %v808_v19  ;;  %v806_v2 = vsel %vm798_vm6, %v794_v14, %v802_v20  ;;  %v805_v62 = vsel %vm797_vm7, %v793_v18, %v801_v6 }
 0x501   :  { %891 = vmatpush.msrb.mxu0 %v808_v19 }
 0x502   :  { %830 = vmatpush.msrb.mxu2 %v807_v0  ;;  %861 = vmatpush.msrb.mxu3 %v807_v0 }
 0x503   :  { %892 = vmatpush.msrb.mxu0 %v807_v0 }
 0x504   :  { %831 = vmatpush.msrb.mxu2 %v806_v2  ;;  %862 = vmatpush.msrb.mxu3 %v806_v2 }
 0x505   :  { %893 = vmatpush.msrb.mxu0 %v806_v2 }
 0x506   :  { %832 = vmatpush.msrb.mxu2 %v805_v62  ;;  %863 = vmatpush.msrb.mxu3 %v805_v62 }
 0x507   :  { %894 = vmatpush.msrb.mxu0 %v805_v62  ;;  %2605 = vmatmul.msk.f32.vlgmr.msrb.gmra.mxu2 %vm164_vm1, %v809_v5 }
 0x508   :  { %2607 = vmatmul.msk.f32.vlgmr.msrb.gmra.mxu3 %vm164_vm1, %v840_v1  ;;  %2609 = vmatmul.msk.f32.vlgmr.msrb.gmra.mxu0 %vm164_vm1, %v871_v15 }
 0x509   :  { %959 = vmatpush.msra.mxu2 %v907_v21  ;;  %994 = vmatpush.msra.mxu3 %v977_v22 }
 0x50b   :  { %960 = vmatpush.msra.mxu2 %v906_v23  ;;  %995 = vmatpush.msra.mxu3 %v976_v24 }
 0x50d   :  { %961 = vmatpush.msra.mxu2 %v905_v25  ;;  %996 = vmatpush.msra.mxu3 %v975_v26  ;;  %v1089_v25 = vld [vmem:[%s3918_s1 + $0x310] sm:$0xff] }
 0x50e   :  { %1109 = vmatpush.msra.mxu0 %v1089_v25  ;;  %v1326_v25 = vld [vmem:[%s3918_s1 + $0x418] sm:$0xff] }
 0x50f   :  { %2606 = vmatmul.msk.f32.gmra.mxu2 %vm164_vm1, %v810_v27  ;;  %997 = vmatpush.msra.mxu3 %v974_v28  ;;  %v1204_v27 = vld [vmem:[%s3918_s1 + $0x3b8] sm:$0xff]  ;;  %v1203_v28 = vld [vmem:[%s3918_s1 + $0x3b0] sm:$0xff] }
 0x510   :  { %2608 = vmatmul.msk.f32.gmra.mxu3 %vm164_vm1, %v841_v29  ;;  %2610 = vmatmul.msk.f32.gmra.mxu0 %vm164_vm1, %v872_v30  ;;  %v1202_v30 = vld [vmem:[%s3918_s1 + $0x3a8] sm:$0xff] }
 0x511   :  { %962 = vmatpush.msra.mxu2 %v904_v31  ;;  %998 = vmatpush.msra.mxu3 %v973_v35 }
 0x512   :  { %1248 = vmatpush.msrb.mxu0 %v1196_v50 }
 0x513   :  { %963 = vmatpush.msra.mxu2 %v903_v32  ;;  %999 = vmatpush.msra.mxu3 %v972_v37  ;;  %v1067_v37 = vld [vmem:[%s3918_s1 + $0x318] sm:$0x3] }
 0x514   :  { %1249 = vmatpush.msrb.mxu0 %v1195_v51 }
 0x515   :  { %964 = vmatpush.msra.mxu2 %v902_v34  ;;  %1219 = vmatpush.msrb.mxu3 %v1204_v27  ;;  %v1324_v27 = vld [vmem:[%s3918_s1 + $0x408] sm:$0xff] }
 0x516   :  { %1250 = vmatpush.msrb.mxu0 %v1194_v52 }
 0x517   :  { %1220 = vmatpush.msrb.mxu3 %v1203_v28 }
 0x519   :  { %1221 = vmatpush.msrb.mxu3 %v1202_v30 }
 0x585   :  { %v896_v40 = vpop.f32.mrf.mxu0 }
 0x586   :  { %2615 = vmatmul.msk.f32.vlgmr.msra.gmra.mxu3 %vm296_vm2, %v896_v40 }
 0x58a   :  { %v834_v41 = vpop.f32.mrf.mxu2 }
 0x58b   :  { %2613 = vmatmul.msk.f32.vlgmr.msra.gmra.mxu2 %vm296_vm2, %v834_v41  ;;  %v865_v42 = vpop.f32.mrf.mxu3 }
 0x58c   :  { %2611 = vmatmul.msk.f32.vlgmr.msra.gmra.mxu1 %vm296_vm2, %v865_v42 }
 0x58d   :  { %v899_v43 = vpop.f32.mrf.mxu0 }
 0x58e   :  { %2616 = vmatmul.msk.f32.gmra.mxu3 %vm296_vm2, %v899_v43 }
 0x592   :  { %v837_v44 = vpop.f32.mrf.mxu2 }
 0x593   :  { %2614 = vmatmul.msk.f32.gmra.mxu2 %vm296_vm2, %v837_v44  ;;  %v868_v45 = vpop.f32.mrf.mxu3 }
 0x594   :  { %2612 = vmatmul.msk.f32.gmra.mxu1 %vm296_vm2, %v868_v45  ;;  %v1201_v45 = vld [vmem:[%s3918_s1 + $0x3a0] sm:$0xff] }
 0x595   :  { %1222 = vmatpush.msrb.mxu3 %v1201_v45 }
 0x597   :  { %1223 = vmatpush.msrb.mxu3 %v1200_v46 }
 0x599   :  { %1224 = vmatpush.msrb.mxu3 %v1199_v47 }
 0x59b   :  { %1225 = vmatpush.msrb.mxu3 %v1198_v48 }
 0x59d   :  { %1226 = vmatpush.msrb.mxu3 %v1197_v49 }
 0x609   :  { %v937_v53 = vpop.f32.mrf.mxu1  ;;  %v1001_v55 = vpop.f32.mrf.mxu3 }
 0x60e   :  { %v966_v56 = vpop.f32.mrf.mxu2 }
 0x60f   :  { %v967_v57 = vadd.f32 %v966_v56, %v937_v53  ;;  %v1193_v53 = vld [vmem:[%s3918_s1 + $0x360] sm:$0xff]  ;;  %v1190_v56 = vld [vmem:[%s3918_s1 + $0x348] sm:$0xff] }
 0x610   :  { %1251 = vmatpush.msrb.mxu0 %v1193_v53 }
 0x611   :  { %v940_v58 = vpop.f32.mrf.mxu1  ;;  %v3167_v59 = vadd.f32 %v1001_v55, %v967_v57  ;;  %v1004_v61 = vpop.f32.mrf.mxu3  ;;  %v1191_v55 = vld [vmem:[%s3918_s1 + $0x350] sm:$0xff] }
 0x612   :  { %1252 = vmatpush.msrb.mxu0 %v1192_v54 }
 0x613   :  { %v1018_v3 = vmul.f32 %v3167_v59, %v3167_v59  ;;  %v1009_v7 = vsel %vm24_vm0, %v3167_v59, 0.0 }
 0x614   :  { %1253 = vmatpush.msrb.mxu0 %v1191_v55 }
 0x615   :  { %v1020_v11 = vsel %vm24_vm0, %v1018_v3, 0.0 }
 0x616   :  { %v969_v60 = vpop.f32.mrf.mxu2  ;;  %1254 = vmatpush.msrb.mxu0 %v1190_v56 }
 0x617   :  { %v970_v63 = vadd.f32 %v969_v60, %v940_v58 }
 0x619   :  { %v3171_v4 = vadd.f32 %v1004_v61, %v970_v63 }
 0x61b   :  { %v1010_v8 = vsel %vm24_vm0, %v3171_v4, 0.0  ;;  %v1019_v9 = vmul.f32 %v3171_v4, %v3171_v4 }
 0x61c   :  { %v1011_v10 = vadd.f32 %v1010_v8, %v1009_v7 }
 0x61d   :  { %v1021_v12 = vsel %vm24_vm0, %v1019_v9, 0.0 }
 0x61e   :  { %v1012_v13 = vrot.slane %v1011_v10, 4  ;;  %v1022_v14 = vadd.f32 %v1021_v12, %v1020_v11  ;;  %v1126_v12 = vld [vmem:[%s3918_s1 + $0x320] sm:$0xff] }
 0x620   :  { %v1013_v16 = vadd.f32 %v1012_v13, %v1011_v10  ;;  %v1023_v17 = vrot.slane %v1022_v14, 4  ;;  %v1269_v13 = vld [vmem:[%s3918_s1 + $0x3f0] sm:$0xff] }
 0x622   :  { %v1014_v18 = vrot.slane %v1013_v16, 2  ;;  %v1024_v19 = vadd.f32 %v1023_v17, %v1022_v14  ;;  %v1268_v14 = vld [vmem:[%s3918_s1 + $0x3e8] sm:$0xff] }
 0x623   :  { %v1127_v17 = vld [vmem:[%s3918_s1 + $0x328] sm:$0xff] }
 0x624   :  { %v1015_v20 = vadd.f32 %v1014_v18, %v1013_v16  ;;  %v1025_v0 = vrot.slane %v1024_v19, 2  ;;  %v1267_v16 = vld [vmem:[%s3918_s1 + $0x3e0] sm:$0xff]  ;;  %v1159_v18 = vld [vmem:[%s3918_s1 + $0x338] sm:$0xff] }
 0x626   :  { %v1016_v6 = vrot.slane %v1015_v20, 1  ;;  %v1026_v2 = vadd.f32 %v1025_v0, %v1024_v19  ;;  %v1189_v19 = vld [vmem:[%s3918_s1 + $0x340] sm:$0xff]  ;;  %v1265_v0 = vld [vmem:[%s3918_s1 + $0x3d0] sm:$0xff] }
 0x627   :  { %1255 = vmatpush.msrb.mxu0 %v1189_v19 }
 0x628   :  { %v1027_v5 = vrot.slane %v1026_v2, 1  ;;  %v1017_v62 = vadd.f32 %v1016_v6, %v1015_v20  ;;  %v1266_v20 = vld [vmem:[%s3918_s1 + $0x3d8] sm:$0xff]  ;;  %v1264_v6 = vld [vmem:[%s3918_s1 + $0x3c8] sm:$0xff] }
 0x62a   :  { %v1028_v1 = vadd.f32 %v1027_v5, %v1026_v2  ;;  %v1263_v2 = vld [vmem:[%s3918_s1 + $0x3c0] sm:$0xff] }
 0x62c   :  { %v1029_v15 = vsel %vm327_vm3, %v1017_v62, %v1028_v1 }
 0x62d   :  { %2617 = vmatmul.msk.f32.vlgmr.msrb.gmra.mxu1 %vm24_vm0, %v1029_v15 }
 0x6aa   :  { %v1058_v21 = vpop.f32.mrf.mxu1 }
 0x6ab   :  { %v1061_v22 = vmul.f32 0.0078125, %v1058_v21  ;;  %v1330_v21 = vld [vmem:[%s3918_s1 + $0x438] sm:$0xff] }
 0x6ad   :  { %v1062_v23 = vmul.f32 %v1061_v22, %v1061_v22 }
 0x6af   :  { %v1064_v24 = vrot.slane %v1062_v23, 7  ;;  %v1328_v23 = vld [vmem:[%s3918_s1 + $0x428] sm:$0xff] }
 0x6b1   :  { %v1066_v26 = vsub.f32 %v1061_v22, %v1064_v24  ;;  %v1327_v24 = vld [vmem:[%s3918_s1 + $0x420] sm:$0xff] }
 0x6b3   :  { %v1068_v29 = vadd.f32 1e-05, %v1066_v26  ;;  %v1325_v26 = vld [vmem:[%s3918_s1 + $0x410] sm:$0xff] }
 0x6b5   :  { %2671 = vrsqrt.f32 %v1068_v29  ;;  %vm1075_vm8 = vweird.f32 %v1068_v29 }
 0x6bb   :  { %v2672_v31 = vpop.eup %2671 }
 0x6bc   :  { %v1070_v32 = vmul.f32 %v2672_v31, %v1068_v29  ;;  %vm1076_vm2 = vweird.f32 %v2672_v31  ;;  %v1323_v29 = vld [vmem:[%s3918_s1 + $0x400] sm:$0xff] }
 0x6bd   :  { %vm1077_vm9 = vmor %vm1075_vm8, %vm1076_vm2 }
 0x6be   :  { %v1071_v33 = vmul.f32 %v2672_v31, %v1070_v32 }
 0x6c0   :  { %v1072_v34 = vmul.f32 0.5, %v1071_v33 }
 0x6c2   :  { %v1073_v35 = vsub.f32 1.5, %v1072_v34 }
 0x6c4   :  { %v1074_v36 = vmul.f32 %v2672_v31, %v1073_v35 }
 0x6c6   :  { %v1078_v38 = vsel %vm1077_vm9, %v2672_v31, %v1074_v36 }
 0x6c7   :  { %v1080_v39 = vrot.slane %v1078_v38, 1 }
 0x6c9   :  { %v1082_v40 = vmul.f32 %v1080_v39, %v1067_v37 }
 0x6cb   :  { %v1083_v41 = vmul.f32 %v1082_v40, %v1061_v22  ;;  %v1329_v22 = vld [vmem:[%s3918_s1 + $0x430] sm:$0xff] }
 0x6cd   :  { %v1085_v42 = vrot.slane %v1083_v41, 7 }
 0x6cf   :  { %v1087_v43 = vsub.f32 %v1067_v37, %v1085_v42 }
 0x6d1   :  { %v1088_v44 = vsel %vm327_vm3, %v1082_v40, %v1087_v43 }
 0x6d2   :  { %2618 = vmatmul.msk.f32.vlgmr.msra.gmra.mxu0 %vm1090_vm10, %v1088_v44 }
 0x74f   :  { %v1111_v57 = vpop.f32.mrf.mxu0 }
 0x750   :  { %v1114_v58 = vperm.slane %v1111_v57, 0  ;;  %v1117_v63 = vperm.slane %v1111_v57, 1 }
 0x752   :  { %v1115_v60 = vmul.f32 %v1114_v58, %v3167_v59  ;;  %v1116_v61 = vmul.f32 %v1114_v58, %v3171_v4  ;;  %v1158_v59 = vld [vmem:[%s3918_s1 + $0x330] sm:$0xff]  ;;  %v1270_v4 = vld [vmem:[%s3918_s1 + $0x3f8] sm:$0xff] }
 0x754   :  { %v1118_v3 = vadd.f32 %v1117_v63, %v1115_v60  ;;  %v1119_v7 = vadd.f32 %v1117_v63, %v1116_v61 }
 0x756   :  { %v1122_v8 = vmul.f32 0.2, %v1118_v3  ;;  %vm1121_vm11 = vcmp.gt.f32.partialorder %v1119_v7, 0.0  ;;  %v1123_v9 = vmul.f32 0.2, %v1119_v7  ;;  %vm1120_vm12 = vcmp.gt.f32.partialorder %v1118_v3, 0.0 }
 0x758   :  { %v1125_v10 = vsel %vm1121_vm11, %v1119_v7, %v1123_v9  ;;  %v1124_v11 = vsel %vm1120_vm12, %v1118_v3, %v1122_v8  ;;  %v1382_v8 = vld [vmem:[%s3918_s1 + $0x440] sm:$0xff] }
 0x759   :  { %1149 = vmatpush.msra.mxu1 %v1125_v10  ;;  %1180 = vmatpush.msrb.mxu2 %v1125_v10 }
 0x75a   :  { %2623 = vmatmul.msk.f32.vlgmr.msrb.gmra.mxu3 %vm24_vm0, %v1124_v11 }
 0x75b   :  { %1150 = vmatpush.msra.mxu1 %v1124_v11  ;;  %1181 = vmatpush.msrb.mxu2 %v1124_v11 }
 0x75c   :  { %2619 = vmatmul.msk.f32.vlgmr.msra.gmra.mxu1 %vm1128_vm13, %v1126_v12  ;;  %2621 = vmatmul.msk.f32.vlgmr.msrb.gmra.mxu2 %vm1128_vm13, %v1158_v59 }
 0x75d   :  { %1285 = vmatpush.msrb.mxu1 %v1270_v4  ;;  %1342 = vmatpush.msra.mxu2 %v1330_v21 }
 0x75e   :  { %1401 = vmatpush.msra.mxu3 %v1382_v8  ;;  %v1601_v8 = vld [vmem:[%s3918_s1 + $0x530] sm:$0xff] }
 0x75f   :  { %1286 = vmatpush.msrb.mxu1 %v1269_v13  ;;  %1343 = vmatpush.msra.mxu2 %v1329_v22 }
 0x761   :  { %1287 = vmatpush.msrb.mxu1 %v1268_v14  ;;  %1344 = vmatpush.msra.mxu2 %v1328_v23 }
 0x762   :  { %2624 = vmatmul.msk.f32.gmra.mxu3 %vm24_vm0, %v1125_v10 }
 0x763   :  { %1288 = vmatpush.msrb.mxu1 %v1267_v16  ;;  %1345 = vmatpush.msra.mxu2 %v1327_v24  ;;  %v1360_v16 = vld [vmem:[%s3918_s1 + $0x448] sm:$0x3] }
 0x764   :  { %2620 = vmatmul.msk.f32.gmra.mxu1 %vm1128_vm13, %v1127_v17  ;;  %2622 = vmatmul.msk.f32.gmra.mxu2 %vm1128_vm13, %v1159_v18 }
 0x765   :  { %1289 = vmatpush.msrb.mxu1 %v1266_v20  ;;  %1346 = vmatpush.msra.mxu2 %v1326_v25 }
 0x767   :  { %1290 = vmatpush.msrb.mxu1 %v1265_v0  ;;  %1347 = vmatpush.msra.mxu2 %v1325_v26 }
 0x769   :  { %1291 = vmatpush.msrb.mxu1 %v1264_v6  ;;  %1348 = vmatpush.msra.mxu2 %v1324_v27 }
 0x76b   :  { %1292 = vmatpush.msrb.mxu1 %v1263_v2  ;;  %1349 = vmatpush.msra.mxu2 %v1323_v29 }
 0x7d9   :  { %v1152_v5 = vpop.f32.mrf.mxu1 }
 0x7da   :  { %2625 = vmatmul.msk.f32.vlgmr.msrb.gmra.mxu0 %vm24_vm0, %v1152_v5  ;;  %v1505_v5 = vld [vmem:[%s3918_s1 + $0x4e0] sm:$0xff] }
 0x7db   :  { %1517 = vmatpush.msra.mxu1 %v1505_v5 }
 0x7dd   :  { %v1228_v30 = vpop.f32.mrf.mxu3 }
 0x7df   :  { %v1183_v62 = vpop.f32.mrf.mxu2 }
 0x7e0   :  { %2627 = vmatmul.msk.f32.vlgmr.msrb.gmra.mxu1 %vm24_vm0, %v1183_v62  ;;  %v1504_v62 = vld [vmem:[%s3918_s1 + $0x4d8] sm:$0xff] }
 0x7e1   :  { %v1155_v1 = vpop.f32.mrf.mxu1  ;;  %1518 = vmatpush.msra.mxu1 %v1504_v62 }
 0x7e2   :  { %2626 = vmatmul.msk.f32.gmra.mxu0 %vm24_vm0, %v1155_v1  ;;  %v1503_v1 = vld [vmem:[%s3918_s1 + $0x4d0] sm:$0xff] }
 0x7e3   :  { %1519 = vmatpush.msra.mxu1 %v1503_v1 }
 0x7e5   :  { %v1231_v35 = vpop.f32.mrf.mxu3 }
 0x7e7   :  { %v1186_v15 = vpop.f32.mrf.mxu2 }
 0x7e8   :  { %2628 = vmatmul.msk.f32.gmra.mxu1 %vm24_vm0, %v1186_v15  ;;  %v1502_v15 = vld [vmem:[%s3918_s1 + $0x4c8] sm:$0xff] }
 0x7e9   :  { %1520 = vmatpush.msra.mxu1 %v1502_v15 }
 0x857   :  { %v1257_v28 = vpop.f32.mrf.mxu0 }
 0x858   :  { %v1258_v32 = vadd.f32 %v1257_v28, %v1228_v30 }
 0x85d   :  { %v1294_v31 = vpop.f32.mrf.mxu1 }
 0x85e   :  { %v3311_v34 = vadd.f32 %v1294_v31, %v1258_v32  ;;  %v1418_v31 = vld [vmem:[%s3918_s1 + $0x450] sm:$0xff] }
 0x85f   :  { %v1260_v33 = vpop.f32.mrf.mxu0 }
 0x860   :  { %v1261_v36 = vadd.f32 %v1260_v33, %v1231_v35  ;;  %v1311_v38 = vmul.f32 %v3311_v34, %v3311_v34  ;;  %v1302_v40 = vsel %vm24_vm0, %v3311_v34, 0.0  ;;  %v1442_v33 = vld [vmem:[%s3918_s1 + $0x458] sm:$0xff]  ;;  %v1497_v35 = vld [vmem:[%s3918_s1 + $0x4a0] sm:$0xff] }
 0x862   :  { %v1313_v44 = vsel %vm24_vm0, %v1311_v38, 0.0  ;;  %v1558_v38 = vld [vmem:[%s3918_s1 + $0x518] sm:$0xff] }
 0x865   :  { %v1297_v37 = vpop.f32.mrf.mxu1 }
 0x866   :  { %v1301_v39 = vadd.f32 %v1297_v37, %v1261_v36  ;;  %v1559_v36 = vld [vmem:[%s3918_s1 + $0x520] sm:$0xff]  ;;  %v1496_v37 = vld [vmem:[%s3918_s1 + $0x498] sm:$0xff] }
 0x868   :  { %v1303_v41 = vsel %vm24_vm0, %v1301_v39, 0.0  ;;  %v1312_v42 = vmul.f32 %v1301_v39, %v1301_v39 }
 0x869   :  { %v1304_v43 = vadd.f32 %v1303_v41, %v1302_v40  ;;  %v1557_v40 = vld [vmem:[%s3918_s1 + $0x510] sm:$0xff]  ;;  %v1494_v41 = vld [vmem:[%s3918_s1 + $0x488] sm:$0xff] }
 0x86a   :  { %v1314_v45 = vsel %vm24_vm0, %v1312_v42, 0.0  ;;  %v1556_v42 = vld [vmem:[%s3918_s1 + $0x508] sm:$0xff] }
 0x86b   :  { %v1305_v46 = vrot.slane %v1304_v43, 4  ;;  %v1315_v47 = vadd.f32 %v1314_v45, %v1313_v44  ;;  %v1555_v44 = vld [vmem:[%s3918_s1 + $0x500] sm:$0xff]  ;;  %v1492_v45 = vld [vmem:[%s3918_s1 + $0x478] sm:$0xff] }
 0x86d   :  { %v1306_v48 = vadd.f32 %v1305_v46, %v1304_v43  ;;  %v1316_v49 = vrot.slane %v1315_v47, 4  ;;  %v1493_v43 = vld [vmem:[%s3918_s1 + $0x480] sm:$0xff]  ;;  %v1554_v46 = vld [vmem:[%s3918_s1 + $0x4f8] sm:$0xff] }
 0x86f   :  { %v1307_v50 = vrot.slane %v1306_v48, 2  ;;  %v1317_v51 = vadd.f32 %v1316_v49, %v1315_v47  ;;  %v1491_v47 = vld [vmem:[%s3918_s1 + $0x470] sm:$0xff]  ;;  %v1490_v49 = vld [vmem:[%s3918_s1 + $0x468] sm:$0xff] }
 0x871   :  { %v1308_v52 = vadd.f32 %v1307_v50, %v1306_v48  ;;  %v1318_v53 = vrot.slane %v1317_v51, 2  ;;  %v1501_v48 = vld [vmem:[%s3918_s1 + $0x4c0] sm:$0xff]  ;;  %v1553_v50 = vld [vmem:[%s3918_s1 + $0x4f0] sm:$0xff] }
 0x872   :  { %1521 = vmatpush.msra.mxu1 %v1501_v48  ;;  %v1751_v48 = vld [vmem:[%s3918_s1 + $0x5f0] sm:$0xff] }
 0x873   :  { %v1309_v54 = vrot.slane %v1308_v52, 1  ;;  %v1319_v55 = vadd.f32 %v1318_v53, %v1317_v51  ;;  %v1500_v51 = vld [vmem:[%s3918_s1 + $0x4b8] sm:$0xff]  ;;  %v1499_v53 = vld [vmem:[%s3918_s1 + $0x4b0] sm:$0xff] }
 0x874   :  { %1522 = vmatpush.msra.mxu1 %v1500_v51  ;;  %v1748_v51 = vld [vmem:[%s3918_s1 + $0x5d8] sm:$0xff] }
 0x875   :  { %v1320_v56 = vrot.slane %v1319_v55, 1  ;;  %v1310_v57 = vadd.f32 %v1309_v54, %v1308_v52  ;;  %v1552_v52 = vld [vmem:[%s3918_s1 + $0x4e8] sm:$0xff] }
 0x876   :  { %v1498_v54 = vld [vmem:[%s3918_s1 + $0x4a8] sm:$0xff]  ;;  %1523 = vmatpush.msra.mxu1 %v1499_v53 }
 0x877   :  { %v1321_v58 = vadd.f32 %v1320_v56, %v1319_v55  ;;  %v1746_v53 = vld [vmem:[%s3918_s1 + $0x5c8] sm:$0xff] }
 0x878   :  { %1524 = vmatpush.msra.mxu1 %v1498_v54  ;;  %v1745_v54 = vld [vmem:[%s3918_s1 + $0x5c0] sm:$0xff] }
 0x879   :  { %v1322_v60 = vsel %vm327_vm3, %v1310_v57, %v1321_v58  ;;  %v1607_v58 = vld [vmem:[%s3918_s1 + $0x560] sm:$0xff] }
 0x87a   :  { %2629 = vmatmul.msk.f32.vlgmr.msra.gmra.mxu2 %vm24_vm0, %v1322_v60  ;;  %v1606_v60 = vld [vmem:[%s3918_s1 + $0x558] sm:$0xff] }
 0x8fd   :  { %v1351_v61 = vpop.f32.mrf.mxu2 }
 0x8fe   :  { %v1354_v63 = vmul.f32 0.0078125, %v1351_v61  ;;  %v1605_v61 = vld [vmem:[%s3918_s1 + $0x550] sm:$0xff] }
 0x900   :  { %v1355_v3 = vmul.f32 %v1354_v63, %v1354_v63 }
 0x902   :  { %v1357_v7 = vrot.slane %v1355_v3, 7  ;;  %v1603_v3 = vld [vmem:[%s3918_s1 + $0x540] sm:$0xff] }
 0x904   :  { %v1359_v9 = vsub.f32 %v1354_v63, %v1357_v7  ;;  %v1602_v7 = vld [vmem:[%s3918_s1 + $0x538] sm:$0xff] }
 0x906   :  { %v1361_v10 = vadd.f32 1e-05, %v1359_v9  ;;  %v1600_v9 = vld [vmem:[%s3918_s1 + $0x528] sm:$0xff] }
 0x908   :  { %2673 = vrsqrt.f32 %v1361_v10  ;;  %vm1368_vm15 = vweird.f32 %v1361_v10 }
 0x90e   :  { %v2674_v11 = vpop.eup %2673 }
 0x90f   :  { %v1363_v12 = vmul.f32 %v2674_v11, %v1361_v10  ;;  %vm1369_vm14 = vweird.f32 %v2674_v11 }
 0x910   :  { %vm1370_vm4 = vmor %vm1368_vm15, %vm1369_vm14 }
 0x911   :  { %v1364_v59 = vmul.f32 %v2674_v11, %v1363_v12 }
 0x913   :  { %v1365_v4 = vmul.f32 0.5, %v1364_v59 }
 0x915   :  { %v1366_v13 = vsub.f32 1.5, %v1365_v4 }
 0x917   :  { %v1367_v14 = vmul.f32 %v2674_v11, %v1366_v13 }
 0x919   :  { %v1371_v17 = vsel %vm1370_vm4, %v2674_v11, %v1367_v14 }
 0x91a   :  { %v1373_v18 = vrot.slane %v1371_v17, 1 }
 0x91c   :  { %v1375_v19 = vmul.f32 %v1373_v18, %v1360_v16 }
 0x91e   :  { %v1376_v20 = vmul.f32 %v1375_v19, %v1354_v63  ;;  %v1604_v63 = vld [vmem:[%s3918_s1 + $0x548] sm:$0xff] }
 0x920   :  { %v1378_v0 = vrot.slane %v1376_v20, 7 }
 0x922   :  { %v1380_v6 = vsub.f32 %v1360_v16, %v1378_v0 }
 0x924   :  { %v1381_v2 = vsel %vm327_vm3, %v1375_v19, %v1380_v6 }
 0x925   :  { %2630 = vmatmul.msk.f32.vlgmr.msra.gmra.mxu3 %vm1090_vm10, %v1381_v2 }
 0x9a8   :  { %v1403_v21 = vpop.f32.mrf.mxu3 }
 0x9a9   :  { %v1406_v22 = vperm.slane %v1403_v21, 0  ;;  %v1409_v25 = vperm.slane %v1403_v21, 1 }
 0x9ab   :  { %v1407_v23 = vmul.f32 %v1406_v22, %v3311_v34  ;;  %v1408_v24 = vmul.f32 %v1406_v22, %v1301_v39  ;;  %v1466_v34 = vld [vmem:[%s3918_s1 + $0x460] sm:$0xff]  ;;  %v1495_v39 = vld [vmem:[%s3918_s1 + $0x490] sm:$0xff] }
 0x9ad   :  { %v1410_v26 = vadd.f32 %v1409_v25, %v1407_v23  ;;  %v1411_v27 = vadd.f32 %v1409_v25, %v1408_v24 }
 0x9af   :  { %vm1413_vm5 = vcmp.gt.f32.partialorder %v1411_v27, 0.0  ;;  %v1415_v28 = vmul.f32 0.2, %v1411_v27  ;;  %v1414_v29 = vmul.f32 0.2, %v1410_v26  ;;  %vm1412_vm6 = vcmp.gt.f32.partialorder %v1410_v26, 0.0 }
 0x9b1   :  { %v1417_v30 = vsel %vm1413_vm5, %v1411_v27, %v1415_v28  ;;  %v1416_v32 = vsel %vm1412_vm6, %v1410_v26, %v1414_v29  ;;  %v1660_v27 = vld [vmem:[%s3918_s1 + $0x570] sm:$0xff]  ;;  %v1659_v28 = vld [vmem:[%s3918_s1 + $0x568] sm:$0xff] }
 0x9b2   :  { %1436 = vmatpush.msrb.mxu2 %v1417_v30  ;;  %1460 = vmatpush.msrb.mxu3 %v1417_v30 }
 0x9b3   :  { %1484 = vmatpush.msra.mxu0 %v1417_v30  ;;  %1678 = vmatpush.msrb.mxu1 %v1660_v27  ;;  %v1754_v30 = vld [vmem:[%s3918_s1 + $0x608] sm:$0xff] }
 0x9b4   :  { %1437 = vmatpush.msrb.mxu2 %v1416_v32  ;;  %1461 = vmatpush.msrb.mxu3 %v1416_v32 }
 0x9b5   :  { %1485 = vmatpush.msra.mxu0 %v1416_v32  ;;  %2631 = vmatmul.msk.f32.vlgmr.msrb.gmra.mxu2 %vm1128_vm13, %v1418_v31  ;;  %v1753_v31 = vld [vmem:[%s3918_s1 + $0x600] sm:$0xff] }
 0x9b6   :  { %2632 = vmatmul.msk.f32.vlgmr.msrb.gmra.mxu3 %vm1128_vm13, %v1442_v33  ;;  %2633 = vmatmul.msk.f32.vlgmr.msra.gmra.mxu0 %vm1128_vm13, %v1466_v34  ;;  %v1752_v33 = vld [vmem:[%s3918_s1 + $0x5f8] sm:$0xff] }
 0x9b7   :  { %1540 = vmatpush.msra.mxu2 %v1497_v35  ;;  %1571 = vmatpush.msra.mxu3 %v1559_v36 }
 0x9b8   :  { %1619 = vmatpush.msrb.mxu0 %v1607_v58  ;;  %1679 = vmatpush.msrb.mxu1 %v1659_v28  ;;  %v1741_v58 = vld [vmem:[%s3918_s1 + $0x5a0] sm:$0xff] }
 0x9b9   :  { %1541 = vmatpush.msra.mxu2 %v1496_v37  ;;  %1572 = vmatpush.msra.mxu3 %v1558_v38 }
 0x9ba   :  { %1620 = vmatpush.msrb.mxu0 %v1606_v60  ;;  %v1740_v60 = vld [vmem:[%s3918_s1 + $0x598] sm:$0xff] }
 0x9bb   :  { %1542 = vmatpush.msra.mxu2 %v1495_v39  ;;  %1573 = vmatpush.msra.mxu3 %v1557_v40  ;;  %v1637_v40 = vld [vmem:[%s3918_s1 + $0x578] sm:$0x3] }
 0x9bc   :  { %1621 = vmatpush.msrb.mxu0 %v1605_v61 }
 0x9bd   :  { %1543 = vmatpush.msra.mxu2 %v1494_v41  ;;  %1574 = vmatpush.msra.mxu3 %v1556_v42 }
 0x9be   :  { %1622 = vmatpush.msrb.mxu0 %v1604_v63 }
 0x9bf   :  { %1544 = vmatpush.msra.mxu2 %v1493_v43  ;;  %1575 = vmatpush.msra.mxu3 %v1555_v44 }
 0x9c0   :  { %1623 = vmatpush.msrb.mxu0 %v1603_v3 }
 0x9c1   :  { %1545 = vmatpush.msra.mxu2 %v1492_v45  ;;  %1576 = vmatpush.msra.mxu3 %v1554_v46 }
 0x9c2   :  { %1624 = vmatpush.msrb.mxu0 %v1602_v7 }
 0x9c3   :  { %1546 = vmatpush.msra.mxu2 %v1491_v47  ;;  %1577 = vmatpush.msra.mxu3 %v1553_v50  ;;  %v1749_v50 = vld [vmem:[%s3918_s1 + $0x5e0] sm:$0xff] }
 0x9c4   :  { %1625 = vmatpush.msrb.mxu0 %v1601_v8 }
 0x9c5   :  { %1547 = vmatpush.msra.mxu2 %v1490_v49  ;;  %1578 = vmatpush.msra.mxu3 %v1552_v52  ;;  %v1750_v49 = vld [vmem:[%s3918_s1 + $0x5e8] sm:$0xff]  ;;  %v1747_v52 = vld [vmem:[%s3918_s1 + $0x5d0] sm:$0xff] }
 0x9c6   :  { %1626 = vmatpush.msrb.mxu0 %v1600_v9 }
 0x9c7   :  { %1766 = vmatpush.msrb.mxu3 %v1754_v30 }
 0x9c8   :  { %1789 = vmatpush.msra.mxu0 %v1746_v53 }
 0x9c9   :  { %1767 = vmatpush.msrb.mxu3 %v1753_v31 }
 0x9ca   :  { %1790 = vmatpush.msra.mxu0 %v1745_v54 }
 0x9cb   :  { %1768 = vmatpush.msrb.mxu3 %v1752_v33 }
 0x9cd   :  { %1769 = vmatpush.msrb.mxu3 %v1751_v48  ;;  %v1909_v48 = vld [vmem:[%s3918_s1 + $0x698] sm:$0xff] }
 0x9cf   :  { %1770 = vmatpush.msrb.mxu3 %v1750_v49 }
 0x9d1   :  { %1771 = vmatpush.msrb.mxu3 %v1749_v50  ;;  %v1908_v50 = vld [vmem:[%s3918_s1 + $0x690] sm:$0xff] }
 0x9d3   :  { %1772 = vmatpush.msrb.mxu3 %v1748_v51 }
 0x9d5   :  { %1773 = vmatpush.msrb.mxu3 %v1747_v52 }
 0xa33   :  { %v1487_v55 = vpop.f32.mrf.mxu0 }
 0xa34   :  { %2636 = vmatmul.msk.f32.vlgmr.msra.gmra.mxu3 %vm24_vm0, %v1487_v55  ;;  %v1744_v55 = vld [vmem:[%s3918_s1 + $0x5b8] sm:$0xff] }
 0xa35   :  { %1791 = vmatpush.msra.mxu0 %v1744_v55  ;;  %1927 = vmatpush.msra.mxu3 %v1909_v48 }
 0xa37   :  { %1928 = vmatpush.msra.mxu3 %v1908_v50 }
 0xa38   :  { %v1439_v56 = vpop.f32.mrf.mxu2 }
 0xa39   :  { %2635 = vmatmul.msk.f32.vlgmr.msra.gmra.mxu2 %vm24_vm0, %v1439_v56  ;;  %v1463_v57 = vpop.f32.mrf.mxu3  ;;  %v1743_v56 = vld [vmem:[%s3918_s1 + $0x5b0] sm:$0xff] }
 0xa3a   :  { %2634 = vmatmul.msk.f32.vlgmr.msra.gmra.mxu1 %vm24_vm0, %v1463_v57  ;;  %v1742_v57 = vld [vmem:[%s3918_s1 + $0x5a8] sm:$0xff]  ;;  %1792 = vmatpush.msra.mxu0 %v1743_v56 }
 0xa3c   :  { %1793 = vmatpush.msra.mxu0 %v1742_v57 }
 0xa3e   :  { %1794 = vmatpush.msra.mxu0 %v1741_v58 }
 0xa40   :  { %1795 = vmatpush.msra.mxu0 %v1740_v60  ;;  %v1886_v60 = vld [vmem:[%s3918_s1 + $0x6a0] sm:$0x3] }
 0xab7   :  { %v1526_v10 = vpop.f32.mrf.mxu1  ;;  %v1580_v12 = vpop.f32.mrf.mxu3 }
 0xabc   :  { %v1549_v11 = vpop.f32.mrf.mxu2 }
 0xabd   :  { %v1550_v59 = vadd.f32 %v1549_v11, %v1526_v10  ;;  %v1691_v10 = vld [vmem:[%s3918_s1 + $0x580] sm:$0xff] }
 0xabf   :  { %v3442_v4 = vadd.f32 %v1580_v12, %v1550_v59  ;;  %v1715_v12 = vld [vmem:[%s3918_s1 + $0x588] sm:$0xff] }
 0xac0   :  { %v1808_v59 = vld [vmem:[%s3918_s1 + $0x648] sm:$0xff] }
 0xac1   :  { %v1584_v13 = vsel %vm24_vm0, %v3442_v4, 0.0  ;;  %v1591_v14 = vmul.f32 %v3442_v4, %v3442_v4 }
 0xac2   :  { %v1585_v16 = vrot.slane %v1584_v13, 4 }
 0xac3   :  { %v1592_v17 = vsel %vm24_vm0, %v1591_v14, 0.0  ;;  %v1805_v14 = vld [vmem:[%s3918_s1 + $0x630] sm:$0xff] }
 0xac4   :  { %v1586_v18 = vadd.f32 %v1585_v16, %v1584_v13  ;;  %v1593_v19 = vrot.slane %v1592_v17, 4  ;;  %v1806_v13 = vld [vmem:[%s3918_s1 + $0x638] sm:$0xff]  ;;  %v1739_v16 = vld [vmem:[%s3918_s1 + $0x590] sm:$0xff] }
 0xac5   :  { %1796 = vmatpush.msra.mxu0 %v1739_v16  ;;  %v2021_v16 = vld [vmem:[%s3918_s1 + $0x708] sm:$0xff] }
 0xac6   :  { %v1587_v20 = vrot.slane %v1586_v18, 2  ;;  %v1594_v0 = vadd.f32 %v1593_v19, %v1592_v17  ;;  %v1804_v17 = vld [vmem:[%s3918_s1 + $0x628] sm:$0xff]  ;;  %v1802_v19 = vld [vmem:[%s3918_s1 + $0x618] sm:$0xff] }
 0xac8   :  { %v1588_v6 = vadd.f32 %v1587_v20, %v1586_v18  ;;  %v1595_v2 = vrot.slane %v1594_v0, 2  ;;  %v1803_v18 = vld [vmem:[%s3918_s1 + $0x620] sm:$0xff]  ;;  %v1801_v20 = vld [vmem:[%s3918_s1 + $0x610] sm:$0xff] }
 0xaca   :  { %v1589_v5 = vrot.slane %v1588_v6, 1  ;;  %v1596_v62 = vadd.f32 %v1595_v2, %v1594_v0  ;;  %v1856_v2 = vld [vmem:[%s3918_s1 + $0x688] sm:$0xff] }
 0xacc   :  { %v1597_v1 = vrot.slane %v1596_v62, 1  ;;  %v1590_v15 = vadd.f32 %v1589_v5, %v1588_v6  ;;  %v1855_v5 = vld [vmem:[%s3918_s1 + $0x680] sm:$0xff] }
 0xace   :  { %v1598_v21 = vadd.f32 %v1597_v1, %v1596_v62  ;;  %v1854_v62 = vld [vmem:[%s3918_s1 + $0x678] sm:$0xff]  ;;  %v1853_v1 = vld [vmem:[%s3918_s1 + $0x670] sm:$0xff] }
 0xad0   :  { %v1599_v22 = vsel %vm327_vm3, %v1590_v15, %v1598_v21  ;;  %v1852_v15 = vld [vmem:[%s3918_s1 + $0x668] sm:$0xff]  ;;  %v1851_v21 = vld [vmem:[%s3918_s1 + $0x660] sm:$0xff] }
 0xad1   :  { %2637 = vmatmul.msk.f32.vlgmr.msrb.gmra.mxu0 %vm24_vm0, %v1599_v22  ;;  %v1850_v22 = vld [vmem:[%s3918_s1 + $0x658] sm:$0xff] }
 0xb4e   :  { %v1628_v23 = vpop.f32.mrf.mxu0 }
 0xb4f   :  { %v1631_v24 = vmul.f32 0.03125, %v1628_v23  ;;  %v1849_v23 = vld [vmem:[%s3918_s1 + $0x650] sm:$0xff] }
 0xb51   :  { %v1632_v25 = vmul.f32 %v1631_v24, %v1631_v24 }
 0xb53   :  { %v1634_v26 = vrot.slane %v1632_v25, 7 }
 0xb55   :  { %v1636_v29 = vsub.f32 %v1631_v24, %v1634_v26 }
 0xb57   :  { %v1638_v32 = vadd.f32 1e-05, %v1636_v29 }
 0xb59   :  { %2675 = vrsqrt.f32 %v1638_v32  ;;  %vm1645_vm2 = vweird.f32 %v1638_v32 }
 0xb5f   :  { %v2676_v34 = vpop.eup %2675 }
 0xb60   :  { %v1640_v35 = vmul.f32 %v2676_v34, %v1638_v32  ;;  %vm1646_vm7 = vweird.f32 %v2676_v34 }
 0xb61   :  { %vm1647_vm8 = vmor %vm1645_vm2, %vm1646_vm7  ;;  %vm2221_vm7 = vcmask 1043456   ;;  %vm2217_vm2 = vcmask 31744  }
 0xb62   :  { %v1641_v36 = vmul.f32 %v2676_v34, %v1640_v35 }
 0xb64   :  { %v1642_v37 = vmul.f32 0.5, %v1641_v36 }
 0xb66   :  { %v1643_v38 = vsub.f32 1.5, %v1642_v37 }
 0xb68   :  { %v1644_v39 = vmul.f32 %v2676_v34, %v1643_v38 }
 0xb6a   :  { %v1648_v41 = vsel %vm1647_vm8, %v2676_v34, %v1644_v39 }
 0xb6b   :  { %v1650_v42 = vrot.slane %v1648_v41, 1 }
 0xb6d   :  { %v1652_v43 = vmul.f32 %v1650_v42, %v1637_v40 }
 0xb6f   :  { %v1653_v44 = vmul.f32 %v1652_v43, %v1631_v24 }
 0xb71   :  { %v1655_v45 = vrot.slane %v1653_v44, 7 }
 0xb73   :  { %v1657_v46 = vsub.f32 %v1637_v40, %v1655_v45 }
 0xb75   :  { %v1658_v47 = vsel %vm327_vm3, %v1652_v43, %v1657_v46 }
 0xb76   :  { %2638 = vmatmul.msk.f32.vlgmr.msrb.gmra.mxu1 %vm1128_vm13, %v1658_v47 }
 0xbf3   :  { %v1681_v61 = vpop.f32.mrf.mxu1 }
 0xbf4   :  { %v1684_v63 = vperm.slane %v1681_v61, 0  ;;  %v1686_v7 = vperm.slane %v1681_v61, 1 }
 0xbf6   :  { %v1685_v3 = vmul.f32 %v1684_v63, %v3442_v4  ;;  %v1807_v4 = vld [vmem:[%s3918_s1 + $0x640] sm:$0xff] }
 0xbf8   :  { %v1687_v8 = vadd.f32 %v1686_v7, %v1685_v3 }
 0xbfa   :  { %vm1688_vm9 = vcmp.gt.f32.partialorder %v1687_v8, 0.0  ;;  %v1689_v9 = vmul.f32 0.2, %v1687_v8 }
 0xbfc   :  { %v1690_v11 = vsel %vm1688_vm9, %v1687_v8, %v1689_v9 }
 0xbfd   :  { %1710 = vmatpush.msra.mxu1 %v1690_v11  ;;  %1734 = vmatpush.msrb.mxu2 %v1690_v11 }
 0xbfe   :  { %2641 = vmatmul.msk.f32.vlgmr.msrb.gmra.mxu3 %vm24_vm0, %v1690_v11  ;;  %2639 = vmatmul.msk.f32.vlgmr.msra.gmra.mxu1 %vm1090_vm10, %v1691_v10  ;;  %v2027_v11 = vld [vmem:[%s3918_s1 + $0x738] sm:$0xff] }
 0xbff   :  { %2640 = vmatmul.msk.f32.vlgmr.msrb.gmra.mxu2 %vm1090_vm10, %v1715_v12  ;;  %1820 = vmatpush.msrb.mxu1 %v1808_v59  ;;  %v2026_v12 = vld [vmem:[%s3918_s1 + $0x730] sm:$0xff]  ;;  %v2025_v59 = vld [vmem:[%s3918_s1 + $0x728] sm:$0xff] }
 0xc00   :  { %1868 = vmatpush.msra.mxu2 %v1856_v2  ;;  %2039 = vmatpush.msrb.mxu3 %v2027_v11  ;;  %v1964_v2 = vld [vmem:[%s3918_s1 + $0x6b0] sm:$0xf] }
 0xc01   :  { %1821 = vmatpush.msrb.mxu1 %v1807_v4  ;;  %v2024_v4 = vld [vmem:[%s3918_s1 + $0x720] sm:$0xff] }
 0xc02   :  { %1869 = vmatpush.msra.mxu2 %v1855_v5  ;;  %2040 = vmatpush.msrb.mxu3 %v2026_v12 }
 0xc03   :  { %1822 = vmatpush.msrb.mxu1 %v1806_v13  ;;  %v2023_v13 = vld [vmem:[%s3918_s1 + $0x718] sm:$0xff] }
 0xc04   :  { %1870 = vmatpush.msra.mxu2 %v1854_v62  ;;  %2041 = vmatpush.msrb.mxu3 %v2025_v59  ;;  %v1988_v62 = vld [vmem:[%s3918_s1 + $0x6b8] sm:$0xf] }
 0xc05   :  { %1823 = vmatpush.msrb.mxu1 %v1805_v14  ;;  %v2022_v14 = vld [vmem:[%s3918_s1 + $0x710] sm:$0xff] }
 0xc06   :  { %1871 = vmatpush.msra.mxu2 %v1853_v1  ;;  %2042 = vmatpush.msrb.mxu3 %v2024_v4  ;;  %v1940_v1 = vld [vmem:[%s3918_s1 + $0x6a8] sm:$0xf] }
 0xc07   :  { %1824 = vmatpush.msrb.mxu1 %v1804_v17 }
 0xc08   :  { %1872 = vmatpush.msra.mxu2 %v1852_v15  ;;  %2043 = vmatpush.msrb.mxu3 %v2023_v13  ;;  %v2019_v15 = vld [vmem:[%s3918_s1 + $0x6f8] sm:$0xff] }
 0xc09   :  { %1825 = vmatpush.msrb.mxu1 %v1803_v18  ;;  %v2185_v13 = vld [vmem:[%s3918_s1 + $0x7d8] sm:$0xff] }
 0xc0a   :  { %1873 = vmatpush.msra.mxu2 %v1851_v21  ;;  %2044 = vmatpush.msrb.mxu3 %v2022_v14  ;;  %v2081_v21 = vld [vmem:[%s3918_s1 + $0x778] sm:$0xff] }
 0xc0b   :  { %1826 = vmatpush.msrb.mxu1 %v1802_v19 }
 0xc0c   :  { %1874 = vmatpush.msra.mxu2 %v1850_v22  ;;  %2045 = vmatpush.msrb.mxu3 %v2021_v16  ;;  %v2018_v22 = vld [vmem:[%s3918_s1 + $0x6f0] sm:$0xff] }
 0xc0d   :  { %1827 = vmatpush.msrb.mxu1 %v1801_v20  ;;  %v2184_v16 = vld [vmem:[%s3918_s1 + $0x7d0] sm:$0xff] }
 0xc0e   :  { %1875 = vmatpush.msra.mxu2 %v1849_v23  ;;  %v2080_v23 = vld [vmem:[%s3918_s1 + $0x770] sm:$0xff] }
 0xc7b   :  { %v1712_v0 = vpop.f32.mrf.mxu1 }
 0xc7c   :  { %2642 = vmatmul.msk.f32.vlgmr.msra.gmra.mxu0 %vm24_vm0, %v1712_v0 }
 0xc81   :  { %v1775_v25 = vpop.f32.mrf.mxu3 }
 0xc82   :  { %v1736_v6 = vpop.f32.mrf.mxu2 }
 0xc83   :  { %2643 = vmatmul.msk.f32.vlgmr.msrb.gmra.mxu1 %vm24_vm0, %v1736_v6 }
 0xcf9   :  { %v1798_v24 = vpop.f32.mrf.mxu0 }
 0xcfa   :  { %v1799_v26 = vadd.f32 %v1798_v24, %v1775_v25  ;;  %v2017_v24 = vld [vmem:[%s3918_s1 + $0x6e8] sm:$0xff] }
 0xcfb   :  { %v2079_v25 = vld [vmem:[%s3918_s1 + $0x768] sm:$0xff] }
 0xd00   :  { %v1829_v27 = vpop.f32.mrf.mxu1 }
 0xd01   :  { %v3570_v28 = vadd.f32 %v1829_v27, %v1799_v26  ;;  %v2016_v26 = vld [vmem:[%s3918_s1 + $0x6e0] sm:$0xff] }
 0xd02   :  { %v2020_v27 = vld [vmem:[%s3918_s1 + $0x700] sm:$0xff] }
 0xd03   :  { %v1833_v29 = vsel %vm24_vm0, %v3570_v28, 0.0  ;;  %v1840_v30 = vmul.f32 %v3570_v28, %v3570_v28  ;;  %2046 = vmatpush.msrb.mxu3 %v2020_v27 }
 0xd04   :  { %v1834_v31 = vrot.slane %v1833_v29, 4 }
 0xd05   :  { %v1841_v32 = vsel %vm24_vm0, %v1840_v30, 0.0  ;;  %v2014_v30 = vld [vmem:[%s3918_s1 + $0x6d0] sm:$0xff] }
 0xd06   :  { %v1835_v33 = vadd.f32 %v1834_v31, %v1833_v29  ;;  %v1842_v34 = vrot.slane %v1841_v32, 4  ;;  %v2078_v29 = vld [vmem:[%s3918_s1 + $0x760] sm:$0xff]  ;;  %v2077_v31 = vld [vmem:[%s3918_s1 + $0x758] sm:$0xff] }
 0xd08   :  { %v1836_v35 = vrot.slane %v1835_v33, 2  ;;  %v1843_v36 = vadd.f32 %v1842_v34, %v1841_v32  ;;  %v2013_v32 = vld [vmem:[%s3918_s1 + $0x6c8] sm:$0xff]  ;;  %v2012_v34 = vld [vmem:[%s3918_s1 + $0x6c0] sm:$0xff] }
 0xd0a   :  { %v1837_v37 = vadd.f32 %v1836_v35, %v1835_v33  ;;  %v1844_v38 = vrot.slane %v1843_v36, 2  ;;  %v2076_v33 = vld [vmem:[%s3918_s1 + $0x750] sm:$0xff]  ;;  %v2075_v35 = vld [vmem:[%s3918_s1 + $0x748] sm:$0xff] }
 0xd0c   :  { %v1838_v39 = vrot.slane %v1837_v37, 1  ;;  %v1845_v40 = vadd.f32 %v1844_v38, %v1843_v36  ;;  %v2074_v36 = vld [vmem:[%s3918_s1 + $0x740] sm:$0xff] }
 0xd0e   :  { %v1846_v41 = vrot.slane %v1845_v40, 1  ;;  %v1839_v42 = vadd.f32 %v1838_v39, %v1837_v37 }
 0xd10   :  { %v1847_v43 = vadd.f32 %v1846_v41, %v1845_v40  ;;  %v2130_v40 = vld [vmem:[%s3918_s1 + $0x7b8] sm:$0xff]  ;;  %v2129_v41 = vld [vmem:[%s3918_s1 + $0x7b0] sm:$0xff] }
 0xd12   :  { %v1848_v44 = vsel %vm327_vm3, %v1839_v42, %v1847_v43  ;;  %v2128_v42 = vld [vmem:[%s3918_s1 + $0x7a8] sm:$0xff]  ;;  %v2127_v43 = vld [vmem:[%s3918_s1 + $0x7a0] sm:$0xff] }
 0xd13   :  { %2644 = vmatmul.msk.f32.vlgmr.msra.gmra.mxu2 %vm24_vm0, %v1848_v44  ;;  %v2126_v44 = vld [vmem:[%s3918_s1 + $0x798] sm:$0xff] }
 0xd96   :  { %v1877_v45 = vpop.f32.mrf.mxu2 }
 0xd97   :  { %v1880_v46 = vmul.f32 0.03125, %v1877_v45  ;;  %v2125_v45 = vld [vmem:[%s3918_s1 + $0x790] sm:$0xff] }
 0xd99   :  { %v1881_v47 = vmul.f32 %v1880_v46, %v1880_v46 }
 0xd9b   :  { %v1883_v49 = vrot.slane %v1881_v47, 7  ;;  %v2123_v47 = vld [vmem:[%s3918_s1 + $0x780] sm:$0xff] }
 0xd9d   :  { %v1885_v51 = vsub.f32 %v1880_v46, %v1883_v49 }
 0xd9f   :  { %v1887_v52 = vadd.f32 1e-05, %v1885_v51 }
 0xda1   :  { %2677 = vrsqrt.f32 %v1887_v52  ;;  %vm1894_vm12 = vweird.f32 %v1887_v52 }
 0xda7   :  { %v2678_v53 = vpop.eup %2677 }
 0xda8   :  { %v1889_v54 = vmul.f32 %v2678_v53, %v1887_v52  ;;  %vm1895_vm11 = vweird.f32 %v2678_v53 }
 0xda9   :  { %vm1896_vm14 = vmor %vm1894_vm12, %vm1895_vm11 }
 0xdaa   :  { %v1890_v55 = vmul.f32 %v2678_v53, %v1889_v54 }
 0xdac   :  { %v1891_v56 = vmul.f32 0.5, %v1890_v55 }
 0xdae   :  { %v1892_v57 = vsub.f32 1.5, %v1891_v56 }
 0xdb0   :  { %v1893_v58 = vmul.f32 %v2678_v53, %v1892_v57 }
 0xdb2   :  { %v1897_v61 = vsel %vm1896_vm14, %v2678_v53, %v1893_v58 }
 0xdb3   :  { %v1899_v63 = vrot.slane %v1897_v61, 1 }
 0xdb5   :  { %v1901_v3 = vmul.f32 %v1899_v63, %v1886_v60 }
 0xdb7   :  { %v1902_v7 = vmul.f32 %v1901_v3, %v1880_v46  ;;  %v2124_v46 = vld [vmem:[%s3918_s1 + $0x788] sm:$0xff] }
 0xdb9   :  { %v1904_v8 = vrot.slane %v1902_v7, 7 }
 0xdbb   :  { %v1906_v9 = vsub.f32 %v1886_v60, %v1904_v8 }
 0xdbd   :  { %v1907_v10 = vsel %vm327_vm3, %v1901_v3, %v1906_v9 }
 0xdbe   :  { %2645 = vmatmul.msk.f32.vlgmr.msra.gmra.mxu3 %vm1128_vm13, %v1907_v10 }
 0xdbf   :  { %2201 = vmatpush.msra.mxu3 %v2185_v13  ;;  %v2378_v13 = vld [vmem:[%s3918_s1 + $0x8b8] sm:$0xff] }
 0xdc1   :  { %2202 = vmatpush.msra.mxu3 %v2184_v16 }
 0xe41   :  { %v1930_v17 = vpop.f32.mrf.mxu3 }
 0xe42   :  { %v1933_v18 = vperm.slane %v1930_v17, 0  ;;  %v1935_v20 = vperm.slane %v1930_v17, 1 }
 0xe44   :  { %v1934_v19 = vmul.f32 %v1933_v18, %v3570_v28  ;;  %v2015_v28 = vld [vmem:[%s3918_s1 + $0x6d8] sm:$0xff]  ;;  %v2183_v18 = vld [vmem:[%s3918_s1 + $0x7c8] sm:$0xff] }
 0xe45   :  { %2203 = vmatpush.msra.mxu3 %v2183_v18 }
 0xe46   :  { %v1936_v0 = vadd.f32 %v1935_v20, %v1934_v19  ;;  %v2182_v19 = vld [vmem:[%s3918_s1 + $0x7c0] sm:$0xff] }
 0xe47   :  { %2204 = vmatpush.msra.mxu3 %v2182_v19 }
 0xe48   :  { %vm1937_vm13 = vcmp.gt.f32.partialorder %v1936_v0, 0.0  ;;  %v1938_v6 = vmul.f32 0.2, %v1936_v0 }
 0xe4a   :  { %v1939_v5 = vsel %vm1937_vm13, %v1936_v0, %v1938_v6  ;;  %v2284_v0 = vld [vmem:[%s3918_s1 + $0x870] sm:$0xff]  ;;  %v2283_v6 = vld [vmem:[%s3918_s1 + $0x868] sm:$0xff] }
 0xe4b   :  { %1959 = vmatpush.msrb.mxu0 %v1939_v5  ;;  %1983 = vmatpush.msra.mxu1 %v1939_v5 }
 0xe4c   :  { %2007 = vmatpush.msrb.mxu2 %v1939_v5  ;;  %2647 = vmatmul.msk.f32.vlgmr.msra.gmra.mxu1 %vm1090_vm10, %v1964_v2  ;;  %v2282_v5 = vld [vmem:[%s3918_s1 + $0x860] sm:$0xff] }
 0xe4d   :  { %2648 = vmatmul.msk.f32.vlgmr.msrb.gmra.mxu2 %vm1090_vm10, %v1988_v62  ;;  %2646 = vmatmul.msk.f32.vlgmr.msrb.gmra.mxu0 %vm1090_vm10, %v1940_v1  ;;  %vm2106_vm10 = vcmask 519168  }
 0xe4e   :  { %2062 = vmatpush.msra.mxu0 %v2019_v15  ;;  %2093 = vmatpush.msrb.mxu1 %v2081_v21 }
 0xe4f   :  { %2142 = vmatpush.msra.mxu2 %v2130_v40  ;;  %v2273_v40 = vld [vmem:[%s3918_s1 + $0x818] sm:$0xff] }
 0xe50   :  { %2063 = vmatpush.msra.mxu0 %v2018_v22  ;;  %2094 = vmatpush.msrb.mxu1 %v2080_v23 }
 0xe51   :  { %2143 = vmatpush.msra.mxu2 %v2129_v41  ;;  %v2272_v41 = vld [vmem:[%s3918_s1 + $0x810] sm:$0xff] }
 0xe52   :  { %2064 = vmatpush.msra.mxu0 %v2017_v24  ;;  %2095 = vmatpush.msrb.mxu1 %v2079_v25  ;;  %v2160_v24 = vld [vmem:[%s3918_s1 + $0x7e0] sm:$0x3] }
 0xe53   :  { %2144 = vmatpush.msra.mxu2 %v2128_v42  ;;  %v2271_v42 = vld [vmem:[%s3918_s1 + $0x808] sm:$0xff] }
 0xe54   :  { %2065 = vmatpush.msra.mxu0 %v2016_v26  ;;  %2096 = vmatpush.msrb.mxu1 %v2078_v29 }
 0xe55   :  { %2145 = vmatpush.msra.mxu2 %v2127_v43  ;;  %v2270_v43 = vld [vmem:[%s3918_s1 + $0x800] sm:$0xff] }
 0xe56   :  { %2066 = vmatpush.msra.mxu0 %v2015_v28  ;;  %2097 = vmatpush.msrb.mxu1 %v2077_v31 }
 0xe57   :  { %2146 = vmatpush.msra.mxu2 %v2126_v44 }
 0xe58   :  { %2067 = vmatpush.msra.mxu0 %v2014_v30  ;;  %2098 = vmatpush.msrb.mxu1 %v2076_v33  ;;  %v2280_v33 = vld [vmem:[%s3918_s1 + $0x850] sm:$0xff] }
 0xe59   :  { %2147 = vmatpush.msra.mxu2 %v2125_v45 }
 0xe5a   :  { %2068 = vmatpush.msra.mxu0 %v2013_v32  ;;  %2099 = vmatpush.msrb.mxu1 %v2075_v35  ;;  %v2281_v32 = vld [vmem:[%s3918_s1 + $0x858] sm:$0xff]  ;;  %v2278_v35 = vld [vmem:[%s3918_s1 + $0x840] sm:$0xff] }
 0xe5b   :  { %2148 = vmatpush.msra.mxu2 %v2124_v46 }
 0xe5c   :  { %2069 = vmatpush.msra.mxu0 %v2012_v34  ;;  %2100 = vmatpush.msrb.mxu1 %v2074_v36  ;;  %v2279_v34 = vld [vmem:[%s3918_s1 + $0x848] sm:$0xff]  ;;  %v2277_v36 = vld [vmem:[%s3918_s1 + $0x838] sm:$0xff] }
 0xe5d   :  { %2149 = vmatpush.msra.mxu2 %v2123_v47 }
 0xe5f   :  { %2295 = vmatpush.msrb.mxu2 %v2284_v0 }
 0xe61   :  { %2296 = vmatpush.msrb.mxu2 %v2283_v6 }
 0xe63   :  { %2297 = vmatpush.msrb.mxu2 %v2282_v5 }
 0xe65   :  { %2298 = vmatpush.msrb.mxu2 %v2281_v32 }
 0xe67   :  { %2299 = vmatpush.msrb.mxu2 %v2280_v33  ;;  %v2439_v33 = vld [vmem:[%s3918_s1 + $0x908] sm:$0xff] }
 0xe69   :  { %2300 = vmatpush.msrb.mxu2 %v2279_v34 }
 0xe6b   :  { %2301 = vmatpush.msrb.mxu2 %v2278_v35  ;;  %v2438_v35 = vld [vmem:[%s3918_s1 + $0x900] sm:$0xff] }
 0xe6d   :  { %2302 = vmatpush.msrb.mxu2 %v2277_v36  ;;  %v2437_v36 = vld [vmem:[%s3918_s1 + $0x8f8] sm:$0xff] }
 0xec9   :  { %v1985_v37 = vpop.f32.mrf.mxu1 }
 0xeca   :  { %2649 = vmatmul.msk.f32.vlgmr.msrb.gmra.mxu3 %vm24_vm0, %v1985_v37  ;;  %v1961_v38 = vpop.f32.mrf.mxu0  ;;  %v2276_v37 = vld [vmem:[%s3918_s1 + $0x830] sm:$0xff] }
 0xecb   :  { %2650 = vmatmul.msk.f32.vlgmr.msra.gmra.mxu0 %vm24_vm0, %v1961_v38  ;;  %v2275_v38 = vld [vmem:[%s3918_s1 + $0x828] sm:$0xff]  ;;  %2318 = vmatpush.msrb.mxu3 %v2276_v37 }
 0xecd   :  { %2319 = vmatpush.msrb.mxu3 %v2275_v38  ;;  %v2479_v38 = vld [vmem:[%s3918_s1 + $0x958] sm:$0xff] }
 0xed0   :  { %v2009_v39 = vpop.f32.mrf.mxu2 }
 0xed1   :  { %2651 = vmatmul.msk.f32.vlgmr.msrb.gmra.mxu1 %vm24_vm0, %v2009_v39  ;;  %v2274_v39 = vld [vmem:[%s3918_s1 + $0x820] sm:$0xff] }
 0xed2   :  { %2320 = vmatpush.msrb.mxu3 %v2274_v39  ;;  %v2478_v39 = vld [vmem:[%s3918_s1 + $0x950] sm:$0xff] }
 0xed4   :  { %2321 = vmatpush.msrb.mxu3 %v2273_v40  ;;  %v2512_v40 = vld [vmem:[%s3918_s1 + $0x998] sm:$0xff] }
 0xed6   :  { %2322 = vmatpush.msrb.mxu3 %v2272_v41 }
 0xed8   :  { %2323 = vmatpush.msrb.mxu3 %v2271_v42  ;;  %v2511_v42 = vld [vmem:[%s3918_s1 + $0x990] sm:$0xff] }
 0xeda   :  { %2324 = vmatpush.msrb.mxu3 %v2270_v43  ;;  %v2477_v43 = vld [vmem:[%s3918_s1 + $0x948] sm:$0xff] }
 0xf48   :  { %v2071_v48 = vpop.f32.mrf.mxu0 }
 0xf4d   :  { %v2048_v49 = vpop.f32.mrf.mxu3 }
 0xf4e   :  { %v2072_v50 = vadd.f32 %v2071_v48, %v2048_v49  ;;  %v2102_v51 = vpop.f32.mrf.mxu1 }
 0xf50   :  { %v3702_v52 = vadd.f32 %v2102_v51, %v2072_v50  ;;  %v2216_v50 = vld [vmem:[%s3918_s1 + $0x7e8] sm:$0xf] }
 0xf52   :  { %v2107_v53 = vsel %vm2106_vm10, %v3702_v52, 0.0  ;;  %v2114_v54 = vmul.f32 %v3702_v52, %v3702_v52 }
 0xf53   :  { %v2108_v55 = vrot.slane %v2107_v53, 4 }
 0xf54   :  { %v2115_v56 = vsel %vm2106_vm10, %v2114_v54, 0.0  ;;  %v2337_v54 = vld [vmem:[%s3918_s1 + $0x8b0] sm:$0xff] }
 0xf55   :  { %v2109_v57 = vadd.f32 %v2108_v55, %v2107_v53  ;;  %v2116_v58 = vrot.slane %v2115_v56, 4  ;;  %v2245_v53 = vld [vmem:[%s3918_s1 + $0x7f0] sm:$0xf]  ;;  %v2335_v55 = vld [vmem:[%s3918_s1 + $0x8a0] sm:$0xff] }
 0xf57   :  { %v2110_v60 = vrot.slane %v2109_v57, 2  ;;  %v2117_v61 = vadd.f32 %v2116_v58, %v2115_v56  ;;  %v2269_v56 = vld [vmem:[%s3918_s1 + $0x7f8] sm:$0xff]  ;;  %v2333_v58 = vld [vmem:[%s3918_s1 + $0x890] sm:$0xff] }
 0xf58   :  { %2325 = vmatpush.msrb.mxu3 %v2269_v56 }
 0xf59   :  { %v2111_v63 = vadd.f32 %v2110_v60, %v2109_v57  ;;  %v2118_v3 = vrot.slane %v2117_v61, 2  ;;  %v2334_v57 = vld [vmem:[%s3918_s1 + $0x898] sm:$0xff]  ;;  %v2332_v60 = vld [vmem:[%s3918_s1 + $0x888] sm:$0xff] }
 0xf5b   :  { %v2112_v7 = vrot.slane %v2111_v63, 1  ;;  %v2119_v8 = vadd.f32 %v2118_v3, %v2117_v61  ;;  %v2331_v61 = vld [vmem:[%s3918_s1 + $0x880] sm:$0xff] }
 0xf5d   :  { %v2120_v9 = vrot.slane %v2119_v8, 1  ;;  %v2113_v10 = vadd.f32 %v2112_v7, %v2111_v63  ;;  %v2330_v63 = vld [vmem:[%s3918_s1 + $0x878] sm:$0xff] }
 0xf5f   :  { %v2121_v11 = vadd.f32 %v2120_v9, %v2119_v8  ;;  %v2385_v8 = vld [vmem:[%s3918_s1 + $0x8f0] sm:$0xff]  ;;  %v2384_v9 = vld [vmem:[%s3918_s1 + $0x8e8] sm:$0xff] }
 0xf61   :  { %v2122_v12 = vsel %vm327_vm3, %v2113_v10, %v2121_v11  ;;  %v2383_v10 = vld [vmem:[%s3918_s1 + $0x8e0] sm:$0xff]  ;;  %v2382_v11 = vld [vmem:[%s3918_s1 + $0x8d8] sm:$0xff] }
 0xf62   :  { %2652 = vmatmul.msk.f32.vlgmr.msra.gmra.mxu2 %vm24_vm0, %v2122_v12  ;;  %v2381_v12 = vld [vmem:[%s3918_s1 + $0x8d0] sm:$0xff] }
 0xfe5   :  { %v2151_v59 = vpop.f32.mrf.mxu2 }
 0xfe6   :  { %v2154_v4 = vmul.f32 0.125, %v2151_v59  ;;  %v2380_v59 = vld [vmem:[%s3918_s1 + $0x8c8] sm:$0xff] }
 0xfe8   :  { %v2155_v14 = vmul.f32 %v2154_v4, %v2154_v4 }
 0xfea   :  { %v2157_v17 = vrot.slane %v2155_v14, 7 }
 0xfec   :  { %v2159_v20 = vsub.f32 %v2154_v4, %v2157_v17 }
 0xfee   :  { %v2161_v2 = vadd.f32 1e-05, %v2159_v20 }
 0xff0   :  { %2679 = vrsqrt.f32 %v2161_v2  ;;  %vm2168_vm4 = vweird.f32 %v2161_v2 }
 0xff6   :  { %v2680_v62 = vpop.eup %2679 }
 0xff7   :  { %v2163_v1 = vmul.f32 %v2680_v62, %v2161_v2  ;;  %vm2169_vm15 = vweird.f32 %v2680_v62 }
 0xff8   :  { %vm2170_vm5 = vmor %vm2168_vm4, %vm2169_vm15 }
 0xff9   :  { %v2164_v15 = vmul.f32 %v2680_v62, %v2163_v1 }
 0xffb   :  { %v2165_v21 = vmul.f32 0.5, %v2164_v15 }
 0xffd   :  { %v2166_v22 = vsub.f32 1.5, %v2165_v21 }
 0xfff   :  { %v2167_v23 = vmul.f32 %v2680_v62, %v2166_v22 }
0x1001   :  { %v2171_v25 = vsel %vm2170_vm5, %v2680_v62, %v2167_v23 }
0x1002   :  { %v2173_v26 = vrot.slane %v2171_v25, 1 }
0x1004   :  { %v2175_v27 = vmul.f32 %v2173_v26, %v2160_v24 }
0x1006   :  { %v2176_v28 = vmul.f32 %v2175_v27, %v2154_v4  ;;  %v2379_v4 = vld [vmem:[%s3918_s1 + $0x8c0] sm:$0xff] }
0x1008   :  { %v2178_v29 = vrot.slane %v2176_v28, 7 }
0x100a   :  { %v2180_v30 = vsub.f32 %v2160_v24, %v2178_v29 }
0x100c   :  { %v2181_v31 = vsel %vm327_vm3, %v2175_v27, %v2180_v30 }
0x100d   :  { %2653 = vmatmul.msk.f32.vlgmr.msra.gmra.mxu3 %vm164_vm1, %v2181_v31  ;;  %v2440_v31 = vld [vmem:[%s3918_s1 + $0x910] sm:$0xff] }
0x100e   :  { %2456 = vmatpush.msra.mxu2 %v2440_v31  ;;  %2491 = vmatpush.msra.mxu3 %v2479_v38 }
0x1010   :  { %2457 = vmatpush.msra.mxu2 %v2439_v33  ;;  %2492 = vmatpush.msra.mxu3 %v2478_v39 }
0x1012   :  { %2458 = vmatpush.msra.mxu2 %v2438_v35  ;;  %2493 = vmatpush.msra.mxu3 %v2477_v43 }
0x1014   :  { %2459 = vmatpush.msra.mxu2 %v2437_v36 }
0x1090   :  { %v2206_v44 = vpop.f32.mrf.mxu3 }
0x1091   :  { %v2209_v45 = vperm.slane %v2206_v44, 0  ;;  %v2211_v47 = vperm.slane %v2206_v44, 1 }
0x1093   :  { %v2210_v46 = vmul.f32 %v2209_v45, %v3702_v52  ;;  %v2336_v52 = vld [vmem:[%s3918_s1 + $0x8a8] sm:$0xff] }
0x1095   :  { %v2212_v48 = vadd.f32 %v2211_v47, %v2210_v46 }
0x1097   :  { %v2214_v49 = vmul.f32 0.2, %v2212_v48  ;;  %vm2213_vm6 = vcmp.gt.f32.partialorder %v2212_v48, 0.0 }
0x1099   :  { %v2215_v51 = vsel %vm2213_vm6, %v2212_v48, %v2214_v49 }
0x109a   :  { %2654 = vmatpush.msk.msrb.mxu0 %vm2221_vm7, %v2215_v51  ;;  %2656 = vmatpush.msk.msra.mxu1 %vm2221_vm7, %v2215_v51 }
0x109b   :  { %2658 = vmatmul.msk.f32.vlgmr.msrb.gmra.mxu2 %vm24_vm0, %v2215_v51  ;;  %2655 = vmatmul.msk.f32.vlgmr.msrb.gmra.mxu0 %vm2217_vm2, %v2216_v50  ;;  %v2415_v50 = vld [vmem:[%s3918_s1 + $0x918] sm:$0x3] }
0x109c   :  { %2657 = vmatmul.msk.f32.vlgmr.msra.gmra.mxu1 %vm2217_vm2, %v2245_v53  ;;  %2349 = vmatpush.msra.mxu0 %v2337_v54 }
0x109d   :  { %2397 = vmatpush.msrb.mxu1 %v2385_v8  ;;  %v2473_v8 = vld [vmem:[%s3918_s1 + $0x928] sm:$0xff] }
0x109e   :  { %2350 = vmatpush.msra.mxu0 %v2336_v52 }
0x109f   :  { %2398 = vmatpush.msrb.mxu1 %v2384_v9  ;;  %v2507_v9 = vld [vmem:[%s3918_s1 + $0x970] sm:$0xff] }
0x10a0   :  { %2351 = vmatpush.msra.mxu0 %v2335_v55 }
0x10a1   :  { %2399 = vmatpush.msrb.mxu1 %v2383_v10  ;;  %v2472_v10 = vld [vmem:[%s3918_s1 + $0x920] sm:$0xff] }
0x10a2   :  { %2352 = vmatpush.msra.mxu0 %v2334_v57 }
0x10a3   :  { %2400 = vmatpush.msrb.mxu1 %v2382_v11  ;;  %v2506_v11 = vld [vmem:[%s3918_s1 + $0x968] sm:$0xff] }
0x10a4   :  { %2353 = vmatpush.msra.mxu0 %v2333_v58  ;;  %v2476_v58 = vld [vmem:[%s3918_s1 + $0x940] sm:$0xff] }
0x10a5   :  { %2401 = vmatpush.msrb.mxu1 %v2381_v12  ;;  %2494 = vmatpush.msra.mxu3 %v2476_v58  ;;  %v2505_v12 = vld [vmem:[%s3918_s1 + $0x960] sm:$0xff] }
0x10a6   :  { %2354 = vmatpush.msra.mxu0 %v2332_v60  ;;  %v2510_v60 = vld [vmem:[%s3918_s1 + $0x988] sm:$0xff] }
0x10a7   :  { %2402 = vmatpush.msrb.mxu1 %v2380_v59 }
0x10a8   :  { %2355 = vmatpush.msra.mxu0 %v2331_v61  ;;  %v2475_v61 = vld [vmem:[%s3918_s1 + $0x938] sm:$0xff] }
0x10a9   :  { %2403 = vmatpush.msrb.mxu1 %v2379_v4  ;;  %2495 = vmatpush.msra.mxu3 %v2475_v61 }
0x10aa   :  { %2356 = vmatpush.msra.mxu0 %v2330_v63  ;;  %v2509_v63 = vld [vmem:[%s3918_s1 + $0x980] sm:$0xff] }
0x10ab   :  { %2404 = vmatpush.msrb.mxu1 %v2378_v13 }
0x10ac   :  { %2524 = vmatpush.msrb.mxu0 %v2512_v40 }
0x10ae   :  { %2525 = vmatpush.msrb.mxu0 %v2511_v42 }
0x10b0   :  { %2526 = vmatpush.msrb.mxu0 %v2510_v60 }
0x10b2   :  { %2527 = vmatpush.msrb.mxu0 %v2509_v63 }
0x1118   :  { %v2242_v3 = vpop.f32.mrf.mxu0 }
0x1119   :  { %2659 = vmatmul.msk.f32.vlgmr.msrb.gmra.mxu3 %vm24_vm0, %v2242_v3  ;;  %v2266_v7 = vpop.f32.mrf.mxu1  ;;  %v2474_v3 = vld [vmem:[%s3918_s1 + $0x930] sm:$0xff] }
0x111a   :  { %2660 = vmatmul.msk.f32.vlgmr.msra.gmra.mxu0 %vm24_vm0, %v2266_v7  ;;  %v2508_v7 = vld [vmem:[%s3918_s1 + $0x978] sm:$0xff]  ;;  %2496 = vmatpush.msra.mxu3 %v2474_v3 }
0x111b   :  { %2528 = vmatpush.msrb.mxu0 %v2508_v7 }
0x111c   :  { %2497 = vmatpush.msra.mxu3 %v2473_v8 }
0x111d   :  { %2529 = vmatpush.msrb.mxu0 %v2507_v9 }
0x111e   :  { %v2304_v14 = vpop.f32.mrf.mxu2  ;;  %2498 = vmatpush.msra.mxu3 %v2472_v10 }
0x111f   :  { %2530 = vmatpush.msrb.mxu0 %v2506_v11 }
0x1121   :  { %2531 = vmatpush.msrb.mxu0 %v2505_v12 }
0x1197   :  { %v2358_v17 = vpop.f32.mrf.mxu0 }
0x119c   :  { %v2327_v16 = vpop.f32.mrf.mxu3 }
0x119d   :  { %v2328_v18 = vadd.f32 %v2327_v16, %v2304_v14 }
0x119f   :  { %v3834_v19 = vadd.f32 %v2358_v17, %v2328_v18 }
0x11a1   :  { %v2362_v20 = vsel %vm2106_vm10, %v3834_v19, 0.0  ;;  %v2369_v0 = vmul.f32 %v3834_v19, %v3834_v19 }
0x11a2   :  { %v2363_v6 = vrot.slane %v2362_v20, 4 }
0x11a3   :  { %v2370_v2 = vsel %vm2106_vm10, %v2369_v0, 0.0  ;;  %v2666_v0 = vld [vmem:[%s3918_s1 + $0x9a0] ss:$0 sm:$0xff] }
0x11a4   :  { %v2364_v5 = vadd.f32 %v2363_v6, %v2362_v20  ;;  %v2371_v62 = vrot.slane %v2370_v2, 4 }
0x11a6   :  { %v2365_v1 = vrot.slane %v2364_v5, 2  ;;  %v2372_v15 = vadd.f32 %v2371_v62, %v2370_v2 }
0x11a8   :  { %v2366_v21 = vadd.f32 %v2365_v1, %v2364_v5  ;;  %v2373_v22 = vrot.slane %v2372_v15, 2 }
0x11aa   :  { %v2367_v23 = vrot.slane %v2366_v21, 1  ;;  %v2374_v24 = vadd.f32 %v2373_v22, %v2372_v15 }
0x11ac   :  { %v2375_v25 = vrot.slane %v2374_v24, 1  ;;  %v2368_v26 = vadd.f32 %v2367_v23, %v2366_v21 }
0x11ae   :  { %v2376_v27 = vadd.f32 %v2375_v25, %v2374_v24 }
0x11b0   :  { %v2377_v28 = vsel %vm327_vm3, %v2368_v26, %v2376_v27 }
0x11b1   :  { %2661 = vmatmul.msk.f32.vlgmr.msrb.gmra.mxu1 %vm24_vm0, %v2377_v28 }
0x122e   :  { %v2406_v29 = vpop.f32.mrf.mxu1 }
0x122f   :  { %v2409_v30 = vmul.f32 0.125, %v2406_v29 }
0x1231   :  { %v2410_v32 = vmul.f32 %v2409_v30, %v2409_v30 }
0x1233   :  { %v2412_v34 = vrot.slane %v2410_v32, 7 }
0x1235   :  { %v2414_v37 = vsub.f32 %v2409_v30, %v2412_v34 }
0x1237   :  { %v2416_v41 = vadd.f32 1e-05, %v2414_v37 }
0x1239   :  { %2681 = vrsqrt.f32 %v2416_v41  ;;  %vm2423_vm9 = vweird.f32 %v2416_v41 }
0x123f   :  { %v2682_v44 = vpop.eup %2681 }
0x1240   :  { %v2418_v45 = vmul.f32 %v2682_v44, %v2416_v41  ;;  %vm2424_vm8 = vweird.f32 %v2682_v44 }
0x1241   :  { %vm2425_vm11 = vmor %vm2423_vm9, %vm2424_vm8 }
0x1242   :  { %v2419_v46 = vmul.f32 %v2682_v44, %v2418_v45 }
0x1244   :  { %v2420_v47 = vmul.f32 0.5, %v2419_v46 }
0x1246   :  { %v2421_v48 = vsub.f32 1.5, %v2420_v47 }
0x1248   :  { %v2422_v49 = vmul.f32 %v2682_v44, %v2421_v48 }
0x124a   :  { %v2426_v51 = vsel %vm2425_vm11, %v2682_v44, %v2422_v49 }
0x124b   :  { %v2428_v53 = vrot.slane %v2426_v51, 1 }
0x124d   :  { %v2430_v54 = vmul.f32 %v2428_v53, %v2415_v50 }
0x124f   :  { %v2431_v52 = vmul.f32 %v2430_v54, %v2409_v30 }
0x1251   :  { %v2433_v55 = vrot.slane %v2431_v52, 7 }
0x1253   :  { %v2435_v56 = vsub.f32 %v2415_v50, %v2433_v55 }
0x1255   :  { %v2436_v57 = vsel %vm327_vm3, %v2430_v54, %v2435_v56  ;;  %vm2537_vm3 = vcmask 74752  }
0x1256   :  { %2662 = vmatmul.msk.f32.vlgmr.msra.gmra.mxu2 %vm164_vm1, %v2436_v57 }
0x12d9   :  { %v2461_v59 = vpop.f32.mrf.mxu2 }
0x12da   :  { %v2464_v4 = vperm.slane %v2461_v59, 0  ;;  %v2466_v14 = vperm.slane %v2461_v59, 1 }
0x12dc   :  { %v2465_v13 = vmul.f32 %v2464_v4, %v3834_v19 }
0x12de   :  { %v2467_v16 = vadd.f32 %v2466_v14, %v2465_v13 }
0x12e0   :  { %vm2468_vm1 = vcmp.gt.f32.partialorder %v2467_v16, 0.0  ;;  %v2469_v17 = vmul.f32 0.2, %v2467_v16 }
0x12e2   :  { %v2470_v18 = vsel %vm2468_vm1, %v2467_v16, %v2469_v17 }
0x12e3   :  { %v2513_v20 = vrot.slane %v2470_v18, 2  ;;  %2663 = vmatmul.msk.f32.vlgmr.msra.gmra.mxu3 %vm24_vm0, %v2470_v18 }
0x12e5   :  { %2664 = vmatmul.msk.f32.vlgmr.msrb.gmra.mxu0 %vm24_vm0, %v2513_v20 }
0x1362   :  { %v2533_v2 = vpop.f32.mrf.mxu0 }
0x1366   :  { %v2500_v6 = vpop.f32.mrf.mxu3 }
0x1367   :  { %v2504_v19 = vadd.f32 %v2666_v0, %v2500_v6 }
0x1369   :  { %v2536_v5 = vadd.f32 %v2533_v2, %v2504_v19 }
0x136b   :  { %2538 = vst.msk [vmem:[#allocation2] sm:$0x3] %vm2537_vm3, %v2536_v5 }
0x136c   :  { %2549 = dma.vmem_to_hbm [thread:$0]  %s2545_s0, 32, %s2547_s9, [#allocation3]  }
0x136d   :  { %2707 = dma.done.wait [#allocation3], 32  }
0x136e   :  { %2708 = vsyncadd [#allocation3], 4294967264 }
0x136f   :  { %2554 = vsyncpa [#allocation3], 1 }

</bundles_post_ra>
